<compile_context>
chip_gen: v6e
topology: v6e:2x2x1
jax: 0.10.0
libtpu: 0.0.40
codegen_flags: <defaults>
</compile_context>

<pallas_src>
import numpy as np

import jax
import jax.numpy as jnp
from jax.experimental import pallas as pl
from jax.experimental.pallas import tpu as pltpu

BN_EPS = 1e-5
PA = 128                     # padded channel width for Block1..layer3 (real <= 128)
PB = 256                     # padded channel width for Block4 / fc1
N_RES = (2, 3, 5)            # res blocks in layer1 / layer2 / layer3
_VMEM = pl.BlockSpec(memory_space=pltpu.MemorySpace.VMEM)


# ----------------------------------------------------------------------------
# Fused Pallas kernel: entire textCNN forward
# ----------------------------------------------------------------------------
def _build_kernel(batch, width, out_rows):
    rows = batch * width

    def kernel(x_ref, wa1_ref, wad_ref, wa3_ref, ba1_ref, bad_ref, ba3_ref,
               wba_ref, wbd_ref, wb3_ref, wbfc_ref,
               bba_ref, bbd_ref, bb3_ref, bbfc_ref, o_ref):
        # Row offset within each sequence (row = b*width + w).  Used for the
        # dilated-conv boundary masks and the final (valid-row) average pool.
        off = jax.lax.broadcasted_iota(jnp.int32, (rows, 1), 0) % width
        # For each valid-row stride rs: zero the rows whose rolled neighbour is
        # the conv's zero padding (or belongs to another sequence / wraps).
        masks = {rs: ((off >= rs).astype(jnp.float32),
                      (off <= width - 2 * rs).astype(jnp.float32))
                 for rs in (1, 2, 4)}

        idx = {"a1": 0, "ad": 0, "a3": 0}

        def mm(a, w):
            # bf16 x bf16 on the MXU, f32 accumulation (BN scale pre-folded in w).
            return jnp.dot(a.astype(jnp.bfloat16), w,
                           preferred_element_type=jnp.float32)

        def conv_dil(a, rs, w, b):
            # Conv2d k=(1,2), pad=(0,1), dilation=(1,2): taps at rows r-rs / r+rs.
            # XLU sublane rolls + boundary masks; both taps in one K-concat matmul.
            lo, hi = masks[rs]
            left = pltpu.roll(a, shift=rs, axis=0) * lo
            right = pltpu.roll(a, shift=rows - rs, axis=0) * hi
            y = mm(jnp.concatenate([left, right], axis=1), w) + b
            return jnp.maximum(y, 0.0)

        def conv1x1_A(a, relu=True, residual=None):
            i = idx["a3"]; idx["a3"] += 1
            y = mm(a, wa3_ref[i]) + ba3_ref[i]
            if residual is not None:
                y = y + residual
            return jnp.maximum(y, 0.0) if relu else y

        def conv_dil_A(a, rs):
            i = idx["ad"]; idx["ad"] += 1
            return conv_dil(a, rs, wad_ref[i], bad_ref[i])

        def inception_A(a, rs):
            # Conv1+bn1 and Conv1_1+bn1_1 share the same input -> one N-concat
            # matmul, sliced afterwards.  Stride-2 is implicit (row-stride rs
            # doubles in the caller; only the valid rows are ever consumed).
            i = idx["a1"]; idx["a1"] += 1
            y = mm(a, wa1_ref[i]) + ba1_ref[i]
            h = jnp.maximum(y[:, :PA], 0.0)           # relu(bn1(Conv1(x)))
            short = y[:, PA:]                         # bn1_1(Conv1_1(x))
            h = conv_dil_A(h, rs)                     # relu(bn2(Conv2(h)))
            h = conv1x1_A(h, relu=False)              # bn3(Conv3(h))
            return jnp.maximum(short + h, 0.0)

        def res_A(a, rs):
            h = conv1x1_A(a, relu=True)               # conv1 + bn1 + relu
            h = conv_dil_A(h, rs)                     # conv2 + bn2 + relu
            return conv1x1_A(h, relu=True, residual=a)  # conv3 + bn3 (+id) + relu

        act = x_ref[...]                              # (rows, PA) f32
        rs = 1                                        # current valid-row stride
        act = inception_A(act, rs)                    # Block1
        for _ in range(N_RES[0]):
            act = res_A(act, rs)                      # layer1
        act = inception_A(act, rs); rs *= 2           # Block2 (hidden_stride = 2)
        for _ in range(N_RES[1]):
            act = res_A(act, rs)                      # layer2
        act = inception_A(act, rs); rs *= 2           # Block3 (hidden_stride = 2)
        for _ in range(N_RES[2]):
            act = res_A(act, rs)                      # layer3

        # ---- Block4 (256-wide stage) -------------------------------------
        y = mm(act, wba_ref[...]) + bba_ref[...]      # Conv1 || Conv1_1
        h = jnp.maximum(y[:, :PB], 0.0)
        short = y[:, PB:]
        h = conv_dil(h, rs, wbd_ref[...], bbd_ref[...])
        h = mm(h, wb3_ref[...]) + bb3_ref[...]
        act = jnp.maximum(short + h, 0.0)             # (rows, PB)

        # ---- AdaptiveAvgPool2d((1,1)): average the valid rows per sequence --
        n_valid = width // rs
        pool_w = jnp.where(off % rs == 0, 1.0 / n_valid, 0.0)   # (rows, 1)
        masked = act * pool_w
        parts = [jnp.sum(masked[b * width:(b + 1) * width, :], axis=0, keepdims=True)
                 for b in range(batch)]
        if out_rows > batch:
            parts.append(jnp.zeros((out_rows - batch, PB), jnp.float32))
        pooled = jnp.concatenate(parts, axis=0)       # (out_rows, PB)

        # ---- fc1 -> BatchNorm1d -> ReLU (Dropout(0.75) = identity, eval) ---
        o_ref[...] = jnp.maximum(mm(pooled, wbfc_ref[...]) + bbfc_ref[...], 0.0)

    return kernel


# ----------------------------------------------------------------------------
# Deterministic synthetic parameters, packed in kernel-consumption order
# ----------------------------------------------------------------------------
def _init_bn(key, c):
    k1, k2, k3, k4 = jax.random.split(key, 4)
    gamma = 1.0 + 0.1 * jax.random.normal(k1, (c,), jnp.float32)
    beta = 0.1 * jax.random.normal(k2, (c,), jnp.float32)
    mean = 0.1 * jax.random.normal(k3, (c,), jnp.float32)
    var = 1.0 + 0.1 * jax.random.uniform(k4, (c,), jnp.float32)
    scale = gamma / jnp.sqrt(var + BN_EPS)            # folded eval-mode BN
    bias = beta - mean * scale
    return scale, bias


def _pad_to(a, r, c):
    out = jnp.zeros((r, c), jnp.float32)
    return out.at[:a.shape[0], :a.shape[1]].set(a)


def init_textcnn(key, vocab, c_emb):
    assert c_emb <= PA
    keys = iter(jax.random.split(key, 512))
    nk = lambda: next(keys)

    wa1, ba1, wad, bad, wa3, ba3 = [], [], [], [], [], []

    def folded_1x1(cin, cout):
        w = jax.random.normal(nk(), (cin, cout), jnp.float32) / np.sqrt(cin)
        s, b = _init_bn(nk(), cout)
        return w * s[None, :], b[None, :]             # BN scale folded into W

    def folded_dil(cin, cout):
        w = jax.random.normal(nk(), (2, cin, cout), jnp.float32) / np.sqrt(2 * cin)
        s, b = _init_bn(nk(), cout)
        return w[0] * s[None, :], w[1] * s[None, :], b[None, :]

    def pack_dil(cin, cout, pk, pn):                  # K-concat the two taps
        d0, d1, b = folded_dil(cin, cout)
        w = jnp.concatenate([_pad_to(d0, pk, pn), _pad_to(d1, pk, pn)], axis=0)
        return w, _pad_to(b, 1, pn)

    def add_inception_A(cin, chid, cout):
        w1, b1 = folded_1x1(cin, chid)                # Conv1 / bn1
        w11, b11 = folded_1x1(cin, cout)              # Conv1_1 / bn1_1
        wa1.append(jnp.concatenate([_pad_to(w1, PA, PA), _pad_to(w11, PA, PA)], axis=1))
        ba1.append(jnp.concatenate([_pad_to(b1, 1, PA), _pad_to(b11, 1, PA)], axis=1))
        wd, bd = pack_dil(chid, chid, PA, PA)         # Conv2 / bn2
        wad.append(wd); bad.append(bd)
        w3, b3 = folded_1x1(chid, cout)               # Conv3 / bn3
        wa3.append(_pad_to(w3, PA, PA)); ba3.append(_pad_to(b3, 1, PA))

    def add_res(cin, chid):
        w1, b1 = folded_1x1(cin, chid)
        wa3.append(_pad_to(w1, PA, PA)); ba3.append(_pad_to(b1, 1, PA))
        wd, bd = pack_dil(chid, chid, PA, PA)
        wad.append(wd); bad.append(bd)
        w3, b3 = folded_1x1(chid, cin)
        wa3.append(_pad_to(w3, PA, PA)); ba3.append(_pad_to(b3, 1, PA))

    # Original widths (300/128/256, 64, 512, 128, 1024, 256, 2048) scaled ~8x.
    add_inception_A(c_emb, 16, 32)                    # Block1
    for _ in range(N_RES[0]):
        add_res(32, 8)                                # layer1
    add_inception_A(32, 64, 64)                       # Block2 (stride 2)
    for _ in range(N_RES[1]):
        add_res(64, 16)                               # layer2
    add_inception_A(64, 128, 128)                     # Block3 (stride 2)
    for _ in range(N_RES[2]):
        add_res(128, 32)                              # layer3
    assert len(wa1) == 3 and len(wad) == 13 and len(wa3) == 23

    # Block4 (256-wide stage).
    w1, b1 = folded_1x1(128, 256)
    w11, b11 = folded_1x1(128, 256)
    wb_a = jnp.concatenate([w1, w11], axis=1)         # (128, 512)
    bb_a = jnp.concatenate([b1, b11], axis=1)         # (1, 512)
    wb_d, bb_d = pack_dil(256, 256, PB, PB)           # (512, 256), (1, 256)
    wb_3, bb_3 = folded_1x1(256, 256)

    # fc1 + fc1_bn (fc bias folded into the BN bias).
    fc_w = jax.random.normal(nk(), (256, 256), jnp.float32) / np.sqrt(256)
    fc_b = 0.01 * jax.random.normal(nk(), (256,), jnp.float32)
    s, b = _init_bn(nk(), 256)
    wb_fc = fc_w * s[None, :]
    bb_fc = (s * fc_b + b)[None, :]

    # Embedding table pre-padded to PA channels (padded lanes stay exactly 0).
    emb = jax.random.normal(nk(), (vocab, c_emb), jnp.float32)
    emb = jnp.pad(emb, ((0, 0), (0, PA - c_emb)))

    bf = jnp.bfloat16
    return dict(
        emb=emb,
        wa1=jnp.stack(wa1).astype(bf), ba1=jnp.stack(ba1),
        wad=jnp.stack(wad).astype(bf), bad=jnp.stack(bad),
        wa3=jnp.stack(wa3).astype(bf), ba3=jnp.stack(ba3),
        wb_a=wb_a.astype(bf), bb_a=bb_a,
        wb_d=wb_d.astype(bf), bb_d=bb_d,
        wb_3=wb_3.astype(bf), bb_3=bb_3,
        wb_fc=wb_fc.astype(bf), bb_fc=bb_fc,
    )


# ----------------------------------------------------------------------------
# Forward pass (mirrors textCNN.forward) — one fused pallas_call
# ----------------------------------------------------------------------------
def textcnn_forward(params, token_ids):
    batch, seq_len = token_ids.shape
    assert seq_len % 4 == 0, "two stride-2 stages need seq_len % 4 == 0"
    out_rows = max(8, -(-batch // 8) * 8)             # sublane-aligned output rows

    # Embedding lookup (indexing glue, not the hot path); channels pre-padded.
    x = jnp.take(params["emb"], token_ids.reshape(-1), axis=0)   # (B*L, PA) f32

    kernel = _build_kernel(batch, seq_len, out_rows)
    out = pl.pallas_call(
        kernel,
        out_shape=jax.ShapeDtypeStruct((out_rows, PB), jnp.float32),
        in_specs=[_VMEM] * 15,
        out_specs=_VMEM,
    )(x, params["wa1"], params["wad"], params["wa3"],
      params["ba1"], params["bad"], params["ba3"],
      params["wb_a"], params["wb_d"], params["wb_3"], params["wb_fc"],
      params["bb_a"], params["bb_d"], params["bb_3"], params["bb_fc"])

    return out[:batch]                                            # (B, 256)


# ----------------------------------------------------------------------------
if __name__ == "__main__":
    key = jax.random.PRNGKey(0)
    k_params, k_ids = jax.random.split(key)

    VOCAB, C_EMB, B, L = 64, 32, 2, 16
    params = init_textcnn(k_params, vocab=VOCAB, c_emb=C_EMB)
    token_ids = jax.random.randint(k_ids, (B, L), 0, VOCAB, dtype=jnp.int32)

    fwd = jax.jit(textcnn_forward)
    out = jax.block_until_ready(fwd(params, token_ids))

    assert out.shape == (B, 256), out.shape
    assert bool(jnp.all(jnp.isfinite(out)))
    print("KERNEL_OK")
</pallas_src>

<mosaic_0001>
module attributes {stable_mosaic.version = 11 : i64} {
  func.func @kernel(%arg0: memref<32x128xf32, #tpu.memory_space<vmem>>, %arg1: memref<3x128x256xbf16, #tpu.memory_space<vmem>>, %arg2: memref<13x256x128xbf16, #tpu.memory_space<vmem>>, %arg3: memref<23x128x128xbf16, #tpu.memory_space<vmem>>, %arg4: memref<3x1x256xf32, #tpu.memory_space<vmem>>, %arg5: memref<13x1x128xf32, #tpu.memory_space<vmem>>, %arg6: memref<23x1x128xf32, #tpu.memory_space<vmem>>, %arg7: memref<128x512xbf16, #tpu.memory_space<vmem>>, %arg8: memref<512x256xbf16, #tpu.memory_space<vmem>>, %arg9: memref<256x256xbf16, #tpu.memory_space<vmem>>, %arg10: memref<256x256xbf16, #tpu.memory_space<vmem>>, %arg11: memref<1x512xf32, #tpu.memory_space<vmem>>, %arg12: memref<1x256xf32, #tpu.memory_space<vmem>>, %arg13: memref<1x256xf32, #tpu.memory_space<vmem>>, %arg14: memref<1x256xf32, #tpu.memory_space<vmem>>, %arg15: memref<8x256xf32, #tpu.memory_space<vmem>>) attributes {dimension_semantics = [], scalar_prefetch = 0 : i64, scratch_operands = 0 : i64, tpu.core_type = #tpu.core_type<tc>} {
    %0 = tpu.iota {dimensions = array<i32: 0>} : vector<32x1xi32>
    %c16_i32 = arith.constant 16 : i32
    %c0_i32 = arith.constant 0 : i32
    %1 = arith.cmpi eq, %c16_i32, %c0_i32 : i32
    %c1_i32 = arith.constant 1 : i32
    %2 = arith.select %1, %c1_i32, %c16_i32 : i32
    %3 = vector.broadcast %2 : i32 to vector<32x1xi32>
    %4 = arith.remsi %0, %3 : vector<32x1xi32>
    %c0_i32_0 = arith.constant 0 : i32
    %5 = vector.broadcast %c0_i32_0 : i32 to vector<32x1xi32>
    %6 = arith.cmpi ne, %4, %5 : vector<32x1xi32>
    %c0_i32_1 = arith.constant 0 : i32
    %7 = vector.broadcast %c0_i32_1 : i32 to vector<32x1xi32>
    %8 = arith.cmpi slt, %4, %7 : vector<32x1xi32>
    %c0_i32_2 = arith.constant 0 : i32
    %9 = arith.cmpi slt, %2, %c0_i32_2 : i32
    %10 = vector.broadcast %9 : i1 to vector<32x1xi1>
    %11 = vector.broadcast %10 : vector<32x1xi1> to vector<32x1xi1>
    %12 = arith.xori %8, %11 : vector<32x1xi1>
    %13 = arith.andi %12, %6 : vector<32x1xi1>
    %14 = vector.broadcast %2 : i32 to vector<32x1xi32>
    %15 = arith.addi %4, %14 : vector<32x1xi32>
    %16 = arith.select %13, %15, %4 : vector<32x1xi1>, vector<32x1xi32>
    %c1_i32_3 = arith.constant 1 : i32
    %17 = vector.broadcast %c1_i32_3 : i32 to vector<32x1xi32>
    %18 = arith.cmpi sge, %16, %17 : vector<32x1xi32>
    %19 = arith.extui %18 : vector<32x1xi1> to vector<32x1xi32>
    %20 = arith.sitofp %19 : vector<32x1xi32> to vector<32x1xf32>
    %c14_i32 = arith.constant 14 : i32
    %21 = vector.broadcast %c14_i32 : i32 to vector<32x1xi32>
    %22 = arith.cmpi sle, %16, %21 : vector<32x1xi32>
    %23 = arith.extui %22 : vector<32x1xi1> to vector<32x1xi32>
    %24 = arith.sitofp %23 : vector<32x1xi32> to vector<32x1xf32>
    %c2_i32 = arith.constant 2 : i32
    %25 = vector.broadcast %c2_i32 : i32 to vector<32x1xi32>
    %26 = arith.cmpi sge, %16, %25 : vector<32x1xi32>
    %27 = arith.extui %26 : vector<32x1xi1> to vector<32x1xi32>
    %28 = arith.sitofp %27 : vector<32x1xi32> to vector<32x1xf32>
    %c12_i32 = arith.constant 12 : i32
    %29 = vector.broadcast %c12_i32 : i32 to vector<32x1xi32>
    %30 = arith.cmpi sle, %16, %29 : vector<32x1xi32>
    %31 = arith.extui %30 : vector<32x1xi1> to vector<32x1xi32>
    %32 = arith.sitofp %31 : vector<32x1xi32> to vector<32x1xf32>
    %c4_i32 = arith.constant 4 : i32
    %33 = vector.broadcast %c4_i32 : i32 to vector<32x1xi32>
    %34 = arith.cmpi sge, %16, %33 : vector<32x1xi32>
    %35 = arith.extui %34 : vector<32x1xi1> to vector<32x1xi32>
    %36 = arith.sitofp %35 : vector<32x1xi32> to vector<32x1xf32>
    %c8_i32 = arith.constant 8 : i32
    %37 = vector.broadcast %c8_i32 : i32 to vector<32x1xi32>
    %38 = arith.cmpi sle, %16, %37 : vector<32x1xi32>
    %39 = arith.extui %38 : vector<32x1xi1> to vector<32x1xi32>
    %40 = arith.sitofp %39 : vector<32x1xi32> to vector<32x1xf32>
    %c0 = arith.constant 0 : index
    %c0_4 = arith.constant 0 : index
    %41 = vector.load %arg0[%c0, %c0_4] : memref<32x128xf32, #tpu.memory_space<vmem>>, vector<32x128xf32>
    %c0_5 = arith.constant 0 : index
    %c0_6 = arith.constant 0 : index
    %c0_7 = arith.constant 0 : index
    %42 = vector.load %arg1[%c0_5, %c0_6, %c0_7] : memref<3x128x256xbf16, #tpu.memory_space<vmem>>, vector<1x128x256xbf16>
    %43 = vector.shape_cast %42 : vector<1x128x256xbf16> to vector<128x256xbf16>
    %44 = arith.truncf %41 : vector<32x128xf32> to vector<32x128xbf16>
    %cst = arith.constant dense<0.000000e+00> : vector<32x256xf32>
    %45 = tpu.matmul %44, %43, %cst {dimension_numbers = #tpu.dot_dimension_numbers<[1], [0], [0], [1], [0, 0, 1, 1], [], []>} : vector<32x128xbf16>, vector<128x256xbf16>, vector<32x256xf32> -> vector<32x256xf32>
    %c0_8 = arith.constant 0 : index
    %c0_9 = arith.constant 0 : index
    %c0_10 = arith.constant 0 : index
    %46 = vector.load %arg4[%c0_8, %c0_9, %c0_10] : memref<3x1x256xf32, #tpu.memory_space<vmem>>, vector<1x1x256xf32>
    %47 = vector.shape_cast %46 : vector<1x1x256xf32> to vector<1x256xf32>
    %48 = vector.broadcast %47 : vector<1x256xf32> to vector<32x256xf32>
    %49 = arith.addf %45, %48 : vector<32x256xf32>
    %50 = vector.extract_strided_slice %49 {offsets = [0, 0], sizes = [32, 128], strides = [1, 1]} : vector<32x256xf32> to vector<32x128xf32>
    %cst_11 = arith.constant 0.000000e+00 : f32
    %51 = vector.broadcast %cst_11 : f32 to vector<32x128xf32>
    %52 = arith.maximumf %50, %51 : vector<32x128xf32>
    %53 = vector.extract_strided_slice %49 {offsets = [0, 128], sizes = [32, 128], strides = [1, 1]} : vector<32x256xf32> to vector<32x128xf32>
    %c0_12 = arith.constant 0 : index
    %c0_13 = arith.constant 0 : index
    %c0_14 = arith.constant 0 : index
    %54 = vector.load %arg2[%c0_12, %c0_13, %c0_14] : memref<13x256x128xbf16, #tpu.memory_space<vmem>>, vector<1x256x128xbf16>
    %55 = vector.shape_cast %54 : vector<1x256x128xbf16> to vector<256x128xbf16>
    %c0_15 = arith.constant 0 : index
    %c0_16 = arith.constant 0 : index
    %c0_17 = arith.constant 0 : index
    %56 = vector.load %arg5[%c0_15, %c0_16, %c0_17] : memref<13x1x128xf32, #tpu.memory_space<vmem>>, vector<1x1x128xf32>
    %57 = vector.shape_cast %56 : vector<1x1x128xf32> to vector<1x128xf32>
    %c1_i32_18 = arith.constant 1 : i32
    %58 = tpu.dynamic_rotate %52 by %c1_i32_18 dim 0 : vector<32x128xf32>, i32 -> vector<32x128xf32>
    %59 = vector.broadcast %20 : vector<32x1xf32> to vector<32x128xf32>
    %60 = arith.mulf %58, %59 : vector<32x128xf32>
    %c31_i32 = arith.constant 31 : i32
    %61 = tpu.dynamic_rotate %52 by %c31_i32 dim 0 : vector<32x128xf32>, i32 -> vector<32x128xf32>
    %62 = vector.broadcast %24 : vector<32x1xf32> to vector<32x128xf32>
    %63 = arith.mulf %61, %62 : vector<32x128xf32>
    %64 = tpu.concatenate %60, %63 in 1 : vector<32x128xf32>, vector<32x128xf32> -> vector<32x256xf32>
    %65 = arith.truncf %64 : vector<32x256xf32> to vector<32x256xbf16>
    %cst_19 = arith.constant dense<0.000000e+00> : vector<32x128xf32>
    %66 = tpu.matmul %65, %55, %cst_19 {dimension_numbers = #tpu.dot_dimension_numbers<[1], [0], [0], [1], [0, 0, 1, 1], [], []>} : vector<32x256xbf16>, vector<256x128xbf16>, vector<32x128xf32> -> vector<32x128xf32>
    %67 = vector.broadcast %57 : vector<1x128xf32> to vector<32x128xf32>
    %68 = arith.addf %66, %67 : vector<32x128xf32>
    %cst_20 = arith.constant 0.000000e+00 : f32
    %69 = vector.broadcast %cst_20 : f32 to vector<32x128xf32>
    %70 = arith.maximumf %68, %69 : vector<32x128xf32>
    %c0_21 = arith.constant 0 : index
    %c0_22 = arith.constant 0 : index
    %c0_23 = arith.constant 0 : index
    %71 = vector.load %arg3[%c0_21, %c0_22, %c0_23] : memref<23x128x128xbf16, #tpu.memory_space<vmem>>, vector<1x128x128xbf16>
    %72 = vector.shape_cast %71 : vector<1x128x128xbf16> to vector<128x128xbf16>
    %73 = arith.truncf %70 : vector<32x128xf32> to vector<32x128xbf16>
    %cst_24 = arith.constant dense<0.000000e+00> : vector<32x128xf32>
    %74 = tpu.matmul %73, %72, %cst_24 {dimension_numbers = #tpu.dot_dimension_numbers<[1], [0], [0], [1], [0, 0, 1, 1], [], []>} : vector<32x128xbf16>, vector<128x128xbf16>, vector<32x128xf32> -> vector<32x128xf32>
    %c0_25 = arith.constant 0 : index
    %c0_26 = arith.constant 0 : index
    %c0_27 = arith.constant 0 : index
    %75 = vector.load %arg6[%c0_25, %c0_26, %c0_27] : memref<23x1x128xf32, #tpu.memory_space<vmem>>, vector<1x1x128xf32>
    %76 = vector.shape_cast %75 : vector<1x1x128xf32> to vector<1x128xf32>
    %77 = vector.broadcast %76 : vector<1x128xf32> to vector<32x128xf32>
    %78 = arith.addf %74, %77 : vector<32x128xf32>
    %79 = arith.addf %53, %78 : vector<32x128xf32>
    %cst_28 = arith.constant 0.000000e+00 : f32
    %80 = vector.broadcast %cst_28 : f32 to vector<32x128xf32>
    %81 = arith.maximumf %79, %80 : vector<32x128xf32>
    %c1 = arith.constant 1 : index
    %c0_29 = arith.constant 0 : index
    %c0_30 = arith.constant 0 : index
    %82 = vector.load %arg3[%c1, %c0_29, %c0_30] : memref<23x128x128xbf16, #tpu.memory_space<vmem>>, vector<1x128x128xbf16>
    %83 = vector.shape_cast %82 : vector<1x128x128xbf16> to vector<128x128xbf16>
    %84 = arith.truncf %81 : vector<32x128xf32> to vector<32x128xbf16>
    %cst_31 = arith.constant dense<0.000000e+00> : vector<32x128xf32>
    %85 = tpu.matmul %84, %83, %cst_31 {dimension_numbers = #tpu.dot_dimension_numbers<[1], [0], [0], [1], [0, 0, 1, 1], [], []>} : vector<32x128xbf16>, vector<128x128xbf16>, vector<32x128xf32> -> vector<32x128xf32>
    %c1_32 = arith.constant 1 : index
    %c0_33 = arith.constant 0 : index
    %c0_34 = arith.constant 0 : index
    %86 = vector.load %arg6[%c1_32, %c0_33, %c0_34] : memref<23x1x128xf32, #tpu.memory_space<vmem>>, vector<1x1x128xf32>
    %87 = vector.shape_cast %86 : vector<1x1x128xf32> to vector<1x128xf32>
    %88 = vector.broadcast %87 : vector<1x128xf32> to vector<32x128xf32>
    %89 = arith.addf %85, %88 : vector<32x128xf32>
    %cst_35 = arith.constant 0.000000e+00 : f32
    %90 = vector.broadcast %cst_35 : f32 to vector<32x128xf32>
    %91 = arith.maximumf %89, %90 : vector<32x128xf32>
    %c1_36 = arith.constant 1 : index
    %c0_37 = arith.constant 0 : index
    %c0_38 = arith.constant 0 : index
    %92 = vector.load %arg2[%c1_36, %c0_37, %c0_38] : memref<13x256x128xbf16, #tpu.memory_space<vmem>>, vector<1x256x128xbf16>
    %93 = vector.shape_cast %92 : vector<1x256x128xbf16> to vector<256x128xbf16>
    %c1_39 = arith.constant 1 : index
    %c0_40 = arith.constant 0 : index
    %c0_41 = arith.constant 0 : index
    %94 = vector.load %arg5[%c1_39, %c0_40, %c0_41] : memref<13x1x128xf32, #tpu.memory_space<vmem>>, vector<1x1x128xf32>
    %95 = vector.shape_cast %94 : vector<1x1x128xf32> to vector<1x128xf32>
    %c1_i32_42 = arith.constant 1 : i32
    %96 = tpu.dynamic_rotate %91 by %c1_i32_42 dim 0 : vector<32x128xf32>, i32 -> vector<32x128xf32>
    %97 = vector.broadcast %20 : vector<32x1xf32> to vector<32x128xf32>
    %98 = arith.mulf %96, %97 : vector<32x128xf32>
    %c31_i32_43 = arith.constant 31 : i32
    %99 = tpu.dynamic_rotate %91 by %c31_i32_43 dim 0 : vector<32x128xf32>, i32 -> vector<32x128xf32>
    %100 = vector.broadcast %24 : vector<32x1xf32> to vector<32x128xf32>
    %101 = arith.mulf %99, %100 : vector<32x128xf32>
    %102 = tpu.concatenate %98, %101 in 1 : vector<32x128xf32>, vector<32x128xf32> -> vector<32x256xf32>
    %103 = arith.truncf %102 : vector<32x256xf32> to vector<32x256xbf16>
    %cst_44 = arith.constant dense<0.000000e+00> : vector<32x128xf32>
    %104 = tpu.matmul %103, %93, %cst_44 {dimension_numbers = #tpu.dot_dimension_numbers<[1], [0], [0], [1], [0, 0, 1, 1], [], []>} : vector<32x256xbf16>, vector<256x128xbf16>, vector<32x128xf32> -> vector<32x128xf32>
    %105 = vector.broadcast %95 : vector<1x128xf32> to vector<32x128xf32>
    %106 = arith.addf %104, %105 : vector<32x128xf32>
    %cst_45 = arith.constant 0.000000e+00 : f32
    %107 = vector.broadcast %cst_45 : f32 to vector<32x128xf32>
    %108 = arith.maximumf %106, %107 : vector<32x128xf32>
    %c2 = arith.constant 2 : index
    %c0_46 = arith.constant 0 : index
    %c0_47 = arith.constant 0 : index
    %109 = vector.load %arg3[%c2, %c0_46, %c0_47] : memref<23x128x128xbf16, #tpu.memory_space<vmem>>, vector<1x128x128xbf16>
    %110 = vector.shape_cast %109 : vector<1x128x128xbf16> to vector<128x128xbf16>
    %111 = arith.truncf %108 : vector<32x128xf32> to vector<32x128xbf16>
    %cst_48 = arith.constant dense<0.000000e+00> : vector<32x128xf32>
    %112 = tpu.matmul %111, %110, %cst_48 {dimension_numbers = #tpu.dot_dimension_numbers<[1], [0], [0], [1], [0, 0, 1, 1], [], []>} : vector<32x128xbf16>, vector<128x128xbf16>, vector<32x128xf32> -> vector<32x128xf32>
    %c2_49 = arith.constant 2 : index
    %c0_50 = arith.constant 0 : index
    %c0_51 = arith.constant 0 : index
    %113 = vector.load %arg6[%c2_49, %c0_50, %c0_51] : memref<23x1x128xf32, #tpu.memory_space<vmem>>, vector<1x1x128xf32>
    %114 = vector.shape_cast %113 : vector<1x1x128xf32> to vector<1x128xf32>
    %115 = vector.broadcast %114 : vector<1x128xf32> to vector<32x128xf32>
    %116 = arith.addf %112, %115 : vector<32x128xf32>
    %117 = arith.addf %116, %81 : vector<32x128xf32>
    %cst_52 = arith.constant 0.000000e+00 : f32
    %118 = vector.broadcast %cst_52 : f32 to vector<32x128xf32>
    %119 = arith.maximumf %117, %118 : vector<32x128xf32>
    %c3 = arith.constant 3 : index
    %c0_53 = arith.constant 0 : index
    %c0_54 = arith.constant 0 : index
    %120 = vector.load %arg3[%c3, %c0_53, %c0_54] : memref<23x128x128xbf16, #tpu.memory_space<vmem>>, vector<1x128x128xbf16>
    %121 = vector.shape_cast %120 : vector<1x128x128xbf16> to vector<128x128xbf16>
    %122 = arith.truncf %119 : vector<32x128xf32> to vector<32x128xbf16>
    %cst_55 = arith.constant dense<0.000000e+00> : vector<32x128xf32>
    %123 = tpu.matmul %122, %121, %cst_55 {dimension_numbers = #tpu.dot_dimension_numbers<[1], [0], [0], [1], [0, 0, 1, 1], [], []>} : vector<32x128xbf16>, vector<128x128xbf16>, vector<32x128xf32> -> vector<32x128xf32>
    %c3_56 = arith.constant 3 : index
    %c0_57 = arith.constant 0 : index
    %c0_58 = arith.constant 0 : index
    %124 = vector.load %arg6[%c3_56, %c0_57, %c0_58] : memref<23x1x128xf32, #tpu.memory_space<vmem>>, vector<1x1x128xf32>
    %125 = vector.shape_cast %124 : vector<1x1x128xf32> to vector<1x128xf32>
    %126 = vector.broadcast %125 : vector<1x128xf32> to vector<32x128xf32>
    %127 = arith.addf %123, %126 : vector<32x128xf32>
    %cst_59 = arith.constant 0.000000e+00 : f32
    %128 = vector.broadcast %cst_59 : f32 to vector<32x128xf32>
    %129 = arith.maximumf %127, %128 : vector<32x128xf32>
    %c2_60 = arith.constant 2 : index
    %c0_61 = arith.constant 0 : index
    %c0_62 = arith.constant 0 : index
    %130 = vector.load %arg2[%c2_60, %c0_61, %c0_62] : memref<13x256x128xbf16, #tpu.memory_space<vmem>>, vector<1x256x128xbf16>
    %131 = vector.shape_cast %130 : vector<1x256x128xbf16> to vector<256x128xbf16>
    %c2_63 = arith.constant 2 : index
    %c0_64 = arith.constant 0 : index
    %c0_65 = arith.constant 0 : index
    %132 = vector.load %arg5[%c2_63, %c0_64, %c0_65] : memref<13x1x128xf32, #tpu.memory_space<vmem>>, vector<1x1x128xf32>
    %133 = vector.shape_cast %132 : vector<1x1x128xf32> to vector<1x128xf32>
    %c1_i32_66 = arith.constant 1 : i32
    %134 = tpu.dynamic_rotate %129 by %c1_i32_66 dim 0 : vector<32x128xf32>, i32 -> vector<32x128xf32>
    %135 = vector.broadcast %20 : vector<32x1xf32> to vector<32x128xf32>
    %136 = arith.mulf %134, %135 : vector<32x128xf32>
    %c31_i32_67 = arith.constant 31 : i32
    %137 = tpu.dynamic_rotate %129 by %c31_i32_67 dim 0 : vector<32x128xf32>, i32 -> vector<32x128xf32>
    %138 = vector.broadcast %24 : vector<32x1xf32> to vector<32x128xf32>
    %139 = arith.mulf %137, %138 : vector<32x128xf32>
    %140 = tpu.concatenate %136, %139 in 1 : vector<32x128xf32>, vector<32x128xf32> -> vector<32x256xf32>
    %141 = arith.truncf %140 : vector<32x256xf32> to vector<32x256xbf16>
    %cst_68 = arith.constant dense<0.000000e+00> : vector<32x128xf32>
    %142 = tpu.matmul %141, %131, %cst_68 {dimension_numbers = #tpu.dot_dimension_numbers<[1], [0], [0], [1], [0, 0, 1, 1], [], []>} : vector<32x256xbf16>, vector<256x128xbf16>, vector<32x128xf32> -> vector<32x128xf32>
    %143 = vector.broadcast %133 : vector<1x128xf32> to vector<32x128xf32>
    %144 = arith.addf %142, %143 : vector<32x128xf32>
    %cst_69 = arith.constant 0.000000e+00 : f32
    %145 = vector.broadcast %cst_69 : f32 to vector<32x128xf32>
    %146 = arith.maximumf %144, %145 : vector<32x128xf32>
    %c4 = arith.constant 4 : index
    %c0_70 = arith.constant 0 : index
    %c0_71 = arith.constant 0 : index
    %147 = vector.load %arg3[%c4, %c0_70, %c0_71] : memref<23x128x128xbf16, #tpu.memory_space<vmem>>, vector<1x128x128xbf16>
    %148 = vector.shape_cast %147 : vector<1x128x128xbf16> to vector<128x128xbf16>
    %149 = arith.truncf %146 : vector<32x128xf32> to vector<32x128xbf16>
    %cst_72 = arith.constant dense<0.000000e+00> : vector<32x128xf32>
    %150 = tpu.matmul %149, %148, %cst_72 {dimension_numbers = #tpu.dot_dimension_numbers<[1], [0], [0], [1], [0, 0, 1, 1], [], []>} : vector<32x128xbf16>, vector<128x128xbf16>, vector<32x128xf32> -> vector<32x128xf32>
    %c4_73 = arith.constant 4 : index
    %c0_74 = arith.constant 0 : index
    %c0_75 = arith.constant 0 : index
    %151 = vector.load %arg6[%c4_73, %c0_74, %c0_75] : memref<23x1x128xf32, #tpu.memory_space<vmem>>, vector<1x1x128xf32>
    %152 = vector.shape_cast %151 : vector<1x1x128xf32> to vector<1x128xf32>
    %153 = vector.broadcast %152 : vector<1x128xf32> to vector<32x128xf32>
    %154 = arith.addf %150, %153 : vector<32x128xf32>
    %155 = arith.addf %154, %119 : vector<32x128xf32>
    %cst_76 = arith.constant 0.000000e+00 : f32
    %156 = vector.broadcast %cst_76 : f32 to vector<32x128xf32>
    %157 = arith.maximumf %155, %156 : vector<32x128xf32>
    %c1_77 = arith.constant 1 : index
    %c0_78 = arith.constant 0 : index
    %c0_79 = arith.constant 0 : index
    %158 = vector.load %arg1[%c1_77, %c0_78, %c0_79] : memref<3x128x256xbf16, #tpu.memory_space<vmem>>, vector<1x128x256xbf16>
    %159 = vector.shape_cast %158 : vector<1x128x256xbf16> to vector<128x256xbf16>
    %160 = arith.truncf %157 : vector<32x128xf32> to vector<32x128xbf16>
    %cst_80 = arith.constant dense<0.000000e+00> : vector<32x256xf32>
    %161 = tpu.matmul %160, %159, %cst_80 {dimension_numbers = #tpu.dot_dimension_numbers<[1], [0], [0], [1], [0, 0, 1, 1], [], []>} : vector<32x128xbf16>, vector<128x256xbf16>, vector<32x256xf32> -> vector<32x256xf32>
    %c1_81 = arith.constant 1 : index
    %c0_82 = arith.constant 0 : index
    %c0_83 = arith.constant 0 : index
    %162 = vector.load %arg4[%c1_81, %c0_82, %c0_83] : memref<3x1x256xf32, #tpu.memory_space<vmem>>, vector<1x1x256xf32>
    %163 = vector.shape_cast %162 : vector<1x1x256xf32> to vector<1x256xf32>
    %164 = vector.broadcast %163 : vector<1x256xf32> to vector<32x256xf32>
    %165 = arith.addf %161, %164 : vector<32x256xf32>
    %166 = vector.extract_strided_slice %165 {offsets = [0, 0], sizes = [32, 128], strides = [1, 1]} : vector<32x256xf32> to vector<32x128xf32>
    %cst_84 = arith.constant 0.000000e+00 : f32
    %167 = vector.broadcast %cst_84 : f32 to vector<32x128xf32>
    %168 = arith.maximumf %166, %167 : vector<32x128xf32>
    %169 = vector.extract_strided_slice %165 {offsets = [0, 128], sizes = [32, 128], strides = [1, 1]} : vector<32x256xf32> to vector<32x128xf32>
    %c3_85 = arith.constant 3 : index
    %c0_86 = arith.constant 0 : index
    %c0_87 = arith.constant 0 : index
    %170 = vector.load %arg2[%c3_85, %c0_86, %c0_87] : memref<13x256x128xbf16, #tpu.memory_space<vmem>>, vector<1x256x128xbf16>
    %171 = vector.shape_cast %170 : vector<1x256x128xbf16> to vector<256x128xbf16>
    %c3_88 = arith.constant 3 : index
    %c0_89 = arith.constant 0 : index
    %c0_90 = arith.constant 0 : index
    %172 = vector.load %arg5[%c3_88, %c0_89, %c0_90] : memref<13x1x128xf32, #tpu.memory_space<vmem>>, vector<1x1x128xf32>
    %173 = vector.shape_cast %172 : vector<1x1x128xf32> to vector<1x128xf32>
    %c1_i32_91 = arith.constant 1 : i32
    %174 = tpu.dynamic_rotate %168 by %c1_i32_91 dim 0 : vector<32x128xf32>, i32 -> vector<32x128xf32>
    %175 = vector.broadcast %20 : vector<32x1xf32> to vector<32x128xf32>
    %176 = arith.mulf %174, %175 : vector<32x128xf32>
    %c31_i32_92 = arith.constant 31 : i32
    %177 = tpu.dynamic_rotate %168 by %c31_i32_92 dim 0 : vector<32x128xf32>, i32 -> vector<32x128xf32>
    %178 = vector.broadcast %24 : vector<32x1xf32> to vector<32x128xf32>
    %179 = arith.mulf %177, %178 : vector<32x128xf32>
    %180 = tpu.concatenate %176, %179 in 1 : vector<32x128xf32>, vector<32x128xf32> -> vector<32x256xf32>
    %181 = arith.truncf %180 : vector<32x256xf32> to vector<32x256xbf16>
    %cst_93 = arith.constant dense<0.000000e+00> : vector<32x128xf32>
    %182 = tpu.matmul %181, %171, %cst_93 {dimension_numbers = #tpu.dot_dimension_numbers<[1], [0], [0], [1], [0, 0, 1, 1], [], []>} : vector<32x256xbf16>, vector<256x128xbf16>, vector<32x128xf32> -> vector<32x128xf32>
    %183 = vector.broadcast %173 : vector<1x128xf32> to vector<32x128xf32>
    %184 = arith.addf %182, %183 : vector<32x128xf32>
    %cst_94 = arith.constant 0.000000e+00 : f32
    %185 = vector.broadcast %cst_94 : f32 to vector<32x128xf32>
    %186 = arith.maximumf %184, %185 : vector<32x128xf32>
    %c5 = arith.constant 5 : index
    %c0_95 = arith.constant 0 : index
    %c0_96 = arith.constant 0 : index
    %187 = vector.load %arg3[%c5, %c0_95, %c0_96] : memref<23x128x128xbf16, #tpu.memory_space<vmem>>, vector<1x128x128xbf16>
    %188 = vector.shape_cast %187 : vector<1x128x128xbf16> to vector<128x128xbf16>
    %189 = arith.truncf %186 : vector<32x128xf32> to vector<32x128xbf16>
    %cst_97 = arith.constant dense<0.000000e+00> : vector<32x128xf32>
    %190 = tpu.matmul %189, %188, %cst_97 {dimension_numbers = #tpu.dot_dimension_numbers<[1], [0], [0], [1], [0, 0, 1, 1], [], []>} : vector<32x128xbf16>, vector<128x128xbf16>, vector<32x128xf32> -> vector<32x128xf32>
    %c5_98 = arith.constant 5 : index
    %c0_99 = arith.constant 0 : index
    %c0_100 = arith.constant 0 : index
    %191 = vector.load %arg6[%c5_98, %c0_99, %c0_100] : memref<23x1x128xf32, #tpu.memory_space<vmem>>, vector<1x1x128xf32>
    %192 = vector.shape_cast %191 : vector<1x1x128xf32> to vector<1x128xf32>
    %193 = vector.broadcast %192 : vector<1x128xf32> to vector<32x128xf32>
    %194 = arith.addf %190, %193 : vector<32x128xf32>
    %195 = arith.addf %169, %194 : vector<32x128xf32>
    %cst_101 = arith.constant 0.000000e+00 : f32
    %196 = vector.broadcast %cst_101 : f32 to vector<32x128xf32>
    %197 = arith.maximumf %195, %196 : vector<32x128xf32>
    %c6 = arith.constant 6 : index
    %c0_102 = arith.constant 0 : index
    %c0_103 = arith.constant 0 : index
    %198 = vector.load %arg3[%c6, %c0_102, %c0_103] : memref<23x128x128xbf16, #tpu.memory_space<vmem>>, vector<1x128x128xbf16>
    %199 = vector.shape_cast %198 : vector<1x128x128xbf16> to vector<128x128xbf16>
    %200 = arith.truncf %197 : vector<32x128xf32> to vector<32x128xbf16>
    %cst_104 = arith.constant dense<0.000000e+00> : vector<32x128xf32>
    %201 = tpu.matmul %200, %199, %cst_104 {dimension_numbers = #tpu.dot_dimension_numbers<[1], [0], [0], [1], [0, 0, 1, 1], [], []>} : vector<32x128xbf16>, vector<128x128xbf16>, vector<32x128xf32> -> vector<32x128xf32>
    %c6_105 = arith.constant 6 : index
    %c0_106 = arith.constant 0 : index
    %c0_107 = arith.constant 0 : index
    %202 = vector.load %arg6[%c6_105, %c0_106, %c0_107] : memref<23x1x128xf32, #tpu.memory_space<vmem>>, vector<1x1x128xf32>
    %203 = vector.shape_cast %202 : vector<1x1x128xf32> to vector<1x128xf32>
    %204 = vector.broadcast %203 : vector<1x128xf32> to vector<32x128xf32>
    %205 = arith.addf %201, %204 : vector<32x128xf32>
    %cst_108 = arith.constant 0.000000e+00 : f32
    %206 = vector.broadcast %cst_108 : f32 to vector<32x128xf32>
    %207 = arith.maximumf %205, %206 : vector<32x128xf32>
    %c4_109 = arith.constant 4 : index
    %c0_110 = arith.constant 0 : index
    %c0_111 = arith.constant 0 : index
    %208 = vector.load %arg2[%c4_109, %c0_110, %c0_111] : memref<13x256x128xbf16, #tpu.memory_space<vmem>>, vector<1x256x128xbf16>
    %209 = vector.shape_cast %208 : vector<1x256x128xbf16> to vector<256x128xbf16>
    %c4_112 = arith.constant 4 : index
    %c0_113 = arith.constant 0 : index
    %c0_114 = arith.constant 0 : index
    %210 = vector.load %arg5[%c4_112, %c0_113, %c0_114] : memref<13x1x128xf32, #tpu.memory_space<vmem>>, vector<1x1x128xf32>
    %211 = vector.shape_cast %210 : vector<1x1x128xf32> to vector<1x128xf32>
    %c2_i32_115 = arith.constant 2 : i32
    %212 = tpu.dynamic_rotate %207 by %c2_i32_115 dim 0 : vector<32x128xf32>, i32 -> vector<32x128xf32>
    %213 = vector.broadcast %28 : vector<32x1xf32> to vector<32x128xf32>
    %214 = arith.mulf %212, %213 : vector<32x128xf32>
    %c30_i32 = arith.constant 30 : i32
    %215 = tpu.dynamic_rotate %207 by %c30_i32 dim 0 : vector<32x128xf32>, i32 -> vector<32x128xf32>
    %216 = vector.broadcast %32 : vector<32x1xf32> to vector<32x128xf32>
    %217 = arith.mulf %215, %216 : vector<32x128xf32>
    %218 = tpu.concatenate %214, %217 in 1 : vector<32x128xf32>, vector<32x128xf32> -> vector<32x256xf32>
    %219 = arith.truncf %218 : vector<32x256xf32> to vector<32x256xbf16>
    %cst_116 = arith.constant dense<0.000000e+00> : vector<32x128xf32>
    %220 = tpu.matmul %219, %209, %cst_116 {dimension_numbers = #tpu.dot_dimension_numbers<[1], [0], [0], [1], [0, 0, 1, 1], [], []>} : vector<32x256xbf16>, vector<256x128xbf16>, vector<32x128xf32> -> vector<32x128xf32>
    %221 = vector.broadcast %211 : vector<1x128xf32> to vector<32x128xf32>
    %222 = arith.addf %220, %221 : vector<32x128xf32>
    %cst_117 = arith.constant 0.000000e+00 : f32
    %223 = vector.broadcast %cst_117 : f32 to vector<32x128xf32>
    %224 = arith.maximumf %222, %223 : vector<32x128xf32>
    %c7 = arith.constant 7 : index
    %c0_118 = arith.constant 0 : index
    %c0_119 = arith.constant 0 : index
    %225 = vector.load %arg3[%c7, %c0_118, %c0_119] : memref<23x128x128xbf16, #tpu.memory_space<vmem>>, vector<1x128x128xbf16>
    %226 = vector.shape_cast %225 : vector<1x128x128xbf16> to vector<128x128xbf16>
    %227 = arith.truncf %224 : vector<32x128xf32> to vector<32x128xbf16>
    %cst_120 = arith.constant dense<0.000000e+00> : vector<32x128xf32>
    %228 = tpu.matmul %227, %226, %cst_120 {dimension_numbers = #tpu.dot_dimension_numbers<[1], [0], [0], [1], [0, 0, 1, 1], [], []>} : vector<32x128xbf16>, vector<128x128xbf16>, vector<32x128xf32> -> vector<32x128xf32>
    %c7_121 = arith.constant 7 : index
    %c0_122 = arith.constant 0 : index
    %c0_123 = arith.constant 0 : index
    %229 = vector.load %arg6[%c7_121, %c0_122, %c0_123] : memref<23x1x128xf32, #tpu.memory_space<vmem>>, vector<1x1x128xf32>
    %230 = vector.shape_cast %229 : vector<1x1x128xf32> to vector<1x128xf32>
    %231 = vector.broadcast %230 : vector<1x128xf32> to vector<32x128xf32>
    %232 = arith.addf %228, %231 : vector<32x128xf32>
    %233 = arith.addf %232, %197 : vector<32x128xf32>
    %cst_124 = arith.constant 0.000000e+00 : f32
    %234 = vector.broadcast %cst_124 : f32 to vector<32x128xf32>
    %235 = arith.maximumf %233, %234 : vector<32x128xf32>
    %c8 = arith.constant 8 : index
    %c0_125 = arith.constant 0 : index
    %c0_126 = arith.constant 0 : index
    %236 = vector.load %arg3[%c8, %c0_125, %c0_126] : memref<23x128x128xbf16, #tpu.memory_space<vmem>>, vector<1x128x128xbf16>
    %237 = vector.shape_cast %236 : vector<1x128x128xbf16> to vector<128x128xbf16>
    %238 = arith.truncf %235 : vector<32x128xf32> to vector<32x128xbf16>
    %cst_127 = arith.constant dense<0.000000e+00> : vector<32x128xf32>
    %239 = tpu.matmul %238, %237, %cst_127 {dimension_numbers = #tpu.dot_dimension_numbers<[1], [0], [0], [1], [0, 0, 1, 1], [], []>} : vector<32x128xbf16>, vector<128x128xbf16>, vector<32x128xf32> -> vector<32x128xf32>
    %c8_128 = arith.constant 8 : index
    %c0_129 = arith.constant 0 : index
    %c0_130 = arith.constant 0 : index
    %240 = vector.load %arg6[%c8_128, %c0_129, %c0_130] : memref<23x1x128xf32, #tpu.memory_space<vmem>>, vector<1x1x128xf32>
    %241 = vector.shape_cast %240 : vector<1x1x128xf32> to vector<1x128xf32>
    %242 = vector.broadcast %241 : vector<1x128xf32> to vector<32x128xf32>
    %243 = arith.addf %239, %242 : vector<32x128xf32>
    %cst_131 = arith.constant 0.000000e+00 : f32
    %244 = vector.broadcast %cst_131 : f32 to vector<32x128xf32>
    %245 = arith.maximumf %243, %244 : vector<32x128xf32>
    %c5_132 = arith.constant 5 : index
    %c0_133 = arith.constant 0 : index
    %c0_134 = arith.constant 0 : index
    %246 = vector.load %arg2[%c5_132, %c0_133, %c0_134] : memref<13x256x128xbf16, #tpu.memory_space<vmem>>, vector<1x256x128xbf16>
    %247 = vector.shape_cast %246 : vector<1x256x128xbf16> to vector<256x128xbf16>
    %c5_135 = arith.constant 5 : index
    %c0_136 = arith.constant 0 : index
    %c0_137 = arith.constant 0 : index
    %248 = vector.load %arg5[%c5_135, %c0_136, %c0_137] : memref<13x1x128xf32, #tpu.memory_space<vmem>>, vector<1x1x128xf32>
    %249 = vector.shape_cast %248 : vector<1x1x128xf32> to vector<1x128xf32>
    %c2_i32_138 = arith.constant 2 : i32
    %250 = tpu.dynamic_rotate %245 by %c2_i32_138 dim 0 : vector<32x128xf32>, i32 -> vector<32x128xf32>
    %251 = vector.broadcast %28 : vector<32x1xf32> to vector<32x128xf32>
    %252 = arith.mulf %250, %251 : vector<32x128xf32>
    %c30_i32_139 = arith.constant 30 : i32
    %253 = tpu.dynamic_rotate %245 by %c30_i32_139 dim 0 : vector<32x128xf32>, i32 -> vector<32x128xf32>
    %254 = vector.broadcast %32 : vector<32x1xf32> to vector<32x128xf32>
    %255 = arith.mulf %253, %254 : vector<32x128xf32>
    %256 = tpu.concatenate %252, %255 in 1 : vector<32x128xf32>, vector<32x128xf32> -> vector<32x256xf32>
    %257 = arith.truncf %256 : vector<32x256xf32> to vector<32x256xbf16>
    %cst_140 = arith.constant dense<0.000000e+00> : vector<32x128xf32>
    %258 = tpu.matmul %257, %247, %cst_140 {dimension_numbers = #tpu.dot_dimension_numbers<[1], [0], [0], [1], [0, 0, 1, 1], [], []>} : vector<32x256xbf16>, vector<256x128xbf16>, vector<32x128xf32> -> vector<32x128xf32>
    %259 = vector.broadcast %249 : vector<1x128xf32> to vector<32x128xf32>
    %260 = arith.addf %258, %259 : vector<32x128xf32>
    %cst_141 = arith.constant 0.000000e+00 : f32
    %261 = vector.broadcast %cst_141 : f32 to vector<32x128xf32>
    %262 = arith.maximumf %260, %261 : vector<32x128xf32>
    %c9 = arith.constant 9 : index
    %c0_142 = arith.constant 0 : index
    %c0_143 = arith.constant 0 : index
    %263 = vector.load %arg3[%c9, %c0_142, %c0_143] : memref<23x128x128xbf16, #tpu.memory_space<vmem>>, vector<1x128x128xbf16>
    %264 = vector.shape_cast %263 : vector<1x128x128xbf16> to vector<128x128xbf16>
    %265 = arith.truncf %262 : vector<32x128xf32> to vector<32x128xbf16>
    %cst_144 = arith.constant dense<0.000000e+00> : vector<32x128xf32>
    %266 = tpu.matmul %265, %264, %cst_144 {dimension_numbers = #tpu.dot_dimension_numbers<[1], [0], [0], [1], [0, 0, 1, 1], [], []>} : vector<32x128xbf16>, vector<128x128xbf16>, vector<32x128xf32> -> vector<32x128xf32>
    %c9_145 = arith.constant 9 : index
    %c0_146 = arith.constant 0 : index
    %c0_147 = arith.constant 0 : index
    %267 = vector.load %arg6[%c9_145, %c0_146, %c0_147] : memref<23x1x128xf32, #tpu.memory_space<vmem>>, vector<1x1x128xf32>
    %268 = vector.shape_cast %267 : vector<1x1x128xf32> to vector<1x128xf32>
    %269 = vector.broadcast %268 : vector<1x128xf32> to vector<32x128xf32>
    %270 = arith.addf %266, %269 : vector<32x128xf32>
    %271 = arith.addf %270, %235 : vector<32x128xf32>
    %cst_148 = arith.constant 0.000000e+00 : f32
    %272 = vector.broadcast %cst_148 : f32 to vector<32x128xf32>
    %273 = arith.maximumf %271, %272 : vector<32x128xf32>
    %c10 = arith.constant 10 : index
    %c0_149 = arith.constant 0 : index
    %c0_150 = arith.constant 0 : index
    %274 = vector.load %arg3[%c10, %c0_149, %c0_150] : memref<23x128x128xbf16, #tpu.memory_space<vmem>>, vector<1x128x128xbf16>
    %275 = vector.shape_cast %274 : vector<1x128x128xbf16> to vector<128x128xbf16>
    %276 = arith.truncf %273 : vector<32x128xf32> to vector<32x128xbf16>
    %cst_151 = arith.constant dense<0.000000e+00> : vector<32x128xf32>
    %277 = tpu.matmul %276, %275, %cst_151 {dimension_numbers = #tpu.dot_dimension_numbers<[1], [0], [0], [1], [0, 0, 1, 1], [], []>} : vector<32x128xbf16>, vector<128x128xbf16>, vector<32x128xf32> -> vector<32x128xf32>
    %c10_152 = arith.constant 10 : index
    %c0_153 = arith.constant 0 : index
    %c0_154 = arith.constant 0 : index
    %278 = vector.load %arg6[%c10_152, %c0_153, %c0_154] : memref<23x1x128xf32, #tpu.memory_space<vmem>>, vector<1x1x128xf32>
    %279 = vector.shape_cast %278 : vector<1x1x128xf32> to vector<1x128xf32>
    %280 = vector.broadcast %279 : vector<1x128xf32> to vector<32x128xf32>
    %281 = arith.addf %277, %280 : vector<32x128xf32>
    %cst_155 = arith.constant 0.000000e+00 : f32
    %282 = vector.broadcast %cst_155 : f32 to vector<32x128xf32>
    %283 = arith.maximumf %281, %282 : vector<32x128xf32>
    %c6_156 = arith.constant 6 : index
    %c0_157 = arith.constant 0 : index
    %c0_158 = arith.constant 0 : index
    %284 = vector.load %arg2[%c6_156, %c0_157, %c0_158] : memref<13x256x128xbf16, #tpu.memory_space<vmem>>, vector<1x256x128xbf16>
    %285 = vector.shape_cast %284 : vector<1x256x128xbf16> to vector<256x128xbf16>
    %c6_159 = arith.constant 6 : index
    %c0_160 = arith.constant 0 : index
    %c0_161 = arith.constant 0 : index
    %286 = vector.load %arg5[%c6_159, %c0_160, %c0_161] : memref<13x1x128xf32, #tpu.memory_space<vmem>>, vector<1x1x128xf32>
    %287 = vector.shape_cast %286 : vector<1x1x128xf32> to vector<1x128xf32>
    %c2_i32_162 = arith.constant 2 : i32
    %288 = tpu.dynamic_rotate %283 by %c2_i32_162 dim 0 : vector<32x128xf32>, i32 -> vector<32x128xf32>
    %289 = vector.broadcast %28 : vector<32x1xf32> to vector<32x128xf32>
    %290 = arith.mulf %288, %289 : vector<32x128xf32>
    %c30_i32_163 = arith.constant 30 : i32
    %291 = tpu.dynamic_rotate %283 by %c30_i32_163 dim 0 : vector<32x128xf32>, i32 -> vector<32x128xf32>
    %292 = vector.broadcast %32 : vector<32x1xf32> to vector<32x128xf32>
    %293 = arith.mulf %291, %292 : vector<32x128xf32>
    %294 = tpu.concatenate %290, %293 in 1 : vector<32x128xf32>, vector<32x128xf32> -> vector<32x256xf32>
    %295 = arith.truncf %294 : vector<32x256xf32> to vector<32x256xbf16>
    %cst_164 = arith.constant dense<0.000000e+00> : vector<32x128xf32>
    %296 = tpu.matmul %295, %285, %cst_164 {dimension_numbers = #tpu.dot_dimension_numbers<[1], [0], [0], [1], [0, 0, 1, 1], [], []>} : vector<32x256xbf16>, vector<256x128xbf16>, vector<32x128xf32> -> vector<32x128xf32>
    %297 = vector.broadcast %287 : vector<1x128xf32> to vector<32x128xf32>
    %298 = arith.addf %296, %297 : vector<32x128xf32>
    %cst_165 = arith.constant 0.000000e+00 : f32
    %299 = vector.broadcast %cst_165 : f32 to vector<32x128xf32>
    %300 = arith.maximumf %298, %299 : vector<32x128xf32>
    %c11 = arith.constant 11 : index
    %c0_166 = arith.constant 0 : index
    %c0_167 = arith.constant 0 : index
    %301 = vector.load %arg3[%c11, %c0_166, %c0_167] : memref<23x128x128xbf16, #tpu.memory_space<vmem>>, vector<1x128x128xbf16>
    %302 = vector.shape_cast %301 : vector<1x128x128xbf16> to vector<128x128xbf16>
    %303 = arith.truncf %300 : vector<32x128xf32> to vector<32x128xbf16>
    %cst_168 = arith.constant dense<0.000000e+00> : vector<32x128xf32>
    %304 = tpu.matmul %303, %302, %cst_168 {dimension_numbers = #tpu.dot_dimension_numbers<[1], [0], [0], [1], [0, 0, 1, 1], [], []>} : vector<32x128xbf16>, vector<128x128xbf16>, vector<32x128xf32> -> vector<32x128xf32>
    %c11_169 = arith.constant 11 : index
    %c0_170 = arith.constant 0 : index
    %c0_171 = arith.constant 0 : index
    %305 = vector.load %arg6[%c11_169, %c0_170, %c0_171] : memref<23x1x128xf32, #tpu.memory_space<vmem>>, vector<1x1x128xf32>
    %306 = vector.shape_cast %305 : vector<1x1x128xf32> to vector<1x128xf32>
    %307 = vector.broadcast %306 : vector<1x128xf32> to vector<32x128xf32>
    %308 = arith.addf %304, %307 : vector<32x128xf32>
    %309 = arith.addf %308, %273 : vector<32x128xf32>
    %cst_172 = arith.constant 0.000000e+00 : f32
    %310 = vector.broadcast %cst_172 : f32 to vector<32x128xf32>
    %311 = arith.maximumf %309, %310 : vector<32x128xf32>
    %c2_173 = arith.constant 2 : index
    %c0_174 = arith.constant 0 : index
    %c0_175 = arith.constant 0 : index
    %312 = vector.load %arg1[%c2_173, %c0_174, %c0_175] : memref<3x128x256xbf16, #tpu.memory_space<vmem>>, vector<1x128x256xbf16>
    %313 = vector.shape_cast %312 : vector<1x128x256xbf16> to vector<128x256xbf16>
    %314 = arith.truncf %311 : vector<32x128xf32> to vector<32x128xbf16>
    %cst_176 = arith.constant dense<0.000000e+00> : vector<32x256xf32>
    %315 = tpu.matmul %314, %313, %cst_176 {dimension_numbers = #tpu.dot_dimension_numbers<[1], [0], [0], [1], [0, 0, 1, 1], [], []>} : vector<32x128xbf16>, vector<128x256xbf16>, vector<32x256xf32> -> vector<32x256xf32>
    %c2_177 = arith.constant 2 : index
    %c0_178 = arith.constant 0 : index
    %c0_179 = arith.constant 0 : index
    %316 = vector.load %arg4[%c2_177, %c0_178, %c0_179] : memref<3x1x256xf32, #tpu.memory_space<vmem>>, vector<1x1x256xf32>
    %317 = vector.shape_cast %316 : vector<1x1x256xf32> to vector<1x256xf32>
    %318 = vector.broadcast %317 : vector<1x256xf32> to vector<32x256xf32>
    %319 = arith.addf %315, %318 : vector<32x256xf32>
    %320 = vector.extract_strided_slice %319 {offsets = [0, 0], sizes = [32, 128], strides = [1, 1]} : vector<32x256xf32> to vector<32x128xf32>
    %cst_180 = arith.constant 0.000000e+00 : f32
    %321 = vector.broadcast %cst_180 : f32 to vector<32x128xf32>
    %322 = arith.maximumf %320, %321 : vector<32x128xf32>
    %323 = vector.extract_strided_slice %319 {offsets = [0, 128], sizes = [32, 128], strides = [1, 1]} : vector<32x256xf32> to vector<32x128xf32>
    %c7_181 = arith.constant 7 : index
    %c0_182 = arith.constant 0 : index
    %c0_183 = arith.constant 0 : index
    %324 = vector.load %arg2[%c7_181, %c0_182, %c0_183] : memref<13x256x128xbf16, #tpu.memory_space<vmem>>, vector<1x256x128xbf16>
    %325 = vector.shape_cast %324 : vector<1x256x128xbf16> to vector<256x128xbf16>
    %c7_184 = arith.constant 7 : index
    %c0_185 = arith.constant 0 : index
    %c0_186 = arith.constant 0 : index
    %326 = vector.load %arg5[%c7_184, %c0_185, %c0_186] : memref<13x1x128xf32, #tpu.memory_space<vmem>>, vector<1x1x128xf32>
    %327 = vector.shape_cast %326 : vector<1x1x128xf32> to vector<1x128xf32>
    %c2_i32_187 = arith.constant 2 : i32
    %328 = tpu.dynamic_rotate %322 by %c2_i32_187 dim 0 : vector<32x128xf32>, i32 -> vector<32x128xf32>
    %329 = vector.broadcast %28 : vector<32x1xf32> to vector<32x128xf32>
    %330 = arith.mulf %328, %329 : vector<32x128xf32>
    %c30_i32_188 = arith.constant 30 : i32
    %331 = tpu.dynamic_rotate %322 by %c30_i32_188 dim 0 : vector<32x128xf32>, i32 -> vector<32x128xf32>
    %332 = vector.broadcast %32 : vector<32x1xf32> to vector<32x128xf32>
    %333 = arith.mulf %331, %332 : vector<32x128xf32>
    %334 = tpu.concatenate %330, %333 in 1 : vector<32x128xf32>, vector<32x128xf32> -> vector<32x256xf32>
    %335 = arith.truncf %334 : vector<32x256xf32> to vector<32x256xbf16>
    %cst_189 = arith.constant dense<0.000000e+00> : vector<32x128xf32>
    %336 = tpu.matmul %335, %325, %cst_189 {dimension_numbers = #tpu.dot_dimension_numbers<[1], [0], [0], [1], [0, 0, 1, 1], [], []>} : vector<32x256xbf16>, vector<256x128xbf16>, vector<32x128xf32> -> vector<32x128xf32>
    %337 = vector.broadcast %327 : vector<1x128xf32> to vector<32x128xf32>
    %338 = arith.addf %336, %337 : vector<32x128xf32>
    %cst_190 = arith.constant 0.000000e+00 : f32
    %339 = vector.broadcast %cst_190 : f32 to vector<32x128xf32>
    %340 = arith.maximumf %338, %339 : vector<32x128xf32>
    %c12 = arith.constant 12 : index
    %c0_191 = arith.constant 0 : index
    %c0_192 = arith.constant 0 : index
    %341 = vector.load %arg3[%c12, %c0_191, %c0_192] : memref<23x128x128xbf16, #tpu.memory_space<vmem>>, vector<1x128x128xbf16>
    %342 = vector.shape_cast %341 : vector<1x128x128xbf16> to vector<128x128xbf16>
    %343 = arith.truncf %340 : vector<32x128xf32> to vector<32x128xbf16>
    %cst_193 = arith.constant dense<0.000000e+00> : vector<32x128xf32>
    %344 = tpu.matmul %343, %342, %cst_193 {dimension_numbers = #tpu.dot_dimension_numbers<[1], [0], [0], [1], [0, 0, 1, 1], [], []>} : vector<32x128xbf16>, vector<128x128xbf16>, vector<32x128xf32> -> vector<32x128xf32>
    %c12_194 = arith.constant 12 : index
    %c0_195 = arith.constant 0 : index
    %c0_196 = arith.constant 0 : index
    %345 = vector.load %arg6[%c12_194, %c0_195, %c0_196] : memref<23x1x128xf32, #tpu.memory_space<vmem>>, vector<1x1x128xf32>
    %346 = vector.shape_cast %345 : vector<1x1x128xf32> to vector<1x128xf32>
    %347 = vector.broadcast %346 : vector<1x128xf32> to vector<32x128xf32>
    %348 = arith.addf %344, %347 : vector<32x128xf32>
    %349 = arith.addf %323, %348 : vector<32x128xf32>
    %cst_197 = arith.constant 0.000000e+00 : f32
    %350 = vector.broadcast %cst_197 : f32 to vector<32x128xf32>
    %351 = arith.maximumf %349, %350 : vector<32x128xf32>
    %c13 = arith.constant 13 : index
    %c0_198 = arith.constant 0 : index
    %c0_199 = arith.constant 0 : index
    %352 = vector.load %arg3[%c13, %c0_198, %c0_199] : memref<23x128x128xbf16, #tpu.memory_space<vmem>>, vector<1x128x128xbf16>
    %353 = vector.shape_cast %352 : vector<1x128x128xbf16> to vector<128x128xbf16>
    %354 = arith.truncf %351 : vector<32x128xf32> to vector<32x128xbf16>
    %cst_200 = arith.constant dense<0.000000e+00> : vector<32x128xf32>
    %355 = tpu.matmul %354, %353, %cst_200 {dimension_numbers = #tpu.dot_dimension_numbers<[1], [0], [0], [1], [0, 0, 1, 1], [], []>} : vector<32x128xbf16>, vector<128x128xbf16>, vector<32x128xf32> -> vector<32x128xf32>
    %c13_201 = arith.constant 13 : index
    %c0_202 = arith.constant 0 : index
    %c0_203 = arith.constant 0 : index
    %356 = vector.load %arg6[%c13_201, %c0_202, %c0_203] : memref<23x1x128xf32, #tpu.memory_space<vmem>>, vector<1x1x128xf32>
    %357 = vector.shape_cast %356 : vector<1x1x128xf32> to vector<1x128xf32>
    %358 = vector.broadcast %357 : vector<1x128xf32> to vector<32x128xf32>
    %359 = arith.addf %355, %358 : vector<32x128xf32>
    %cst_204 = arith.constant 0.000000e+00 : f32
    %360 = vector.broadcast %cst_204 : f32 to vector<32x128xf32>
    %361 = arith.maximumf %359, %360 : vector<32x128xf32>
    %c8_205 = arith.constant 8 : index
    %c0_206 = arith.constant 0 : index
    %c0_207 = arith.constant 0 : index
    %362 = vector.load %arg2[%c8_205, %c0_206, %c0_207] : memref<13x256x128xbf16, #tpu.memory_space<vmem>>, vector<1x256x128xbf16>
    %363 = vector.shape_cast %362 : vector<1x256x128xbf16> to vector<256x128xbf16>
    %c8_208 = arith.constant 8 : index
    %c0_209 = arith.constant 0 : index
    %c0_210 = arith.constant 0 : index
    %364 = vector.load %arg5[%c8_208, %c0_209, %c0_210] : memref<13x1x128xf32, #tpu.memory_space<vmem>>, vector<1x1x128xf32>
    %365 = vector.shape_cast %364 : vector<1x1x128xf32> to vector<1x128xf32>
    %c4_i32_211 = arith.constant 4 : i32
    %366 = tpu.dynamic_rotate %361 by %c4_i32_211 dim 0 : vector<32x128xf32>, i32 -> vector<32x128xf32>
    %367 = vector.broadcast %36 : vector<32x1xf32> to vector<32x128xf32>
    %368 = arith.mulf %366, %367 : vector<32x128xf32>
    %c28_i32 = arith.constant 28 : i32
    %369 = tpu.dynamic_rotate %361 by %c28_i32 dim 0 : vector<32x128xf32>, i32 -> vector<32x128xf32>
    %370 = vector.broadcast %40 : vector<32x1xf32> to vector<32x128xf32>
    %371 = arith.mulf %369, %370 : vector<32x128xf32>
    %372 = tpu.concatenate %368, %371 in 1 : vector<32x128xf32>, vector<32x128xf32> -> vector<32x256xf32>
    %373 = arith.truncf %372 : vector<32x256xf32> to vector<32x256xbf16>
    %cst_212 = arith.constant dense<0.000000e+00> : vector<32x128xf32>
    %374 = tpu.matmul %373, %363, %cst_212 {dimension_numbers = #tpu.dot_dimension_numbers<[1], [0], [0], [1], [0, 0, 1, 1], [], []>} : vector<32x256xbf16>, vector<256x128xbf16>, vector<32x128xf32> -> vector<32x128xf32>
    %375 = vector.broadcast %365 : vector<1x128xf32> to vector<32x128xf32>
    %376 = arith.addf %374, %375 : vector<32x128xf32>
    %cst_213 = arith.constant 0.000000e+00 : f32
    %377 = vector.broadcast %cst_213 : f32 to vector<32x128xf32>
    %378 = arith.maximumf %376, %377 : vector<32x128xf32>
    %c14 = arith.constant 14 : index
    %c0_214 = arith.constant 0 : index
    %c0_215 = arith.constant 0 : index
    %379 = vector.load %arg3[%c14, %c0_214, %c0_215] : memref<23x128x128xbf16, #tpu.memory_space<vmem>>, vector<1x128x128xbf16>
    %380 = vector.shape_cast %379 : vector<1x128x128xbf16> to vector<128x128xbf16>
    %381 = arith.truncf %378 : vector<32x128xf32> to vector<32x128xbf16>
    %cst_216 = arith.constant dense<0.000000e+00> : vector<32x128xf32>
    %382 = tpu.matmul %381, %380, %cst_216 {dimension_numbers = #tpu.dot_dimension_numbers<[1], [0], [0], [1], [0, 0, 1, 1], [], []>} : vector<32x128xbf16>, vector<128x128xbf16>, vector<32x128xf32> -> vector<32x128xf32>
    %c14_217 = arith.constant 14 : index
    %c0_218 = arith.constant 0 : index
    %c0_219 = arith.constant 0 : index
    %383 = vector.load %arg6[%c14_217, %c0_218, %c0_219] : memref<23x1x128xf32, #tpu.memory_space<vmem>>, vector<1x1x128xf32>
    %384 = vector.shape_cast %383 : vector<1x1x128xf32> to vector<1x128xf32>
    %385 = vector.broadcast %384 : vector<1x128xf32> to vector<32x128xf32>
    %386 = arith.addf %382, %385 : vector<32x128xf32>
    %387 = arith.addf %386, %351 : vector<32x128xf32>
    %cst_220 = arith.constant 0.000000e+00 : f32
    %388 = vector.broadcast %cst_220 : f32 to vector<32x128xf32>
    %389 = arith.maximumf %387, %388 : vector<32x128xf32>
    %c15 = arith.constant 15 : index
    %c0_221 = arith.constant 0 : index
    %c0_222 = arith.constant 0 : index
    %390 = vector.load %arg3[%c15, %c0_221, %c0_222] : memref<23x128x128xbf16, #tpu.memory_space<vmem>>, vector<1x128x128xbf16>
    %391 = vector.shape_cast %390 : vector<1x128x128xbf16> to vector<128x128xbf16>
    %392 = arith.truncf %389 : vector<32x128xf32> to vector<32x128xbf16>
    %cst_223 = arith.constant dense<0.000000e+00> : vector<32x128xf32>
    %393 = tpu.matmul %392, %391, %cst_223 {dimension_numbers = #tpu.dot_dimension_numbers<[1], [0], [0], [1], [0, 0, 1, 1], [], []>} : vector<32x128xbf16>, vector<128x128xbf16>, vector<32x128xf32> -> vector<32x128xf32>
    %c15_224 = arith.constant 15 : index
    %c0_225 = arith.constant 0 : index
    %c0_226 = arith.constant 0 : index
    %394 = vector.load %arg6[%c15_224, %c0_225, %c0_226] : memref<23x1x128xf32, #tpu.memory_space<vmem>>, vector<1x1x128xf32>
    %395 = vector.shape_cast %394 : vector<1x1x128xf32> to vector<1x128xf32>
    %396 = vector.broadcast %395 : vector<1x128xf32> to vector<32x128xf32>
    %397 = arith.addf %393, %396 : vector<32x128xf32>
    %cst_227 = arith.constant 0.000000e+00 : f32
    %398 = vector.broadcast %cst_227 : f32 to vector<32x128xf32>
    %399 = arith.maximumf %397, %398 : vector<32x128xf32>
    %c9_228 = arith.constant 9 : index
    %c0_229 = arith.constant 0 : index
    %c0_230 = arith.constant 0 : index
    %400 = vector.load %arg2[%c9_228, %c0_229, %c0_230] : memref<13x256x128xbf16, #tpu.memory_space<vmem>>, vector<1x256x128xbf16>
    %401 = vector.shape_cast %400 : vector<1x256x128xbf16> to vector<256x128xbf16>
    %c9_231 = arith.constant 9 : index
    %c0_232 = arith.constant 0 : index
    %c0_233 = arith.constant 0 : index
    %402 = vector.load %arg5[%c9_231, %c0_232, %c0_233] : memref<13x1x128xf32, #tpu.memory_space<vmem>>, vector<1x1x128xf32>
    %403 = vector.shape_cast %402 : vector<1x1x128xf32> to vector<1x128xf32>
    %c4_i32_234 = arith.constant 4 : i32
    %404 = tpu.dynamic_rotate %399 by %c4_i32_234 dim 0 : vector<32x128xf32>, i32 -> vector<32x128xf32>
    %405 = vector.broadcast %36 : vector<32x1xf32> to vector<32x128xf32>
    %406 = arith.mulf %404, %405 : vector<32x128xf32>
    %c28_i32_235 = arith.constant 28 : i32
    %407 = tpu.dynamic_rotate %399 by %c28_i32_235 dim 0 : vector<32x128xf32>, i32 -> vector<32x128xf32>
    %408 = vector.broadcast %40 : vector<32x1xf32> to vector<32x128xf32>
    %409 = arith.mulf %407, %408 : vector<32x128xf32>
    %410 = tpu.concatenate %406, %409 in 1 : vector<32x128xf32>, vector<32x128xf32> -> vector<32x256xf32>
    %411 = arith.truncf %410 : vector<32x256xf32> to vector<32x256xbf16>
    %cst_236 = arith.constant dense<0.000000e+00> : vector<32x128xf32>
    %412 = tpu.matmul %411, %401, %cst_236 {dimension_numbers = #tpu.dot_dimension_numbers<[1], [0], [0], [1], [0, 0, 1, 1], [], []>} : vector<32x256xbf16>, vector<256x128xbf16>, vector<32x128xf32> -> vector<32x128xf32>
    %413 = vector.broadcast %403 : vector<1x128xf32> to vector<32x128xf32>
    %414 = arith.addf %412, %413 : vector<32x128xf32>
    %cst_237 = arith.constant 0.000000e+00 : f32
    %415 = vector.broadcast %cst_237 : f32 to vector<32x128xf32>
    %416 = arith.maximumf %414, %415 : vector<32x128xf32>
    %c16 = arith.constant 16 : index
    %c0_238 = arith.constant 0 : index
    %c0_239 = arith.constant 0 : index
    %417 = vector.load %arg3[%c16, %c0_238, %c0_239] : memref<23x128x128xbf16, #tpu.memory_space<vmem>>, vector<1x128x128xbf16>
    %418 = vector.shape_cast %417 : vector<1x128x128xbf16> to vector<128x128xbf16>
    %419 = arith.truncf %416 : vector<32x128xf32> to vector<32x128xbf16>
    %cst_240 = arith.constant dense<0.000000e+00> : vector<32x128xf32>
    %420 = tpu.matmul %419, %418, %cst_240 {dimension_numbers = #tpu.dot_dimension_numbers<[1], [0], [0], [1], [0, 0, 1, 1], [], []>} : vector<32x128xbf16>, vector<128x128xbf16>, vector<32x128xf32> -> vector<32x128xf32>
    %c16_241 = arith.constant 16 : index
    %c0_242 = arith.constant 0 : index
    %c0_243 = arith.constant 0 : index
    %421 = vector.load %arg6[%c16_241, %c0_242, %c0_243] : memref<23x1x128xf32, #tpu.memory_space<vmem>>, vector<1x1x128xf32>
    %422 = vector.shape_cast %421 : vector<1x1x128xf32> to vector<1x128xf32>
    %423 = vector.broadcast %422 : vector<1x128xf32> to vector<32x128xf32>
    %424 = arith.addf %420, %423 : vector<32x128xf32>
    %425 = arith.addf %424, %389 : vector<32x128xf32>
    %cst_244 = arith.constant 0.000000e+00 : f32
    %426 = vector.broadcast %cst_244 : f32 to vector<32x128xf32>
    %427 = arith.maximumf %425, %426 : vector<32x128xf32>
    %c17 = arith.constant 17 : index
    %c0_245 = arith.constant 0 : index
    %c0_246 = arith.constant 0 : index
    %428 = vector.load %arg3[%c17, %c0_245, %c0_246] : memref<23x128x128xbf16, #tpu.memory_space<vmem>>, vector<1x128x128xbf16>
    %429 = vector.shape_cast %428 : vector<1x128x128xbf16> to vector<128x128xbf16>
    %430 = arith.truncf %427 : vector<32x128xf32> to vector<32x128xbf16>
    %cst_247 = arith.constant dense<0.000000e+00> : vector<32x128xf32>
    %431 = tpu.matmul %430, %429, %cst_247 {dimension_numbers = #tpu.dot_dimension_numbers<[1], [0], [0], [1], [0, 0, 1, 1], [], []>} : vector<32x128xbf16>, vector<128x128xbf16>, vector<32x128xf32> -> vector<32x128xf32>
    %c17_248 = arith.constant 17 : index
    %c0_249 = arith.constant 0 : index
    %c0_250 = arith.constant 0 : index
    %432 = vector.load %arg6[%c17_248, %c0_249, %c0_250] : memref<23x1x128xf32, #tpu.memory_space<vmem>>, vector<1x1x128xf32>
    %433 = vector.shape_cast %432 : vector<1x1x128xf32> to vector<1x128xf32>
    %434 = vector.broadcast %433 : vector<1x128xf32> to vector<32x128xf32>
    %435 = arith.addf %431, %434 : vector<32x128xf32>
    %cst_251 = arith.constant 0.000000e+00 : f32
    %436 = vector.broadcast %cst_251 : f32 to vector<32x128xf32>
    %437 = arith.maximumf %435, %436 : vector<32x128xf32>
    %c10_252 = arith.constant 10 : index
    %c0_253 = arith.constant 0 : index
    %c0_254 = arith.constant 0 : index
    %438 = vector.load %arg2[%c10_252, %c0_253, %c0_254] : memref<13x256x128xbf16, #tpu.memory_space<vmem>>, vector<1x256x128xbf16>
    %439 = vector.shape_cast %438 : vector<1x256x128xbf16> to vector<256x128xbf16>
    %c10_255 = arith.constant 10 : index
    %c0_256 = arith.constant 0 : index
    %c0_257 = arith.constant 0 : index
    %440 = vector.load %arg5[%c10_255, %c0_256, %c0_257] : memref<13x1x128xf32, #tpu.memory_space<vmem>>, vector<1x1x128xf32>
    %441 = vector.shape_cast %440 : vector<1x1x128xf32> to vector<1x128xf32>
    %c4_i32_258 = arith.constant 4 : i32
    %442 = tpu.dynamic_rotate %437 by %c4_i32_258 dim 0 : vector<32x128xf32>, i32 -> vector<32x128xf32>
    %443 = vector.broadcast %36 : vector<32x1xf32> to vector<32x128xf32>
    %444 = arith.mulf %442, %443 : vector<32x128xf32>
    %c28_i32_259 = arith.constant 28 : i32
    %445 = tpu.dynamic_rotate %437 by %c28_i32_259 dim 0 : vector<32x128xf32>, i32 -> vector<32x128xf32>
    %446 = vector.broadcast %40 : vector<32x1xf32> to vector<32x128xf32>
    %447 = arith.mulf %445, %446 : vector<32x128xf32>
    %448 = tpu.concatenate %444, %447 in 1 : vector<32x128xf32>, vector<32x128xf32> -> vector<32x256xf32>
    %449 = arith.truncf %448 : vector<32x256xf32> to vector<32x256xbf16>
    %cst_260 = arith.constant dense<0.000000e+00> : vector<32x128xf32>
    %450 = tpu.matmul %449, %439, %cst_260 {dimension_numbers = #tpu.dot_dimension_numbers<[1], [0], [0], [1], [0, 0, 1, 1], [], []>} : vector<32x256xbf16>, vector<256x128xbf16>, vector<32x128xf32> -> vector<32x128xf32>
    %451 = vector.broadcast %441 : vector<1x128xf32> to vector<32x128xf32>
    %452 = arith.addf %450, %451 : vector<32x128xf32>
    %cst_261 = arith.constant 0.000000e+00 : f32
    %453 = vector.broadcast %cst_261 : f32 to vector<32x128xf32>
    %454 = arith.maximumf %452, %453 : vector<32x128xf32>
    %c18 = arith.constant 18 : index
    %c0_262 = arith.constant 0 : index
    %c0_263 = arith.constant 0 : index
    %455 = vector.load %arg3[%c18, %c0_262, %c0_263] : memref<23x128x128xbf16, #tpu.memory_space<vmem>>, vector<1x128x128xbf16>
    %456 = vector.shape_cast %455 : vector<1x128x128xbf16> to vector<128x128xbf16>
    %457 = arith.truncf %454 : vector<32x128xf32> to vector<32x128xbf16>
    %cst_264 = arith.constant dense<0.000000e+00> : vector<32x128xf32>
    %458 = tpu.matmul %457, %456, %cst_264 {dimension_numbers = #tpu.dot_dimension_numbers<[1], [0], [0], [1], [0, 0, 1, 1], [], []>} : vector<32x128xbf16>, vector<128x128xbf16>, vector<32x128xf32> -> vector<32x128xf32>
    %c18_265 = arith.constant 18 : index
    %c0_266 = arith.constant 0 : index
    %c0_267 = arith.constant 0 : index
    %459 = vector.load %arg6[%c18_265, %c0_266, %c0_267] : memref<23x1x128xf32, #tpu.memory_space<vmem>>, vector<1x1x128xf32>
    %460 = vector.shape_cast %459 : vector<1x1x128xf32> to vector<1x128xf32>
    %461 = vector.broadcast %460 : vector<1x128xf32> to vector<32x128xf32>
    %462 = arith.addf %458, %461 : vector<32x128xf32>
    %463 = arith.addf %462, %427 : vector<32x128xf32>
    %cst_268 = arith.constant 0.000000e+00 : f32
    %464 = vector.broadcast %cst_268 : f32 to vector<32x128xf32>
    %465 = arith.maximumf %463, %464 : vector<32x128xf32>
    %c19 = arith.constant 19 : index
    %c0_269 = arith.constant 0 : index
    %c0_270 = arith.constant 0 : index
    %466 = vector.load %arg3[%c19, %c0_269, %c0_270] : memref<23x128x128xbf16, #tpu.memory_space<vmem>>, vector<1x128x128xbf16>
    %467 = vector.shape_cast %466 : vector<1x128x128xbf16> to vector<128x128xbf16>
    %468 = arith.truncf %465 : vector<32x128xf32> to vector<32x128xbf16>
    %cst_271 = arith.constant dense<0.000000e+00> : vector<32x128xf32>
    %469 = tpu.matmul %468, %467, %cst_271 {dimension_numbers = #tpu.dot_dimension_numbers<[1], [0], [0], [1], [0, 0, 1, 1], [], []>} : vector<32x128xbf16>, vector<128x128xbf16>, vector<32x128xf32> -> vector<32x128xf32>
    %c19_272 = arith.constant 19 : index
    %c0_273 = arith.constant 0 : index
    %c0_274 = arith.constant 0 : index
    %470 = vector.load %arg6[%c19_272, %c0_273, %c0_274] : memref<23x1x128xf32, #tpu.memory_space<vmem>>, vector<1x1x128xf32>
    %471 = vector.shape_cast %470 : vector<1x1x128xf32> to vector<1x128xf32>
    %472 = vector.broadcast %471 : vector<1x128xf32> to vector<32x128xf32>
    %473 = arith.addf %469, %472 : vector<32x128xf32>
    %cst_275 = arith.constant 0.000000e+00 : f32
    %474 = vector.broadcast %cst_275 : f32 to vector<32x128xf32>
    %475 = arith.maximumf %473, %474 : vector<32x128xf32>
    %c11_276 = arith.constant 11 : index
    %c0_277 = arith.constant 0 : index
    %c0_278 = arith.constant 0 : index
    %476 = vector.load %arg2[%c11_276, %c0_277, %c0_278] : memref<13x256x128xbf16, #tpu.memory_space<vmem>>, vector<1x256x128xbf16>
    %477 = vector.shape_cast %476 : vector<1x256x128xbf16> to vector<256x128xbf16>
    %c11_279 = arith.constant 11 : index
    %c0_280 = arith.constant 0 : index
    %c0_281 = arith.constant 0 : index
    %478 = vector.load %arg5[%c11_279, %c0_280, %c0_281] : memref<13x1x128xf32, #tpu.memory_space<vmem>>, vector<1x1x128xf32>
    %479 = vector.shape_cast %478 : vector<1x1x128xf32> to vector<1x128xf32>
    %c4_i32_282 = arith.constant 4 : i32
    %480 = tpu.dynamic_rotate %475 by %c4_i32_282 dim 0 : vector<32x128xf32>, i32 -> vector<32x128xf32>
    %481 = vector.broadcast %36 : vector<32x1xf32> to vector<32x128xf32>
    %482 = arith.mulf %480, %481 : vector<32x128xf32>
    %c28_i32_283 = arith.constant 28 : i32
    %483 = tpu.dynamic_rotate %475 by %c28_i32_283 dim 0 : vector<32x128xf32>, i32 -> vector<32x128xf32>
    %484 = vector.broadcast %40 : vector<32x1xf32> to vector<32x128xf32>
    %485 = arith.mulf %483, %484 : vector<32x128xf32>
    %486 = tpu.concatenate %482, %485 in 1 : vector<32x128xf32>, vector<32x128xf32> -> vector<32x256xf32>
    %487 = arith.truncf %486 : vector<32x256xf32> to vector<32x256xbf16>
    %cst_284 = arith.constant dense<0.000000e+00> : vector<32x128xf32>
    %488 = tpu.matmul %487, %477, %cst_284 {dimension_numbers = #tpu.dot_dimension_numbers<[1], [0], [0], [1], [0, 0, 1, 1], [], []>} : vector<32x256xbf16>, vector<256x128xbf16>, vector<32x128xf32> -> vector<32x128xf32>
    %489 = vector.broadcast %479 : vector<1x128xf32> to vector<32x128xf32>
    %490 = arith.addf %488, %489 : vector<32x128xf32>
    %cst_285 = arith.constant 0.000000e+00 : f32
    %491 = vector.broadcast %cst_285 : f32 to vector<32x128xf32>
    %492 = arith.maximumf %490, %491 : vector<32x128xf32>
    %c20 = arith.constant 20 : index
    %c0_286 = arith.constant 0 : index
    %c0_287 = arith.constant 0 : index
    %493 = vector.load %arg3[%c20, %c0_286, %c0_287] : memref<23x128x128xbf16, #tpu.memory_space<vmem>>, vector<1x128x128xbf16>
    %494 = vector.shape_cast %493 : vector<1x128x128xbf16> to vector<128x128xbf16>
    %495 = arith.truncf %492 : vector<32x128xf32> to vector<32x128xbf16>
    %cst_288 = arith.constant dense<0.000000e+00> : vector<32x128xf32>
    %496 = tpu.matmul %495, %494, %cst_288 {dimension_numbers = #tpu.dot_dimension_numbers<[1], [0], [0], [1], [0, 0, 1, 1], [], []>} : vector<32x128xbf16>, vector<128x128xbf16>, vector<32x128xf32> -> vector<32x128xf32>
    %c20_289 = arith.constant 20 : index
    %c0_290 = arith.constant 0 : index
    %c0_291 = arith.constant 0 : index
    %497 = vector.load %arg6[%c20_289, %c0_290, %c0_291] : memref<23x1x128xf32, #tpu.memory_space<vmem>>, vector<1x1x128xf32>
    %498 = vector.shape_cast %497 : vector<1x1x128xf32> to vector<1x128xf32>
    %499 = vector.broadcast %498 : vector<1x128xf32> to vector<32x128xf32>
    %500 = arith.addf %496, %499 : vector<32x128xf32>
    %501 = arith.addf %500, %465 : vector<32x128xf32>
    %cst_292 = arith.constant 0.000000e+00 : f32
    %502 = vector.broadcast %cst_292 : f32 to vector<32x128xf32>
    %503 = arith.maximumf %501, %502 : vector<32x128xf32>
    %c21 = arith.constant 21 : index
    %c0_293 = arith.constant 0 : index
    %c0_294 = arith.constant 0 : index
    %504 = vector.load %arg3[%c21, %c0_293, %c0_294] : memref<23x128x128xbf16, #tpu.memory_space<vmem>>, vector<1x128x128xbf16>
    %505 = vector.shape_cast %504 : vector<1x128x128xbf16> to vector<128x128xbf16>
    %506 = arith.truncf %503 : vector<32x128xf32> to vector<32x128xbf16>
    %cst_295 = arith.constant dense<0.000000e+00> : vector<32x128xf32>
    %507 = tpu.matmul %506, %505, %cst_295 {dimension_numbers = #tpu.dot_dimension_numbers<[1], [0], [0], [1], [0, 0, 1, 1], [], []>} : vector<32x128xbf16>, vector<128x128xbf16>, vector<32x128xf32> -> vector<32x128xf32>
    %c21_296 = arith.constant 21 : index
    %c0_297 = arith.constant 0 : index
    %c0_298 = arith.constant 0 : index
    %508 = vector.load %arg6[%c21_296, %c0_297, %c0_298] : memref<23x1x128xf32, #tpu.memory_space<vmem>>, vector<1x1x128xf32>
    %509 = vector.shape_cast %508 : vector<1x1x128xf32> to vector<1x128xf32>
    %510 = vector.broadcast %509 : vector<1x128xf32> to vector<32x128xf32>
    %511 = arith.addf %507, %510 : vector<32x128xf32>
    %cst_299 = arith.constant 0.000000e+00 : f32
    %512 = vector.broadcast %cst_299 : f32 to vector<32x128xf32>
    %513 = arith.maximumf %511, %512 : vector<32x128xf32>
    %c12_300 = arith.constant 12 : index
    %c0_301 = arith.constant 0 : index
    %c0_302 = arith.constant 0 : index
    %514 = vector.load %arg2[%c12_300, %c0_301, %c0_302] : memref<13x256x128xbf16, #tpu.memory_space<vmem>>, vector<1x256x128xbf16>
    %515 = vector.shape_cast %514 : vector<1x256x128xbf16> to vector<256x128xbf16>
    %c12_303 = arith.constant 12 : index
    %c0_304 = arith.constant 0 : index
    %c0_305 = arith.constant 0 : index
    %516 = vector.load %arg5[%c12_303, %c0_304, %c0_305] : memref<13x1x128xf32, #tpu.memory_space<vmem>>, vector<1x1x128xf32>
    %517 = vector.shape_cast %516 : vector<1x1x128xf32> to vector<1x128xf32>
    %c4_i32_306 = arith.constant 4 : i32
    %518 = tpu.dynamic_rotate %513 by %c4_i32_306 dim 0 : vector<32x128xf32>, i32 -> vector<32x128xf32>
    %519 = vector.broadcast %36 : vector<32x1xf32> to vector<32x128xf32>
    %520 = arith.mulf %518, %519 : vector<32x128xf32>
    %c28_i32_307 = arith.constant 28 : i32
    %521 = tpu.dynamic_rotate %513 by %c28_i32_307 dim 0 : vector<32x128xf32>, i32 -> vector<32x128xf32>
    %522 = vector.broadcast %40 : vector<32x1xf32> to vector<32x128xf32>
    %523 = arith.mulf %521, %522 : vector<32x128xf32>
    %524 = tpu.concatenate %520, %523 in 1 : vector<32x128xf32>, vector<32x128xf32> -> vector<32x256xf32>
    %525 = arith.truncf %524 : vector<32x256xf32> to vector<32x256xbf16>
    %cst_308 = arith.constant dense<0.000000e+00> : vector<32x128xf32>
    %526 = tpu.matmul %525, %515, %cst_308 {dimension_numbers = #tpu.dot_dimension_numbers<[1], [0], [0], [1], [0, 0, 1, 1], [], []>} : vector<32x256xbf16>, vector<256x128xbf16>, vector<32x128xf32> -> vector<32x128xf32>
    %527 = vector.broadcast %517 : vector<1x128xf32> to vector<32x128xf32>
    %528 = arith.addf %526, %527 : vector<32x128xf32>
    %cst_309 = arith.constant 0.000000e+00 : f32
    %529 = vector.broadcast %cst_309 : f32 to vector<32x128xf32>
    %530 = arith.maximumf %528, %529 : vector<32x128xf32>
    %c22 = arith.constant 22 : index
    %c0_310 = arith.constant 0 : index
    %c0_311 = arith.constant 0 : index
    %531 = vector.load %arg3[%c22, %c0_310, %c0_311] : memref<23x128x128xbf16, #tpu.memory_space<vmem>>, vector<1x128x128xbf16>
    %532 = vector.shape_cast %531 : vector<1x128x128xbf16> to vector<128x128xbf16>
    %533 = arith.truncf %530 : vector<32x128xf32> to vector<32x128xbf16>
    %cst_312 = arith.constant dense<0.000000e+00> : vector<32x128xf32>
    %534 = tpu.matmul %533, %532, %cst_312 {dimension_numbers = #tpu.dot_dimension_numbers<[1], [0], [0], [1], [0, 0, 1, 1], [], []>} : vector<32x128xbf16>, vector<128x128xbf16>, vector<32x128xf32> -> vector<32x128xf32>
    %c22_313 = arith.constant 22 : index
    %c0_314 = arith.constant 0 : index
    %c0_315 = arith.constant 0 : index
    %535 = vector.load %arg6[%c22_313, %c0_314, %c0_315] : memref<23x1x128xf32, #tpu.memory_space<vmem>>, vector<1x1x128xf32>
    %536 = vector.shape_cast %535 : vector<1x1x128xf32> to vector<1x128xf32>
    %537 = vector.broadcast %536 : vector<1x128xf32> to vector<32x128xf32>
    %538 = arith.addf %534, %537 : vector<32x128xf32>
    %539 = arith.addf %538, %503 : vector<32x128xf32>
    %cst_316 = arith.constant 0.000000e+00 : f32
    %540 = vector.broadcast %cst_316 : f32 to vector<32x128xf32>
    %541 = arith.maximumf %539, %540 : vector<32x128xf32>
    %c0_317 = arith.constant 0 : index
    %c0_318 = arith.constant 0 : index
    %542 = vector.load %arg7[%c0_317, %c0_318] : memref<128x512xbf16, #tpu.memory_space<vmem>>, vector<128x512xbf16>
    %543 = arith.truncf %541 : vector<32x128xf32> to vector<32x128xbf16>
    %cst_319 = arith.constant dense<0.000000e+00> : vector<32x512xf32>
    %544 = tpu.matmul %543, %542, %cst_319 {dimension_numbers = #tpu.dot_dimension_numbers<[1], [0], [0], [1], [0, 0, 1, 1], [], []>} : vector<32x128xbf16>, vector<128x512xbf16>, vector<32x512xf32> -> vector<32x512xf32>
    %c0_320 = arith.constant 0 : index
    %c0_321 = arith.constant 0 : index
    %545 = vector.load %arg11[%c0_320, %c0_321] : memref<1x512xf32, #tpu.memory_space<vmem>>, vector<1x512xf32>
    %546 = vector.broadcast %545 : vector<1x512xf32> to vector<32x512xf32>
    %547 = arith.addf %544, %546 : vector<32x512xf32>
    %548 = vector.extract_strided_slice %547 {offsets = [0, 0], sizes = [32, 256], strides = [1, 1]} : vector<32x512xf32> to vector<32x256xf32>
    %cst_322 = arith.constant 0.000000e+00 : f32
    %549 = vector.broadcast %cst_322 : f32 to vector<32x256xf32>
    %550 = arith.maximumf %548, %549 : vector<32x256xf32>
    %551 = vector.extract_strided_slice %547 {offsets = [0, 256], sizes = [32, 256], strides = [1, 1]} : vector<32x512xf32> to vector<32x256xf32>
    %c0_323 = arith.constant 0 : index
    %c0_324 = arith.constant 0 : index
    %552 = vector.load %arg8[%c0_323, %c0_324] : memref<512x256xbf16, #tpu.memory_space<vmem>>, vector<512x256xbf16>
    %c0_325 = arith.constant 0 : index
    %c0_326 = arith.constant 0 : index
    %553 = vector.load %arg12[%c0_325, %c0_326] : memref<1x256xf32, #tpu.memory_space<vmem>>, vector<1x256xf32>
    %c4_i32_327 = arith.constant 4 : i32
    %554 = tpu.dynamic_rotate %550 by %c4_i32_327 dim 0 : vector<32x256xf32>, i32 -> vector<32x256xf32>
    %555 = vector.broadcast %36 : vector<32x1xf32> to vector<32x256xf32>
    %556 = arith.mulf %554, %555 : vector<32x256xf32>
    %c28_i32_328 = arith.constant 28 : i32
    %557 = tpu.dynamic_rotate %550 by %c28_i32_328 dim 0 : vector<32x256xf32>, i32 -> vector<32x256xf32>
    %558 = vector.broadcast %40 : vector<32x1xf32> to vector<32x256xf32>
    %559 = arith.mulf %557, %558 : vector<32x256xf32>
    %560 = tpu.concatenate %556, %559 in 1 : vector<32x256xf32>, vector<32x256xf32> -> vector<32x512xf32>
    %561 = arith.truncf %560 : vector<32x512xf32> to vector<32x512xbf16>
    %cst_329 = arith.constant dense<0.000000e+00> : vector<32x256xf32>
    %562 = tpu.matmul %561, %552, %cst_329 {dimension_numbers = #tpu.dot_dimension_numbers<[1], [0], [0], [1], [0, 0, 1, 1], [], []>} : vector<32x512xbf16>, vector<512x256xbf16>, vector<32x256xf32> -> vector<32x256xf32>
    %563 = vector.broadcast %553 : vector<1x256xf32> to vector<32x256xf32>
    %564 = arith.addf %562, %563 : vector<32x256xf32>
    %cst_330 = arith.constant 0.000000e+00 : f32
    %565 = vector.broadcast %cst_330 : f32 to vector<32x256xf32>
    %566 = arith.maximumf %564, %565 : vector<32x256xf32>
    %c0_331 = arith.constant 0 : index
    %c0_332 = arith.constant 0 : index
    %567 = vector.load %arg9[%c0_331, %c0_332] : memref<256x256xbf16, #tpu.memory_space<vmem>>, vector<256x256xbf16>
    %568 = arith.truncf %566 : vector<32x256xf32> to vector<32x256xbf16>
    %cst_333 = arith.constant dense<0.000000e+00> : vector<32x256xf32>
    %569 = tpu.matmul %568, %567, %cst_333 {dimension_numbers = #tpu.dot_dimension_numbers<[1], [0], [0], [1], [0, 0, 1, 1], [], []>} : vector<32x256xbf16>, vector<256x256xbf16>, vector<32x256xf32> -> vector<32x256xf32>
    %c0_334 = arith.constant 0 : index
    %c0_335 = arith.constant 0 : index
    %570 = vector.load %arg13[%c0_334, %c0_335] : memref<1x256xf32, #tpu.memory_space<vmem>>, vector<1x256xf32>
    %571 = vector.broadcast %570 : vector<1x256xf32> to vector<32x256xf32>
    %572 = arith.addf %569, %571 : vector<32x256xf32>
    %573 = arith.addf %551, %572 : vector<32x256xf32>
    %cst_336 = arith.constant 0.000000e+00 : f32
    %574 = vector.broadcast %cst_336 : f32 to vector<32x256xf32>
    %575 = arith.maximumf %573, %574 : vector<32x256xf32>
    %c4_i32_337 = arith.constant 4 : i32
    %c0_i32_338 = arith.constant 0 : i32
    %576 = arith.cmpi eq, %c4_i32_337, %c0_i32_338 : i32
    %c1_i32_339 = arith.constant 1 : i32
    %577 = arith.select %576, %c1_i32_339, %c4_i32_337 : i32
    %578 = vector.broadcast %577 : i32 to vector<32x1xi32>
    %579 = arith.remsi %16, %578 : vector<32x1xi32>
    %c0_i32_340 = arith.constant 0 : i32
    %580 = vector.broadcast %c0_i32_340 : i32 to vector<32x1xi32>
    %581 = arith.cmpi ne, %579, %580 : vector<32x1xi32>
    %c0_i32_341 = arith.constant 0 : i32
    %582 = vector.broadcast %c0_i32_341 : i32 to vector<32x1xi32>
    %583 = arith.cmpi slt, %579, %582 : vector<32x1xi32>
    %c0_i32_342 = arith.constant 0 : i32
    %584 = arith.cmpi slt, %577, %c0_i32_342 : i32
    %585 = vector.broadcast %584 : i1 to vector<32x1xi1>
    %586 = vector.broadcast %585 : vector<32x1xi1> to vector<32x1xi1>
    %587 = arith.xori %583, %586 : vector<32x1xi1>
    %588 = arith.andi %587, %581 : vector<32x1xi1>
    %589 = vector.broadcast %577 : i32 to vector<32x1xi32>
    %590 = arith.addi %579, %589 : vector<32x1xi32>
    %591 = arith.select %588, %590, %579 : vector<32x1xi1>, vector<32x1xi32>
    %c0_i32_343 = arith.constant 0 : i32
    %592 = vector.broadcast %c0_i32_343 : i32 to vector<32x1xi32>
    %593 = arith.cmpi eq, %591, %592 : vector<32x1xi32>
    %cst_344 = arith.constant 2.500000e-01 : f32
    %cst_345 = arith.constant 0.000000e+00 : f32
    %594 = vector.broadcast %cst_344 : f32 to vector<32x1xf32>
    %595 = vector.broadcast %cst_345 : f32 to vector<32x1xf32>
    %596 = arith.select %593, %594, %595 : vector<32x1xi1>, vector<32x1xf32>
    %597 = vector.broadcast %596 : vector<32x1xf32> to vector<32x256xf32>
    %598 = arith.mulf %575, %597 : vector<32x256xf32>
    %599 = vector.extract_strided_slice %598 {offsets = [0, 0], sizes = [16, 256], strides = [1, 1]} : vector<32x256xf32> to vector<16x256xf32>
    %cst_346 = arith.constant dense<0.000000e+00> : vector<256xf32>
    %600 = vector.multi_reduction <add>, %599, %cst_346 [0] : vector<16x256xf32> to vector<256xf32>
    %601 = vector.shape_cast %600 : vector<256xf32> to vector<1x256xf32>
    %602 = vector.extract_strided_slice %598 {offsets = [16, 0], sizes = [16, 256], strides = [1, 1]} : vector<32x256xf32> to vector<16x256xf32>
    %cst_347 = arith.constant dense<0.000000e+00> : vector<256xf32>
    %603 = vector.multi_reduction <add>, %602, %cst_347 [0] : vector<16x256xf32> to vector<256xf32>
    %604 = vector.shape_cast %603 : vector<256xf32> to vector<1x256xf32>
    %cst_348 = arith.constant 0.000000e+00 : f32
    %605 = vector.broadcast %cst_348 : f32 to vector<6x256xf32>
    %606 = tpu.concatenate %601, %604, %605 in 0 : vector<1x256xf32>, vector<1x256xf32>, vector<6x256xf32> -> vector<8x256xf32>
    %c0_349 = arith.constant 0 : index
    %c0_350 = arith.constant 0 : index
    %607 = vector.load %arg10[%c0_349, %c0_350] : memref<256x256xbf16, #tpu.memory_space<vmem>>, vector<256x256xbf16>
    %608 = arith.truncf %606 : vector<8x256xf32> to vector<8x256xbf16>
    %cst_351 = arith.constant dense<0.000000e+00> : vector<8x256xf32>
    %609 = tpu.matmul %608, %607, %cst_351 {dimension_numbers = #tpu.dot_dimension_numbers<[1], [0], [0], [1], [0, 0, 1, 1], [], []>} : vector<8x256xbf16>, vector<256x256xbf16>, vector<8x256xf32> -> vector<8x256xf32>
    %c0_352 = arith.constant 0 : index
    %c0_353 = arith.constant 0 : index
    %610 = vector.load %arg14[%c0_352, %c0_353] : memref<1x256xf32, #tpu.memory_space<vmem>>, vector<1x256xf32>
    %611 = vector.broadcast %610 : vector<1x256xf32> to vector<8x256xf32>
    %612 = arith.addf %609, %611 : vector<8x256xf32>
    %cst_354 = arith.constant 0.000000e+00 : f32
    %613 = vector.broadcast %cst_354 : f32 to vector<8x256xf32>
    %614 = arith.maximumf %612, %613 : vector<8x256xf32>
    %c0_355 = arith.constant 0 : index
    %c0_356 = arith.constant 0 : index
    %615 = vector.load %arg15[%c0_355, %c0_356] : memref<8x256xf32, #tpu.memory_space<vmem>>, vector<8x256xf32>
    tpu.vector_store %arg15[%c0_355, %c0_356], %614 {strides = array<i32>} : memref<8x256xf32, #tpu.memory_space<vmem>>, vector<8x256xf32>,
    return
  }
}

</mosaic_0001>

<bundles_post_ra>
// kernel: textcnn_forward.1
= control target key start
LH: loop header
LB: loop body
LE: loop exit
PB: predicated region body
PF: predicated region fallthrough
CT: control target
= control target key end

     0   :  { %20 = vsyncpa [#allocation3], 0  ;;  %s11897_s0 = inlined_call_operand.vmem [shape: f32[32,128], index: 0, kind: input, shape index: {}]   ;;  %s11898_s1 = inlined_call_operand.vmem [shape: bf16[3,128,256], index: 1, kind: input, shape index: {}]   ;;  %s11899_s2 = inlined_call_operand.hbm [shape: bf16[13,256,128], index: 2, kind: input, shape index: {}]   ;;  %s11900_s3 = inlined_call_operand.hbm [shape: bf16[23,128,128], index: 3, kind: input, shape index: {}]   ;;  %s11901_s4 = inlined_call_operand.hbm [shape: f32[3,1,256], index: 4, kind: input, shape index: {}]   ;;  %s11902_s5 = inlined_call_operand.hbm [shape: f32[13,1,128], index: 5, kind: input, shape index: {}]   ;;  %s11903_s6 = inlined_call_operand.hbm [shape: f32[23,1,128], index: 6, kind: input, shape index: {}]   ;;  %s11904_s7 = inlined_call_operand.hbm [shape: bf16[128,512], index: 7, kind: input, shape index: {}]   ;;  %s11905_s8 = inlined_call_operand.hbm [shape: bf16[512,256], index: 8, kind: input, shape index: {}]   ;;  %s11906_s9 = inlined_call_operand.hbm [shape: bf16[256,256], index: 9, kind: input, shape index: {}]   ;;  %s11907_s10 = inlined_call_operand.hbm [shape: bf16[256,256], index: 10, kind: input, shape index: {}]   ;;  %s11908_s11 = inlined_call_operand.hbm [shape: f32[1,512], index: 11, kind: input, shape index: {}]   ;;  %s11909_s12 = inlined_call_operand.vmem [shape: f32[1,256], index: 12, kind: input, shape index: {}]   ;;  %s11910_s13 = inlined_call_operand.hbm [shape: f32[1,256], index: 13, kind: input, shape index: {}]   ;;  %s11911_s14 = inlined_call_operand.hbm [shape: f32[1,256], index: 14, kind: input, shape index: {}]   ;;  %s11912_s15 = inlined_call_operand.vmem [shape: f32[8,256], index: 15, kind: output, shape index: {}]  }
   0x1   :  { %21 = vsyncpa [#allocation5], 0 }
   0x2   :  { %22 = vsyncpa [#allocation8], 0 }
   0x3   :  { %23 = vsyncpa [#allocation11], 0 }
   0x4   :  { %24 = vsyncpa [#allocation14], 0 }
   0x5   :  { %25 = vsyncpa [#allocation17], 0 }
   0x6   :  { %26 = vsyncpa [#allocation20], 0  ;;  %s10871_s18 = smov [#allocation4]   ;;  %s10872_s20 = smov [#allocation7]  }
   0x7   :  { %s48_s19 = sshll.u32 %s10871_s18, 4  ;;  %s72_s21 = sshll.u32 %s10872_s20, 4  ;;  %s49_s19 = int_to_ptr.vmem [resolvable:$true] %s48_s19  ;;  %s73_s21 = int_to_ptr.vmem [resolvable:$true] %s72_s21 }
   0x8   :  { %s10625_s22 = scalar_lea.vmem %s49_s19, 23552  ;;  %p10630_p1 = scmp.lt.s32.totalorder %s49_s19, %s49_s19 }
   0x9   :  { %p10626_p0 = scmp.ne.s32.totalorder %s49_s19, %s10625_s22  ;;  %p10631_p2 = scmp.lt.s32.totalorder %s10625_s22, %s10625_s22 }
   0xb   :  { %p10632_p3 = por %p10631_p2, %p10630_p1 }
   0xd   :  { %p10633_p4 = pnand %p10632_p3, %p10626_p0 }
   0xf   :  { %10636 = shalt.err (!%p10633_p4)
}
  0x10   :  { %s10873_s23 = smov 64   ;;  %s10874_s24 = smov 4  }
  0x11   :  { %54 = dma.hbm_to_vmem [thread:$0]  %s11900_s3, 23552, %s49_s19, [#allocation5], %s10873_s23, %s10873_s23, %s10874_s24  }
  0x12   :  { %s10645_s27 = scalar_lea.vmem %s73_s21, 208  ;;  %s10649_s28 = scalar_lea.vmem %s73_s21, 224 }
  0x13   :  { %p10646_p5 = scmp.ne.s32.totalorder %s73_s21, %s10645_s27  ;;  %p10650_p6 = scmp.lt.s32.totalorder %s73_s21, %s73_s21 }
  0x14   :  { %p10651_p7 = scmp.lt.s32.totalorder %s10649_s28, %s10645_s27 }
  0x16   :  { %p10652_p8 = por %p10651_p7, %p10650_p6 }
  0x18   :  { %p10653_p9 = pnand %p10652_p8, %p10646_p5 }
  0x1a   :  { %10656 = shalt.err (!%p10653_p9)
}
  0x1b   :  { %s10875_s29 = smov 16   ;;  %s10876_s30 = smov 1  }
  0x1c   :  { %78 = dma.hbm_to_vmem [thread:$0]  %s11902_s5, 208, %s73_s21, [#allocation8], %s10875_s29, %s10875_s29, %s10876_s30  }
  0x1d   :  { %s10877_s18 = smov [#allocation10]  }
  0x1e   :  { %s96_s20 = sshll.u32 %s10877_s18, 4  ;;  %s97_s20 = int_to_ptr.vmem [resolvable:$true] %s96_s20 }
  0x1f   :  { %s10665_s3 = scalar_lea.vmem %s97_s20, 4096  ;;  %p10670_p11 = scmp.lt.s32.totalorder %s97_s20, %s97_s20 }
  0x20   :  { %p10666_p10 = scmp.ne.s32.totalorder %s97_s20, %s10665_s3  ;;  %p10671_p12 = scmp.lt.s32.totalorder %s10665_s3, %s10665_s3 }
  0x22   :  { %p10672_p13 = por %p10671_p12, %p10670_p11 }
  0x24   :  { %p10673_p0 = pnand %p10672_p13, %p10666_p10 }
  0x26   :  { %10676 = shalt.err (!%p10673_p0)
}
  0x27   :  { %s10878_s19 = smov 256   ;;  %s10879_s26 = smov [#allocation13]  }
  0x28   :  { %102 = dma.hbm_to_vmem [thread:$0]  %s11904_s7, 4096, %s97_s20, [#allocation11], %s10878_s19, %s10878_s19, %s10875_s29  }
  0x29   :  { %s120_s27 = sshll.u32 %s10879_s26, 4  ;;  %s10880_s28 = smov [#allocation16]   ;;  %s121_s27 = int_to_ptr.vmem [resolvable:$true] %s120_s27 }
  0x2a   :  { %s145_s5 = sshll.u32 %s10880_s28, 4  ;;  %s10685_s21 = scalar_lea.vmem %s121_s27, 4096  ;;  %s146_s5 = int_to_ptr.vmem [resolvable:$true] %s145_s5 }
  0x2b   :  { %p10686_p1 = scmp.ne.s32.totalorder %s121_s27, %s10685_s21  ;;  %p10690_p2 = scmp.lt.s32.totalorder %s121_s27, %s121_s27 }
  0x2c   :  { %p10691_p3 = scmp.lt.s32.totalorder %s10685_s21, %s10685_s21 }
  0x2e   :  { %p10692_p4 = por %p10691_p3, %p10690_p2 }
  0x30   :  { %p10693_p5 = pnand %p10692_p4, %p10686_p1 }
  0x32   :  { %10696 = shalt.err (!%p10693_p5)
}
  0x33   :  { %s10881_s16 = smov 128   ;;  %s10882_s17 = smov 8  }
  0x34   :  { %126 = dma.hbm_to_vmem [thread:$0]  %s11906_s9, 4096, %s121_s27, [#allocation14], %s10881_s16, %s10881_s16, %s10882_s17  }
  0x35   :  { %s10705_s20 = scalar_lea.vmem %s146_s5, 64  ;;  %p10710_p7 = scmp.lt.s32.totalorder %s146_s5, %s146_s5 }
  0x36   :  { %p10706_p6 = scmp.ne.s32.totalorder %s146_s5, %s10705_s20  ;;  %p10711_p8 = scmp.lt.s32.totalorder %s10705_s20, %s10705_s20 }
  0x38   :  { %p10712_p9 = por %p10711_p8, %p10710_p7 }
  0x3a   :  { %p10713_p10 = pnand %p10712_p9, %p10706_p6 }
  0x3c   :  { %10716 = shalt.err (!%p10713_p10)
}
  0x3d   :  { %148 = dma.hbm_to_vmem [thread:$0]  %s11908_s11, 64, %s146_s5, [#allocation17]  }
  0x3e   :  { %s10883_s22 = smov [#allocation2]   ;;  %s10884_s26 = smov [#allocation6]  }
  0x3f   :  { %s36_s25 = sshll.u32 %s10883_s22, 4  ;;  %s60_s28 = sshll.u32 %s10884_s26, 4  ;;  %s37_s25 = int_to_ptr.vmem [resolvable:$true] %s36_s25  ;;  %s61_s28 = int_to_ptr.vmem [resolvable:$true] %s60_s28 }
  0x40   :  { %s10725_s21 = scalar_lea.vmem %s37_s25, 26624  ;;  %p10730_p12 = scmp.lt.s32.totalorder %s37_s25, %s37_s25 }
  0x41   :  { %p10726_p11 = scmp.ne.s32.totalorder %s37_s25, %s10725_s21  ;;  %p10731_p13 = scmp.lt.s32.totalorder %s10725_s21, %s10725_s21 }
  0x43   :  { %p10732_p0 = por %p10731_p13, %p10730_p12 }
  0x45   :  { %p10733_p1 = pnand %p10732_p0, %p10726_p11 }
  0x47   :  { %10736 = shalt.err (!%p10733_p1)
}
  0x48   :  { %42 = dma.hbm_to_vmem [thread:$0]  %s11899_s2, 26624, %s37_s25, [#allocation3], %s10873_s23, %s10873_s23, %s10874_s24  }
  0x49   :  { %s10745_s11 = scalar_lea.vmem %s61_s28, 96  ;;  %p10750_p3 = scmp.lt.s32.totalorder %s61_s28, %s61_s28 }
  0x4a   :  { %p10746_p2 = scmp.ne.s32.totalorder %s61_s28, %s10745_s11  ;;  %p10751_p4 = scmp.lt.s32.totalorder %s10745_s11, %s10745_s11 }
  0x4c   :  { %p10752_p5 = por %p10751_p4, %p10750_p3 }
  0x4e   :  { %p10753_p6 = pnand %p10752_p5, %p10746_p2 }
  0x50   :  { %10756 = shalt.err (!%p10753_p6)
}
  0x51   :  { %s10885_s5 = smov 32   ;;  %s10886_s18 = smov 2  }
  0x52   :  { %66 = dma.hbm_to_vmem [thread:$0]  %s11901_s4, 96, %s61_s28, [#allocation5], %s10885_s5, %s10885_s5, %s10886_s18  }
  0x53   :  { %s10887_s3 = smov [#allocation9]   ;;  %s10888_s22 = smov [#allocation12]  }
  0x54   :  { %s84_s19 = sshll.u32 %s10887_s3, 4  ;;  %s108_s26 = sshll.u32 %s10888_s22, 4  ;;  %s85_s19 = int_to_ptr.vmem [resolvable:$true] %s84_s19  ;;  %s109_s26 = int_to_ptr.vmem [resolvable:$true] %s108_s26 }
  0x55   :  { %s10765_s2 = scalar_lea.vmem %s85_s19, 368  ;;  %s10769_s23 = scalar_lea.vmem %s85_s19, 384 }
  0x56   :  { %p10766_p7 = scmp.ne.s32.totalorder %s85_s19, %s10765_s2  ;;  %p10770_p8 = scmp.lt.s32.totalorder %s85_s19, %s85_s19 }
  0x57   :  { %p10771_p9 = scmp.lt.s32.totalorder %s10769_s23, %s10765_s2 }
  0x59   :  { %p10772_p10 = por %p10771_p9, %p10770_p8 }
  0x5b   :  { %p10773_p11 = pnand %p10772_p10, %p10766_p7 }
  0x5d   :  { %10776 = shalt.err (!%p10773_p11)
}
  0x5e   :  { %90 = dma.hbm_to_vmem [thread:$0]  %s11903_s6, 368, %s85_s19, [#allocation8], %s10875_s29, %s10875_s29, %s10876_s30  }
  0x5f   :  { %s10785_s4 = scalar_lea.vmem %s109_s26, 8192  ;;  %p10790_p13 = scmp.lt.s32.totalorder %s109_s26, %s109_s26 }
  0x60   :  { %p10786_p12 = scmp.ne.s32.totalorder %s109_s26, %s10785_s4  ;;  %p10791_p0 = scmp.lt.s32.totalorder %s10785_s4, %s10785_s4 }
  0x62   :  { %p10792_p1 = por %p10791_p0, %p10790_p13 }
  0x64   :  { %p10793_p2 = pnand %p10792_p1, %p10786_p12 }
  0x66   :  { %10796 = shalt.err (!%p10793_p2)
}
  0x67   :  { %114 = dma.hbm_to_vmem [thread:$0]  %s11905_s8, 8192, %s109_s26, [#allocation11], %s10881_s16, %s10881_s16, %s10882_s17  }
  0x68   :  { %s10889_s9 = smov [#allocation15]   ;;  %s10890_s11 = smov [#allocation18]  }
  0x69   :  { %s132_s27 = sshll.u32 %s10889_s9, 4  ;;  %s157_s5 = sshll.u32 %s10890_s11, 4  ;;  %s133_s27 = int_to_ptr.vmem [resolvable:$true] %s132_s27  ;;  %s158_s5 = int_to_ptr.vmem [resolvable:$true] %s157_s5 }
  0x6a   :  { %s10805_s6 = scalar_lea.vmem %s133_s27, 4096  ;;  %p10810_p4 = scmp.lt.s32.totalorder %s133_s27, %s133_s27 }
  0x6b   :  { %p10806_p3 = scmp.ne.s32.totalorder %s133_s27, %s10805_s6  ;;  %p10811_p5 = scmp.lt.s32.totalorder %s10805_s6, %s10805_s6 }
  0x6d   :  { %p10812_p6 = por %p10811_p5, %p10810_p4 }
  0x6f   :  { %p10813_p7 = pnand %p10812_p6, %p10806_p3 }
  0x71   :  { %10816 = shalt.err (!%p10813_p7)
}
  0x72   :  { %138 = dma.hbm_to_vmem [thread:$0]  %s11907_s10, 4096, %s133_s27, [#allocation14], %s10881_s16, %s10881_s16, %s10882_s17  }
  0x73   :  { %s10825_s8 = scalar_lea.vmem %s158_s5, 32  ;;  %p10830_p9 = scmp.lt.s32.totalorder %s158_s5, %s158_s5 }
  0x74   :  { %p10826_p8 = scmp.ne.s32.totalorder %s158_s5, %s10825_s8  ;;  %p10831_p10 = scmp.lt.s32.totalorder %s10825_s8, %s10825_s8 }
  0x76   :  { %p10832_p11 = por %p10831_p10, %p10830_p9 }
  0x78   :  { %p10833_p12 = pnand %p10832_p11, %p10826_p8 }
  0x7a   :  { %10836 = shalt.err (!%p10833_p12)
}
  0x7b   :  { %160 = dma.hbm_to_vmem [thread:$0]  %s11910_s13, 32, %s158_s5, [#allocation17]  }
  0x7c   :  { %s10891_s20 = smov [#allocation19]  }
  0x7d   :  { %s167_s3 = sshll.u32 %s10891_s20, 4  ;;  %s168_s3 = int_to_ptr.vmem [resolvable:$true] %s167_s3 }
  0x7e   :  { %s10845_s19 = scalar_lea.vmem %s168_s3, 32  ;;  %p10850_p0 = scmp.lt.s32.totalorder %s168_s3, %s168_s3 }
  0x7f   :  { %p10846_p13 = scmp.ne.s32.totalorder %s168_s3, %s10845_s19  ;;  %p10851_p1 = scmp.lt.s32.totalorder %s10845_s19, %s10845_s19 }
  0x81   :  { %p10852_p2 = por %p10851_p1, %p10850_p0 }
  0x83   :  { %p10853_p3 = pnand %p10852_p2, %p10846_p13 }
  0x85   :  { %10856 = shalt.err (!%p10853_p3)
}
  0x86   :  { %170 = dma.hbm_to_vmem [thread:$0]  %s11911_s14, 32, %s168_s3, [#allocation20]  }
  0x87   :  { %10857 = dma.done.wait [#allocation3], 26624  }
  0x88   :  { %10858 = vsyncadd [#allocation3], 4294940672 }
  0x89   :  { %10859 = dma.done.wait [#allocation5], 23648  }
  0x8a   :  { %10860 = vsyncadd [#allocation5], 4294943648 }
  0x8b   :  { %10861 = dma.done.wait [#allocation8], 576  }
  0x8c   :  { %10862 = vsyncadd [#allocation8], 4294966720 }
  0x8d   :  { %10863 = dma.done.wait [#allocation11], 12288  }
  0x8e   :  { %10864 = vsyncadd [#allocation11], 4294955008 }
  0x8f   :  { %10865 = dma.done.wait [#allocation14], 8192  }
  0x90   :  { %10866 = vsyncadd [#allocation14], 4294959104 }
  0x91   :  { %10867 = dma.done.wait [#allocation17], 96  }
  0x92   :  { %10868 = vsyncadd [#allocation17], 4294967200 }
  0x93   :  { %10869 = dma.done.wait [#allocation20], 32  }
  0x94   :  { %10870 = vsyncadd [#allocation20], 4294967264  ;;  %v10892_v0 = vmov 0   ;;  %v9913_v1 = vld [vmem:[%s11898_s1 + $0x74] ss:$8 sps:$4 sm:$0xff]   ;;  %v333_v21 = vld [vmem:[%s11897_s0] sm:$0xff]  ;;  %v208_v33 = vlaneseq }
  0x95   :  { %479 = vmatprep.mubr.bf16.mxu0 %v10892_v0  ;;  %v9915_v2 = vld [vmem:[%s11898_s1 + $0x70] ss:$8 sps:$4 sm:$0xff]   ;;  %447 = vmatprep.subr.bf16.mxu0 %v9913_v1  ;;  %v9916_v3 = vld [vmem:[%s11898_s1 + $0x64] ss:$8 sps:$4 sm:$0xff]   ;;  %v9918_v4 = vld [vmem:[%s11898_s1 + $0x60] ss:$8 sps:$4 sm:$0xff]  }
  0x96   :  { %448 = vmatpush1.bf16.msra.mxu0 %v9915_v2  ;;  %v9919_v5 = vld [vmem:[%s11898_s1 + $0x54] ss:$8 sps:$4 sm:$0xff]   ;;  %v9921_v6 = vld [vmem:[%s11898_s1 + $0x50] ss:$8 sps:$4 sm:$0xff]   ;;  %v9922_v7 = vld [vmem:[%s11898_s1 + $0x44] ss:$8 sps:$4 sm:$0xff]  }
  0x97   :  { %449 = vmatprep.subr.bf16.mxu0 %v9916_v3  ;;  %v9924_v8 = vld [vmem:[%s11898_s1 + $0x40] ss:$8 sps:$4 sm:$0xff]   ;;  %v9925_v9 = vld [vmem:[%s11898_s1 + $0x34] ss:$8 sps:$4 sm:$0xff]   ;;  %v9927_v11 = vld [vmem:[%s11898_s1 + $0x30] ss:$8 sps:$4 sm:$0xff]  }
  0x98   :  { %v9937_v10 = vld [vmem:[#allocation2 + $0x78] sm:$0xff]   ;;  %v9939_v13 = vld [vmem:[#allocation2 + $0x70] sm:$0xff]   ;;  %v9928_v15 = vld [vmem:[%s11898_s1 + $0x24] ss:$8 sps:$4 sm:$0xff]   ;;  %v11094_v36 = vshrl.u32 %v208_v33, 7  ;;  %v10893_v52 = vmov 0.0  }
  0x99   :  { %v9938_v12 = vld [vmem:[#allocation2 + $0x38] sm:$0xff]   ;;  %8836 = vmatprep.subr.bf16.mxu1 %v9937_v10  ;;  %v9940_v14 = vld [vmem:[#allocation2 + $0x30] sm:$0xff]   ;;  %v9930_v16 = vld [vmem:[%s11898_s1 + $0x20] ss:$8 sps:$4 sm:$0xff]  }
  0x9a   :  { %450 = vmatpush1.bf16.msra.mxu0 %v9918_v4  ;;  %8837 = vmatpush3.bf16.msra.mxu1 %v9938_v12  ;;  %v9931_v17 = vld [vmem:[%s11898_s1 + $0x14] ss:$8 sps:$4 sm:$0xff]   ;;  %v9933_v18 = vld [vmem:[%s11898_s1 + $0x10] ss:$8 sps:$4 sm:$0xff]   ;;  %v9934_v19 = vld [vmem:[%s11898_s1 + $0x4] ss:$8 sps:$4 sm:$0xff]  }
  0x9b   :  { %451 = vmatprep.subr.bf16.mxu0 %v9919_v5  ;;  %8838 = vmatprep.subr.bf16.mxu1 %v9939_v13  ;;  %v9936_v20 = vld [vmem:[%s11898_s1] ss:$8 sps:$4 sm:$0xff]   ;;  %v335_v24 = vld [vmem:[%s11897_s0 + $0x10] sm:$0xff]  ;;  %v336_v25 = vld [vmem:[%s11897_s0 + $0x18] sm:$0xff]  ;;  %v210_v39 = vadd.s32 8, %v11094_v36  ;;  %v211_v41 = vadd.s32 16, %v11094_v36 }
  0x9c   :  { %v334_v22 = vld [vmem:[%s11897_s0 + $0x8] sm:$0xff]  ;;  %v354_v26 = vpack.c.bf16 %v336_v25, %v335_v24  ;;  %v9943_v29 = vld [vmem:[#allocation2 + $0x60] sm:$0xff]   ;;  %v9945_v31 = vld [vmem:[#allocation2 + $0x58] sm:$0xff]   ;;  %v212_v44 = vadd.s32 24, %v11094_v36  ;;  %v11102_v45 = vand.u32 15, %v11094_v36  ;;  %v11113_v51 = vsub.s32 0, %v11094_v36 }
  0x9d   :  { %v353_v23 = vpack.c.bf16 %v334_v22, %v333_v21  ;;  %v9941_v27 = vld [vmem:[#allocation2 + $0x68] sm:$0xff]   ;;  %v9944_v30 = vld [vmem:[#allocation2 + $0x20] sm:$0xff]   ;;  %v9946_v32 = vld [vmem:[#allocation2 + $0x18] sm:$0xff]   ;;  %v11098_v42 = vand.u32 15, %v210_v39  ;;  %v11106_v47 = vand.u32 15, %v211_v41  ;;  %vm554_vm4 = vcmp.lt.s32.totalorder %v11094_v36, 7 }
  0x9e   :  { %452 = vmatpush1.bf16.msra.mxu0 %v9921_v6  ;;  %8839 = vmatpush3.bf16.msra.mxu1 %v9940_v14  ;;  %v9942_v28 = vld [vmem:[#allocation2 + $0x28] sm:$0xff]   ;;  %v9947_v34 = vld [vmem:[#allocation2 + $0x50] sm:$0xff]   ;;  %v9951_v40 = vld [vmem:[#allocation2 + $0x40] sm:$0xff]   ;;  %v11104_v46 = vand.u32 15, %v212_v44  ;;  %vm261_vm2 = vcmp.ge.s32.totalorder %v11102_v45, 1  ;;  %vm541_vm5 = vcmp.lt.s32.totalorder %v11094_v36, 1 }
  0x9f   :  { %453 = vmatprep.subr.bf16.mxu0 %v9922_v7  ;;  %8840 = vmatprep.subr.bf16.mxu1 %v9941_v27  ;;  %v9948_v35 = vld [vmem:[#allocation2 + $0x10] sm:$0xff]   ;;  %v9949_v37 = vld [vmem:[#allocation2 + $0x48] sm:$0xff]   ;;  %v9952_v43 = vld [vmem:[#allocation2] sm:$0xff]   ;;  %vm274_vm0 = vcmp.le.s32.totalorder %v11098_v42, 14  ;;  %vm263_vm1 = vcmp.ge.s32.totalorder %v11106_v47, 1  ;;  %v11122_v55 = vsel %vm261_vm2, 1.0, %v10893_v52 }
  0xa0   :  { %v9950_v38 = vld [vmem:[#allocation2 + $0x8] sm:$0xff]   ;;  %v9953_v48 = vld [vmem:[#allocation4 + $0x38] sm:$0xff]   ;;  %v9954_v49 = vld [vmem:[#allocation4 + $0x30] sm:$0xff]   ;;  %vm276_vm3 = vcmp.le.s32.totalorder %v11104_v46, 14  ;;  %v11116_v53 = vsel %vm274_vm0, 1.0, %v10893_v52  ;;  %v11119_v54 = vsel %vm263_vm1, 1.0, %v10893_v52 }
  0xa1   :  { %v9955_v50 = vld [vmem:[#allocation4 + $0x28] sm:$0xff]   ;;  %v11125_v56 = vsel %vm276_vm3, 1.0, %v10893_v52  ;;  %v11127_v57 = vld [vmem:[#allocation6] sm:$0x3]  ;;  %v9961_v41 = vld [vmem:[#allocation4 + $0x78] sm:$0xff]   ;;  %vm285_vm6 = vcmp.ge.s32.totalorder %v11102_v45, 2 }
  0xa2   :  { %454 = vmatpush1.bf16.msra.mxu0 %v9924_v8  ;;  %8841 = vmatpush3.bf16.msra.mxu1 %v9942_v28  ;;  %v360_v58 = vrot.slane %v11127_v57, %v11113_v51  ;;  %v9959_v39 = vld [vmem:[#allocation4 + $0x8] sm:$0xff]   ;;  %vm300_vm7 = vcmp.le.s32.totalorder %v11104_v46, 12  ;;  %vm298_vm8 = vcmp.le.s32.totalorder %v11098_v42, 12  ;;  %vm2494_vm9 = vcmp.lt.s32.totalorder %v11094_v36, 2 }
  0xa3   :  { %455 = vmatprep.subr.bf16.mxu0 %v9925_v9  ;;  %8842 = vmatprep.subr.bf16.mxu1 %v9943_v29  ;;  %v9963_v44 = vld [vmem:[#allocation4 + $0x68] sm:$0xff]   ;;  %vm2507_vm10 = vcmp.lt.s32.totalorder %v11094_v36, 6  ;;  %vm287_vm11 = vcmp.ge.s32.totalorder %v11106_v47, 2  ;;  %vm309_vm12 = vcmp.ge.s32.totalorder %v11102_v45, 4  ;;  %vm324_vm13 = vcmp.le.s32.totalorder %v11104_v46, 8 }
  0xa4   :  { %vm4449_vm14 = vcmp.lt.s32.totalorder %v11094_v36, 4  ;;  %vm322_vm15 = vcmp.le.s32.totalorder %v11098_v42, 8  ;;  %vm311_vm0 = vcmp.ge.s32.totalorder %v11106_v47, 4 }
  0xa6   :  { %456 = vmatpush1.bf16.msra.mxu0 %v9927_v11  ;;  %8843 = vmatpush3.bf16.msra.mxu1 %v9944_v30 }
  0xa7   :  { %457 = vmatprep.subr.bf16.mxu0 %v9928_v15  ;;  %8844 = vmatprep.subr.bf16.mxu1 %v9945_v31 }
  0xaa   :  { %458 = vmatpush1.bf16.msra.mxu0 %v9930_v16  ;;  %8845 = vmatpush3.bf16.msra.mxu1 %v9946_v32 }
  0xab   :  { %459 = vmatprep.subr.bf16.mxu0 %v9931_v17  ;;  %8846 = vmatprep.subr.bf16.mxu1 %v9947_v34 }
  0xae   :  { %460 = vmatpush1.bf16.msra.mxu0 %v9933_v18  ;;  %8847 = vmatpush3.bf16.msra.mxu1 %v9948_v35  ;;  %v9956_v35 = vld [vmem:[#allocation4 + $0x20] sm:$0xff]  }
  0xaf   :  { %461 = vmatprep.subr.bf16.mxu0 %v9934_v19  ;;  %8848 = vmatprep.subr.bf16.mxu1 %v9949_v37  ;;  %v9957_v37 = vld [vmem:[#allocation4 + $0x18] sm:$0xff]  }
  0xb2   :  { %462 = vmatpush1.bf16.msra.mxu0 %v9936_v20  ;;  %8849 = vmatpush3.bf16.msra.mxu1 %v9950_v38  ;;  %v9958_v38 = vld [vmem:[#allocation4 + $0x10] sm:$0xff]  }
  0xb3   :  { %8850 = vmatprep.subr.bf16.mxu1 %v9951_v40  ;;  %9430 = vmatprep.subr.bf16.mxu0 %v9953_v48  ;;  %v9960_v40 = vld [vmem:[#allocation4] sm:$0xff]  }
  0xb5   :  { %480 = vmatmul.mubr.bf16.vlgmr.msra.gmra.mxu0 %v353_v23 }
  0xb6   :  { %489 = vmatprep.mubr.bf16.mxu0 %v10892_v0  ;;  %8851 = vmatpush3.bf16.msra.mxu1 %v9952_v43  ;;  %v9962_v43 = vld [vmem:[#allocation4 + $0x70] sm:$0xff]  }
  0xb7   :  { %9431 = vmatpush3.bf16.msra.mxu0 %v9953_v48  ;;  %9450 = vmatprep.subr.bf16.mxu1 %v9961_v41  ;;  %v9964_v48 = vld [vmem:[#allocation4 + $0x60] sm:$0xff]  }
  0xb8   :  { %9432 = vmatprep.subr.bf16.mxu0 %v9954_v49 }
  0xbb   :  { %9433 = vmatpush3.bf16.msra.mxu0 %v9954_v49 }
  0xbc   :  { %9434 = vmatprep.subr.bf16.mxu0 %v9955_v50 }
  0xbd   :  { %490 = vmatmul.mubr.bf16.gmra.mxu0 %v354_v26 }
  0xbf   :  { %9435 = vmatpush3.bf16.msra.mxu0 %v9955_v50 }
  0xc0   :  { %9436 = vmatprep.subr.bf16.mxu0 %v9956_v35 }
  0xc3   :  { %9437 = vmatpush3.bf16.msra.mxu0 %v9956_v35 }
  0xc4   :  { %9438 = vmatprep.subr.bf16.mxu0 %v9957_v37 }
  0xc7   :  { %9439 = vmatpush3.bf16.msra.mxu0 %v9957_v37 }
  0xc8   :  { %9440 = vmatprep.subr.bf16.mxu0 %v9958_v38 }
  0xcb   :  { %9441 = vmatpush3.bf16.msra.mxu0 %v9958_v38 }
  0xcc   :  { %9442 = vmatprep.subr.bf16.mxu0 %v9959_v39 }
  0xcf   :  { %9443 = vmatpush3.bf16.msra.mxu0 %v9959_v39 }
  0xd0   :  { %9444 = vmatprep.subr.bf16.mxu0 %v9960_v40 }
  0xd3   :  { %9445 = vmatpush3.bf16.msra.mxu0 %v9960_v40 }
 0x175   :  { %v481_v59 = vpop.f32.mrf.mxu0 }
 0x176   :  { %v482_v60 = vadd.f32 %v481_v59, %v360_v58  ;;  %v8178_v59 = vld [vmem:[#allocation7] ss:$0 sm:$0xff] }
 0x177   :  { %v11131_v61 = vpop.f32.mrf.mxu0 }
 0x178   :  { %v500_v62 = vmax.f32 %v482_v60, 0.0 }
 0x179   :  { %v485_v63 = vpop.f32.mrf.mxu0 }
 0x17a   :  { %v537_v1 = vrot.slane %v500_v62, 7  ;;  %v550_v2 = vrot.slane %v500_v62, 1  ;;  %v486_v3 = vadd.f32 %v485_v63, %v360_v58 }
 0x17b   :  { %v11133_v4 = vpop.f32.mrf.mxu0 }
 0x17c   :  { %v501_v5 = vmax.f32 %v486_v3, 0.0 }
 0x17d   :  { %v491_v6 = vpop.f32.mrf.mxu0 }
 0x17e   :  { %v538_v7 = vrot.slane %v501_v5, 7  ;;  %v551_v8 = vrot.slane %v501_v5, 1  ;;  %v492_v9 = vadd.f32 %v491_v6, %v360_v58 }
 0x17f   :  { %v11136_v10 = vpop.f32.mrf.mxu0 }
 0x180   :  { %v502_v11 = vmax.f32 %v492_v9, 0.0  ;;  %v557_v21 = vsel %vm554_vm4, %v550_v2, %v551_v8  ;;  %v544_v27 = vsel %vm541_vm5, %v537_v1, %v538_v7 }
 0x181   :  { %v495_v12 = vpop.f32.mrf.mxu0 }
 0x182   :  { %v539_v13 = vrot.slane %v502_v11, 7  ;;  %v552_v14 = vrot.slane %v502_v11, 1  ;;  %v496_v15 = vadd.f32 %v495_v12, %v360_v58 }
 0x184   :  { %v503_v16 = vmax.f32 %v496_v15, 0.0  ;;  %v556_v17 = vsel %vm554_vm4, %v551_v8, %v552_v14  ;;  %v543_v31 = vsel %vm541_vm5, %v538_v7, %v539_v13 }
 0x185   :  { %v560_v18 = vmul.f32 %v11116_v53, %v556_v17  ;;  %v548_v33 = vmul.f32 %v11119_v54, %v543_v31  ;;  %v497_v31 = vpop.f32.mrf.mxu0 }
 0x186   :  { %v540_v19 = vrot.slane %v503_v16, 7  ;;  %v553_v20 = vrot.slane %v503_v16, 1 }
 0x187   :  { %v564_v22 = vpack.c.bf16 %v560_v18, %v557_v21  ;;  %v9967_v21 = vld [vmem:[#allocation4 + $0x48] sm:$0xff]  }
 0x188   :  { %v545_v23 = vsel %vm541_vm5, %v540_v19, %v537_v1  ;;  %v558_v24 = vsel %vm554_vm4, %v553_v20, %v550_v2  ;;  %v555_v28 = vsel %vm554_vm4, %v552_v14, %v553_v20  ;;  %v542_v32 = vsel %vm541_vm5, %v539_v13, %v540_v19  ;;  %v9965_v19 = vld [vmem:[#allocation4 + $0x58] sm:$0xff]   ;;  %v9966_v20 = vld [vmem:[#allocation4 + $0x50] sm:$0xff]  }
 0x189   :  { %701 = vmatprep.mubr.bf16.mxu1 %v564_v22  ;;  %v546_v25 = vmul.f32 %v11122_v55, %v545_v23  ;;  %v562_v26 = vmul.f32 %v11125_v56, %v558_v24  ;;  %v565_v34 = vpack.c.bf16 %v542_v32, %v548_v33  ;;  %v9968_v22 = vld [vmem:[#allocation4 + $0x40] sm:$0xff]   ;;  %v9969_v23 = vld [vmem:[#allocation2 + $0xf8] sm:$0xff]  }
 0x18a   :  { %v9970_v24 = vld [vmem:[#allocation2 + $0xb8] sm:$0xff]   ;;  %8884 = vmatprep.subr.bf16.mxu0 %v9969_v23 }
 0x18b   :  { %v563_v29 = vpack.c.bf16 %v544_v27, %v546_v25  ;;  %v566_v30 = vpack.c.bf16 %v562_v26, %v555_v28  ;;  %v9971_v25 = vld [vmem:[#allocation2 + $0xf0] sm:$0xff]   ;;  %v9973_v27 = vld [vmem:[#allocation2 + $0xe8] sm:$0xff]  }
 0x18c   :  { %v9972_v26 = vld [vmem:[#allocation2 + $0xb0] sm:$0xff]   ;;  %v9974_v28 = vld [vmem:[#allocation2 + $0xa8] sm:$0xff]  }
 0x18d   :  { %702 = vmatmul.mubr.bf16.vlgmr.msra.gmra.mxu1 %v563_v29  ;;  %v9975_v29 = vld [vmem:[#allocation2 + $0xe0] sm:$0xff]  }
 0x18e   :  { %709 = vmatprep.mubr.bf16.mxu1 %v566_v30  ;;  %9451 = vmatpush3.bf16.msra.mxu1 %v9961_v41  ;;  %v11160_v30 = vsub.s32 1, %v11094_v36 }
 0x18f   :  { %9452 = vmatprep.subr.bf16.mxu1 %v9962_v43 }
 0x190   :  { %v364_v33 = vrot.slane %v11127_v57, %v11160_v30 }
 0x192   :  { %9453 = vmatpush3.bf16.msra.mxu1 %v9962_v43  ;;  %v484_v40 = vadd.f32 %v11131_v61, %v364_v33  ;;  %v498_v41 = vadd.f32 %v497_v31, %v364_v33 }
 0x193   :  { %9454 = vmatprep.subr.bf16.mxu1 %v9963_v44 }
 0x195   :  { %710 = vmatmul.mubr.bf16.gmra.mxu1 %v565_v34  ;;  %v8195_v34 = vld [vmem:[#allocation9] ss:$0 sm:$0xff] }
 0x196   :  { %9455 = vmatpush3.bf16.msra.mxu1 %v9963_v44  ;;  %v494_v44 = vadd.f32 %v11136_v10, %v364_v33 }
 0x197   :  { %9456 = vmatprep.subr.bf16.mxu1 %v9964_v48 }
 0x19a   :  { %9457 = vmatpush3.bf16.msra.mxu1 %v9964_v48 }
 0x19b   :  { %9458 = vmatprep.subr.bf16.mxu1 %v9965_v19 }
 0x19e   :  { %9459 = vmatpush3.bf16.msra.mxu1 %v9965_v19 }
 0x19f   :  { %9460 = vmatprep.subr.bf16.mxu1 %v9966_v20 }
 0x1a2   :  { %9461 = vmatpush3.bf16.msra.mxu1 %v9966_v20 }
 0x1a3   :  { %9462 = vmatprep.subr.bf16.mxu1 %v9967_v21 }
 0x1a6   :  { %9463 = vmatpush3.bf16.msra.mxu1 %v9967_v21 }
 0x1a7   :  { %9464 = vmatprep.subr.bf16.mxu1 %v9968_v22 }
 0x1aa   :  { %9465 = vmatpush3.bf16.msra.mxu1 %v9968_v22 }
 0x24d   :  { %v8852_v49 = vpop.f32.mrf.mxu1 }
 0x24f   :  { %v8853_v50 = vpop.f32.mrf.mxu1 }
 0x250   :  { %v8854_v58 = vadd.f32 %v8853_v50, %v8852_v49  ;;  %v488_v49 = vadd.f32 %v11133_v4, %v364_v33 }
 0x251   :  { %v8855_v60 = vpop.f32.mrf.mxu1 }
 0x252   :  { %v704_v63 = vadd.f32 %v8854_v58, %v8178_v59 }
 0x253   :  { %v8856_v62 = vpop.f32.mrf.mxu1 }
 0x254   :  { %v8857_v1 = vadd.f32 %v8856_v62, %v8855_v60  ;;  %v718_v6 = vmax.f32 %v704_v63, 0.0 }
 0x255   :  { %v8858_v2 = vpop.f32.mrf.mxu1 }
 0x256   :  { %v707_v3 = vadd.f32 %v8857_v1, %v8178_v59 }
 0x257   :  { %v8859_v5 = vpop.f32.mrf.mxu1 }
 0x258   :  { %v719_v7 = vmax.f32 %v707_v3, 0.0  ;;  %v8860_v8 = vadd.f32 %v8859_v5, %v8858_v2  ;;  %v9976_v2 = vld [vmem:[#allocation2 + $0xa0] sm:$0xff]   ;;  %v9977_v3 = vld [vmem:[#allocation2 + $0xd8] sm:$0xff]  }
 0x259   :  { %v8861_v9 = vpop.f32.mrf.mxu1  ;;  %v9978_v5 = vld [vmem:[#allocation2 + $0x98] sm:$0xff]  }
 0x25a   :  { %v738_v11 = vpack.c.bf16 %v719_v7, %v718_v6  ;;  %v712_v13 = vadd.f32 %v8860_v8, %v8178_v59  ;;  %v9979_v6 = vld [vmem:[#allocation2 + $0xd0] sm:$0xff]   ;;  %v9981_v8 = vld [vmem:[#allocation2 + $0xc8] sm:$0xff]  }
 0x25b   :  { %v8862_v12 = vpop.f32.mrf.mxu1  ;;  %v9980_v7 = vld [vmem:[#allocation2 + $0x90] sm:$0xff]  }
 0x25c   :  { %v8863_v14 = vadd.f32 %v8862_v12, %v8861_v9  ;;  %9446 = vmatprep.mubr.bf16.mxu0 %v738_v11  ;;  %v720_v16 = vmax.f32 %v712_v13, 0.0  ;;  %v9982_v9 = vld [vmem:[#allocation2 + $0x88] sm:$0xff]   ;;  %v9983_v11 = vld [vmem:[#allocation2 + $0xc0] sm:$0xff]   ;;  %v9985_v13 = vld [vmem:[#allocation4 + $0xb8] sm:$0xff]  }
 0x25d   :  { %v9984_v12 = vld [vmem:[#allocation2 + $0x80] sm:$0xff]   ;;  %9470 = vmatprep.subr.bf16.mxu1 %v9985_v13 }
 0x25e   :  { %v715_v15 = vadd.f32 %v8863_v14, %v8178_v59  ;;  %v9986_v14 = vld [vmem:[#allocation4 + $0xb0] sm:$0xff]  }
 0x260   :  { %v721_v17 = vmax.f32 %v715_v15, 0.0  ;;  %v9987_v15 = vld [vmem:[#allocation4 + $0xa8] sm:$0xff]  }
 0x262   :  { %v739_v18 = vpack.c.bf16 %v721_v17, %v720_v16  ;;  %v8204_v17 = vld [vmem:[#allocation9 + $0x1] ss:$0 sm:$0xff] }
 0x264   :  { %9447 = vmatmul.mubr.bf16.vlgmr.msra.gmra.mxu0 %v739_v18 }
 0x265   :  { %8885 = vmatpush3.bf16.msra.mxu0 %v9970_v24 }
 0x266   :  { %8886 = vmatprep.subr.bf16.mxu0 %v9971_v25 }
 0x269   :  { %8887 = vmatpush3.bf16.msra.mxu0 %v9972_v26 }
 0x26a   :  { %8888 = vmatprep.subr.bf16.mxu0 %v9973_v27 }
 0x26d   :  { %8889 = vmatpush3.bf16.msra.mxu0 %v9974_v28 }
 0x26e   :  { %8890 = vmatprep.subr.bf16.mxu0 %v9975_v29 }
 0x271   :  { %8891 = vmatpush3.bf16.msra.mxu0 %v9976_v2 }
 0x272   :  { %8892 = vmatprep.subr.bf16.mxu0 %v9977_v3 }
 0x275   :  { %8893 = vmatpush3.bf16.msra.mxu0 %v9978_v5 }
 0x276   :  { %8894 = vmatprep.subr.bf16.mxu0 %v9979_v6 }
 0x279   :  { %8895 = vmatpush3.bf16.msra.mxu0 %v9980_v7 }
 0x27a   :  { %8896 = vmatprep.subr.bf16.mxu0 %v9981_v8 }
 0x27d   :  { %8897 = vmatpush3.bf16.msra.mxu0 %v9982_v9  ;;  %v9988_v9 = vld [vmem:[#allocation4 + $0xa0] sm:$0xff]  }
 0x27e   :  { %8898 = vmatprep.subr.bf16.mxu0 %v9983_v11  ;;  %v9989_v11 = vld [vmem:[#allocation4 + $0x98] sm:$0xff]  }
 0x281   :  { %8899 = vmatpush3.bf16.msra.mxu0 %v9984_v12  ;;  %v9990_v12 = vld [vmem:[#allocation4 + $0x90] sm:$0xff]  }
 0x324   :  { %v9448_v32 = vpop.f32.mrf.mxu0 }
 0x325   :  { %v838_v38 = vadd.f32 %v9448_v32, %v8195_v34 }
 0x326   :  { %v829_v35 = vpop.f32.mrf.mxu0 }
 0x327   :  { %v830_v37 = vadd.f32 %v8195_v34, %v829_v35  ;;  %v11171_v57 = vadd.f32 %v838_v38, %v494_v44 }
 0x328   :  { %v9449_v39 = vpop.f32.mrf.mxu0 }
 0x329   :  { %v841_v43 = vadd.f32 %v9449_v39, %v8195_v34  ;;  %v11167_v50 = vadd.f32 %v830_v37, %v484_v40  ;;  %v850_v10 = vmax.f32 %v11171_v57, 0.0 }
 0x32a   :  { %v832_v48 = vpop.f32.mrf.mxu0 }
 0x32b   :  { %v11169_v58 = vadd.f32 %v841_v43, %v498_v41  ;;  %v833_v59 = vadd.f32 %v8195_v34, %v832_v48  ;;  %v848_v61 = vmax.f32 %v11167_v50, 0.0 }
 0x32d   :  { %v11173_v60 = vadd.f32 %v833_v59, %v488_v49  ;;  %v851_v62 = vmax.f32 %v11169_v58, 0.0 }
 0x32f   :  { %v849_v63 = vmax.f32 %v11173_v60, 0.0  ;;  %v870_v1 = vpack.c.bf16 %v851_v62, %v850_v10  ;;  %v10008_v60 = vld [vmem:[#allocation2 + $0x120] sm:$0xff]  }
 0x331   :  { %v869_v4 = vpack.c.bf16 %v849_v63, %v848_v61 }
 0x333   :  { %9466 = vmatprep.mubr.bf16.mxu1 %v869_v4 }
 0x334   :  { %9467 = vmatmul.mubr.bf16.vlgmr.msra.gmra.mxu1 %v870_v1 }
 0x335   :  { %9471 = vmatpush3.bf16.msra.mxu1 %v9985_v13  ;;  %v9991_v13 = vld [vmem:[#allocation4 + $0x88] sm:$0xff]  }
 0x336   :  { %9472 = vmatprep.subr.bf16.mxu1 %v9986_v14 }
 0x339   :  { %9473 = vmatpush3.bf16.msra.mxu1 %v9986_v14  ;;  %v9992_v14 = vld [vmem:[#allocation4 + $0x80] sm:$0xff]  }
 0x33a   :  { %9474 = vmatprep.subr.bf16.mxu1 %v9987_v15 }
 0x33d   :  { %9475 = vmatpush3.bf16.msra.mxu1 %v9987_v15  ;;  %v9993_v15 = vld [vmem:[#allocation4 + $0xf8] sm:$0xff]  }
 0x33e   :  { %9476 = vmatprep.subr.bf16.mxu1 %v9988_v9  ;;  %9490 = vmatprep.subr.bf16.mxu0 %v9993_v15 }
 0x341   :  { %9477 = vmatpush3.bf16.msra.mxu1 %v9988_v9 }
 0x342   :  { %9478 = vmatprep.subr.bf16.mxu1 %v9989_v11 }
 0x345   :  { %9479 = vmatpush3.bf16.msra.mxu1 %v9989_v11  ;;  %v8230_v11 = vld [vmem:[#allocation9 + $0x2] ss:$0 sm:$0xff] }
 0x346   :  { %9480 = vmatprep.subr.bf16.mxu1 %v9990_v12 }
 0x349   :  { %9481 = vmatpush3.bf16.msra.mxu1 %v9990_v12 }
 0x34a   :  { %9482 = vmatprep.subr.bf16.mxu1 %v9991_v13 }
 0x34d   :  { %9483 = vmatpush3.bf16.msra.mxu1 %v9991_v13 }
 0x34e   :  { %9484 = vmatprep.subr.bf16.mxu1 %v9992_v14 }
 0x351   :  { %9485 = vmatpush3.bf16.msra.mxu1 %v9992_v14 }
 0x3f4   :  { %v9468_v16 = vpop.f32.mrf.mxu1 }
 0x3f5   :  { %v970_v19 = vadd.f32 %v9468_v16, %v8204_v17  ;;  %v9994_v16 = vld [vmem:[#allocation4 + $0xf0] sm:$0xff]  }
 0x3f6   :  { %v961_v18 = vpop.f32.mrf.mxu1 }
 0x3f7   :  { %v962_v20 = vadd.f32 %v8204_v17, %v961_v18  ;;  %v978_v25 = vmax.f32 %v970_v19, 0.0  ;;  %v9996_v18 = vld [vmem:[#allocation4 + $0xe0] sm:$0xff]  }
 0x3f8   :  { %v9469_v21 = vpop.f32.mrf.mxu1 }
 0x3f9   :  { %v976_v22 = vmax.f32 %v962_v20, 0.0  ;;  %v973_v23 = vadd.f32 %v9469_v21, %v8204_v17  ;;  %v1029_v34 = vrot.slane %v978_v25, 1  ;;  %v1017_v59 = vrot.slane %v978_v25, 7 }
 0x3fa   :  { %v964_v24 = vpop.f32.mrf.mxu1 }
 0x3fb   :  { %v979_v26 = vmax.f32 %v973_v23, 0.0  ;;  %v965_v27 = vadd.f32 %v8204_v17, %v964_v24  ;;  %v1015_v28 = vrot.slane %v976_v22, 7  ;;  %v1027_v33 = vrot.slane %v976_v22, 1  ;;  %v9995_v17 = vld [vmem:[#allocation4 + $0xe8] sm:$0xff]   ;;  %v8213_v22 = vld [vmem:[#allocation7 + $0x1] ss:$0 sm:$0xff] }
 0x3fd   :  { %v1018_v29 = vrot.slane %v979_v26, 7  ;;  %v1030_v31 = vrot.slane %v979_v26, 1  ;;  %v977_v32 = vmax.f32 %v965_v27, 0.0 }
 0x3ff   :  { %v1022_v35 = vsel %vm541_vm5, %v1018_v29, %v1015_v28  ;;  %v1016_v37 = vrot.slane %v977_v32, 7  ;;  %v1028_v38 = vrot.slane %v977_v32, 1  ;;  %v1034_v39 = vsel %vm554_vm4, %v1030_v31, %v1027_v33 }
 0x400   :  { %v1023_v40 = vmul.f32 %v11122_v55, %v1022_v35  ;;  %v1038_v48 = vmul.f32 %v11125_v56, %v1034_v39  ;;  %v1031_v2 = vsel %vm554_vm4, %v1029_v34, %v1030_v31  ;;  %v1019_v7 = vsel %vm541_vm5, %v1017_v59, %v1018_v29 }
 0x401   :  { %v1032_v41 = vsel %vm554_vm4, %v1028_v38, %v1029_v34  ;;  %v1021_v44 = vsel %vm541_vm5, %v1015_v28, %v1016_v37  ;;  %v1033_v49 = vsel %vm554_vm4, %v1027_v33, %v1028_v38  ;;  %v1020_v5 = vsel %vm541_vm5, %v1016_v37, %v1017_v59  ;;  %v9999_v59 = vld [vmem:[#allocation4 + $0xc8] sm:$0xff]  }
 0x402   :  { %v1036_v43 = vmul.f32 %v11116_v53, %v1032_v41  ;;  %v1039_v1 = vpack.c.bf16 %v1021_v44, %v1023_v40  ;;  %v1042_v3 = vpack.c.bf16 %v1038_v48, %v1031_v2  ;;  %v1025_v6 = vmul.f32 %v11119_v54, %v1020_v5  ;;  %v9997_v48 = vld [vmem:[#allocation4 + $0xd8] sm:$0xff]   ;;  %v10004_v5 = vld [vmem:[#allocation2 + $0x130] sm:$0xff]  }
 0x403   :  { %v10002_v2 = vld [vmem:[#allocation2 + $0x138] sm:$0xff]  }
 0x404   :  { %v1040_v4 = vpack.c.bf16 %v1036_v43, %v1033_v49  ;;  %v1041_v8 = vpack.c.bf16 %v1019_v7, %v1025_v6  ;;  %v9998_v49 = vld [vmem:[#allocation4 + $0xd0] sm:$0xff]   ;;  %v10005_v6 = vld [vmem:[#allocation2 + $0x168] sm:$0xff]  }
 0x405   :  { %v10006_v7 = vld [vmem:[#allocation2 + $0x128] sm:$0xff]  }
 0x406   :  { %1177 = vmatprep.mubr.bf16.mxu0 %v1040_v4  ;;  %v10000_v4 = vld [vmem:[#allocation4 + $0xc0] sm:$0xff]  }
 0x407   :  { %1178 = vmatmul.mubr.bf16.vlgmr.msra.gmra.mxu0 %v1039_v1  ;;  %v10001_v1 = vld [vmem:[#allocation2 + $0x178] sm:$0xff]  }
 0x408   :  { %1185 = vmatprep.mubr.bf16.mxu0 %v1042_v3  ;;  %9491 = vmatpush3.bf16.msra.mxu0 %v9993_v15  ;;  %v10003_v3 = vld [vmem:[#allocation2 + $0x170] sm:$0xff]  }
 0x409   :  { %9492 = vmatprep.subr.bf16.mxu0 %v9994_v16  ;;  %8932 = vmatprep.subr.bf16.mxu1 %v10001_v1 }
 0x40c   :  { %9493 = vmatpush3.bf16.msra.mxu0 %v9994_v16 }
 0x40d   :  { %9494 = vmatprep.subr.bf16.mxu0 %v9995_v17 }
 0x40f   :  { %1186 = vmatmul.mubr.bf16.gmra.mxu0 %v1041_v8  ;;  %v10007_v8 = vld [vmem:[#allocation2 + $0x160] sm:$0xff]  }
 0x410   :  { %9495 = vmatpush3.bf16.msra.mxu0 %v9995_v17 }
 0x411   :  { %9496 = vmatprep.subr.bf16.mxu0 %v9996_v18 }
 0x414   :  { %9497 = vmatpush3.bf16.msra.mxu0 %v9996_v18 }
 0x415   :  { %9498 = vmatprep.subr.bf16.mxu0 %v9997_v48 }
 0x418   :  { %9499 = vmatpush3.bf16.msra.mxu0 %v9997_v48 }
 0x419   :  { %9500 = vmatprep.subr.bf16.mxu0 %v9998_v49 }
 0x41c   :  { %9501 = vmatpush3.bf16.msra.mxu0 %v9998_v49 }
 0x41d   :  { %9502 = vmatprep.subr.bf16.mxu0 %v9999_v59 }
 0x420   :  { %9503 = vmatpush3.bf16.msra.mxu0 %v9999_v59 }
 0x421   :  { %9504 = vmatprep.subr.bf16.mxu0 %v10000_v4 }
 0x424   :  { %9505 = vmatpush3.bf16.msra.mxu0 %v10000_v4 }
 0x4c7   :  { %v8900_v19 = vpop.f32.mrf.mxu0 }
 0x4c9   :  { %v8901_v20 = vpop.f32.mrf.mxu0 }
 0x4ca   :  { %v8902_v21 = vadd.f32 %v8901_v20, %v8900_v19 }
 0x4cb   :  { %v8903_v23 = vpop.f32.mrf.mxu0 }
 0x4cc   :  { %v1180_v25 = vadd.f32 %v8902_v21, %v8213_v22 }
 0x4cd   :  { %v8904_v24 = vpop.f32.mrf.mxu0 }
 0x4ce   :  { %v8905_v26 = vadd.f32 %v8904_v24, %v8903_v23  ;;  %v1194_v31 = vmax.f32 %v1180_v25, 0.0  ;;  %v10012_v25 = vld [vmem:[#allocation2 + $0x110] sm:$0xff]  }
 0x4cf   :  { %v8906_v27 = vpop.f32.mrf.mxu0 }
 0x4d0   :  { %v1183_v28 = vadd.f32 %v8905_v26, %v8213_v22  ;;  %v10013_v26 = vld [vmem:[#allocation2 + $0x148] sm:$0xff]  }
 0x4d1   :  { %v8907_v29 = vpop.f32.mrf.mxu0 }
 0x4d2   :  { %v1195_v32 = vmax.f32 %v1183_v28, 0.0  ;;  %v8908_v33 = vadd.f32 %v8907_v29, %v8906_v27  ;;  %v10014_v27 = vld [vmem:[#allocation2 + $0x108] sm:$0xff]   ;;  %v10015_v28 = vld [vmem:[#allocation2 + $0x140] sm:$0xff]  }
 0x4d3   :  { %v8909_v34 = vpop.f32.mrf.mxu0  ;;  %v10016_v29 = vld [vmem:[#allocation2 + $0x100] sm:$0xff]  }
 0x4d4   :  { %v1215_v35 = vpack.c.bf16 %v1195_v32, %v1194_v31  ;;  %v1188_v38 = vadd.f32 %v8908_v33, %v8213_v22  ;;  %v10017_v31 = vld [vmem:[#allocation4 + $0x138] sm:$0xff]   ;;  %v10018_v32 = vld [vmem:[#allocation4 + $0x130] sm:$0xff]   ;;  %v10019_v33 = vld [vmem:[#allocation4 + $0x128] sm:$0xff]  }
 0x4d5   :  { %v8910_v37 = vpop.f32.mrf.mxu0  ;;  %9510 = vmatprep.subr.bf16.mxu0 %v10017_v31 }
 0x4d6   :  { %v8911_v39 = vadd.f32 %v8910_v37, %v8909_v34  ;;  %9486 = vmatprep.mubr.bf16.mxu1 %v1215_v35  ;;  %v1196_v41 = vmax.f32 %v1188_v38, 0.0  ;;  %v8239_v35 = vld [vmem:[#allocation9 + $0x3] ss:$0 sm:$0xff] }
 0x4d8   :  { %v1191_v40 = vadd.f32 %v8911_v39, %v8213_v22 }
 0x4da   :  { %v1197_v43 = vmax.f32 %v1191_v40, 0.0 }
 0x4dc   :  { %v1216_v44 = vpack.c.bf16 %v1197_v43, %v1196_v41 }
 0x4de   :  { %9487 = vmatmul.mubr.bf16.vlgmr.msra.gmra.mxu1 %v1216_v44 }
 0x4df   :  { %8933 = vmatpush3.bf16.msra.mxu1 %v10002_v2 }
 0x4e0   :  { %8934 = vmatprep.subr.bf16.mxu1 %v10003_v3 }
 0x4e3   :  { %8935 = vmatpush3.bf16.msra.mxu1 %v10004_v5 }
 0x4e4   :  { %8936 = vmatprep.subr.bf16.mxu1 %v10005_v6 }
 0x4e7   :  { %8937 = vmatpush3.bf16.msra.mxu1 %v10006_v7 }
 0x4e8   :  { %8938 = vmatprep.subr.bf16.mxu1 %v10007_v8 }
 0x4eb   :  { %8939 = vmatpush3.bf16.msra.mxu1 %v10008_v60 }
 0x59e   :  { %v9488_v9 = vpop.f32.mrf.mxu1 }
 0x59f   :  { %v1316_v14 = vadd.f32 %v9488_v9, %v8230_v11 }
 0x5a0   :  { %v1307_v12 = vpop.f32.mrf.mxu1 }
 0x5a1   :  { %v1308_v13 = vadd.f32 %v8230_v11, %v1307_v12  ;;  %v11217_v21 = vadd.f32 %v1316_v14, %v850_v10  ;;  %v10011_v10 = vld [vmem:[#allocation2 + $0x150] sm:$0xff]  }
 0x5a2   :  { %v9489_v15 = vpop.f32.mrf.mxu1 }
 0x5a3   :  { %v1319_v16 = vadd.f32 %v9489_v15, %v8230_v11  ;;  %v11209_v18 = vadd.f32 %v1308_v13, %v848_v61  ;;  %v1328_v61 = vmax.f32 %v11217_v21, 0.0  ;;  %v10059_v21 = vld [vmem:[#allocation2 + $0x1d0] sm:$0xff]  }
 0x5a4   :  { %v1310_v17 = vpop.f32.mrf.mxu1 }
 0x5a5   :  { %v11213_v19 = vadd.f32 %v1319_v16, %v851_v62  ;;  %v1311_v20 = vadd.f32 %v8230_v11, %v1310_v17  ;;  %v1326_v24 = vmax.f32 %v11209_v18, 0.0  ;;  %v10009_v62 = vld [vmem:[#allocation2 + $0x158] sm:$0xff]  }
 0x5a6   :  { %8940 = vmatprep.subr.bf16.mxu1 %v10009_v62 }
 0x5a7   :  { %v11221_v22 = vadd.f32 %v1311_v20, %v849_v63  ;;  %v1329_v23 = vmax.f32 %v11213_v19, 0.0  ;;  %v10010_v63 = vld [vmem:[#allocation2 + $0x118] sm:$0xff]  }
 0x5a8   :  { %8941 = vmatpush3.bf16.msra.mxu1 %v10010_v63  ;;  %v10057_v19 = vld [vmem:[#allocation2 + $0x1d8] sm:$0xff]  }
 0x5a9   :  { %v1327_v50 = vmax.f32 %v11221_v22, 0.0  ;;  %v1348_v57 = vpack.c.bf16 %v1329_v23, %v1328_v61  ;;  %8942 = vmatprep.subr.bf16.mxu1 %v10011_v10  ;;  %v10054_v22 = vld [vmem:[#allocation2 + $0x1a8] sm:$0xff]  }
 0x5ab   :  { %v1347_v58 = vpack.c.bf16 %v1327_v50, %v1326_v24 }
 0x5ac   :  { %8943 = vmatpush3.bf16.msra.mxu1 %v10012_v25 }
 0x5ad   :  { %9506 = vmatprep.mubr.bf16.mxu0 %v1347_v58  ;;  %8944 = vmatprep.subr.bf16.mxu1 %v10013_v26 }
 0x5ae   :  { %9507 = vmatmul.mubr.bf16.vlgmr.msra.gmra.mxu0 %v1348_v57 }
 0x5af   :  { %9511 = vmatpush3.bf16.msra.mxu0 %v10017_v31  ;;  %v10023_v31 = vld [vmem:[#allocation4 + $0x108] sm:$0xff]  }
 0x5b0   :  { %8945 = vmatpush3.bf16.msra.mxu1 %v10014_v27  ;;  %9512 = vmatprep.subr.bf16.mxu0 %v10018_v32  ;;  %v10020_v27 = vld [vmem:[#allocation4 + $0x120] sm:$0xff]  }
 0x5b1   :  { %8946 = vmatprep.subr.bf16.mxu1 %v10015_v28  ;;  %v10021_v28 = vld [vmem:[#allocation4 + $0x118] sm:$0xff]  }
 0x5b3   :  { %9513 = vmatpush3.bf16.msra.mxu0 %v10018_v32  ;;  %v10024_v32 = vld [vmem:[#allocation4 + $0x100] sm:$0xff]  }
 0x5b4   :  { %8947 = vmatpush3.bf16.msra.mxu1 %v10016_v29  ;;  %9514 = vmatprep.subr.bf16.mxu0 %v10019_v33  ;;  %v10022_v29 = vld [vmem:[#allocation4 + $0x110] sm:$0xff]  }
 0x5b7   :  { %9515 = vmatpush3.bf16.msra.mxu0 %v10019_v33  ;;  %v10025_v33 = vld [vmem:[%s11898_s1 + $0xf0] ss:$8 sps:$4 sm:$0xff]  }
 0x5b8   :  { %9516 = vmatprep.subr.bf16.mxu0 %v10020_v27 }
 0x5bb   :  { %9517 = vmatpush3.bf16.msra.mxu0 %v10020_v27  ;;  %v10046_v27 = vld [vmem:[%s11898_s1 + $0x80] ss:$8 sps:$4 sm:$0xff]  }
 0x5bc   :  { %9518 = vmatprep.subr.bf16.mxu0 %v10021_v28 }
 0x5bf   :  { %9519 = vmatpush3.bf16.msra.mxu0 %v10021_v28  ;;  %v10049_v28 = vld [vmem:[#allocation2 + $0x1f8] sm:$0xff]  }
 0x5c0   :  { %9520 = vmatprep.subr.bf16.mxu0 %v10022_v29 }
 0x5c3   :  { %9521 = vmatpush3.bf16.msra.mxu0 %v10022_v29  ;;  %v10050_v29 = vld [vmem:[#allocation2 + $0x1b8] sm:$0xff]  }
 0x5c4   :  { %9522 = vmatprep.subr.bf16.mxu0 %v10023_v31 }
 0x5c7   :  { %9523 = vmatpush3.bf16.msra.mxu0 %v10023_v31  ;;  %v10051_v31 = vld [vmem:[#allocation2 + $0x1f0] sm:$0xff]  }
 0x5c8   :  { %9524 = vmatprep.subr.bf16.mxu0 %v10024_v32 }
 0x5cb   :  { %9525 = vmatpush3.bf16.msra.mxu0 %v10024_v32  ;;  %v10052_v32 = vld [vmem:[#allocation2 + $0x1b0] sm:$0xff]  }
 0x5cc   :  { %8970 = vmatprep.subr.bf16.mxu0 %v10049_v28 }
 0x66e   :  { %v9508_v34 = vpop.f32.mrf.mxu0 }
 0x66f   :  { %v1448_v38 = vadd.f32 %v9508_v34, %v8239_v35  ;;  %v10027_v34 = vld [vmem:[%s11898_s1 + $0xf4] ss:$8 sps:$4 sm:$0xff]  }
 0x670   :  { %v1439_v37 = vpop.f32.mrf.mxu0  ;;  %1920 = vmatprep.subr.bf16.mxu1 %v10027_v34  ;;  %v8265_v34 = vld [vmem:[#allocation9 + $0x4] ss:$0 sm:$0xff] }
 0x671   :  { %v1440_v39 = vadd.f32 %v8239_v35, %v1439_v37  ;;  %v1456_v48 = vmax.f32 %v1448_v38, 0.0  ;;  %v10028_v37 = vld [vmem:[%s11898_s1 + $0xe0] ss:$8 sps:$4 sm:$0xff]   ;;  %v10033_v38 = vld [vmem:[%s11898_s1 + $0xd4] ss:$8 sps:$4 sm:$0xff]  }
 0x672   :  { %v9509_v40 = vpop.f32.mrf.mxu0 }
 0x673   :  { %v1454_v41 = vmax.f32 %v1440_v39, 0.0  ;;  %v1451_v43 = vadd.f32 %v9509_v40, %v8239_v35  ;;  %v1507_v6 = vrot.slane %v1456_v48, 1  ;;  %v1495_v20 = vrot.slane %v1456_v48, 7  ;;  %v10031_v39 = vld [vmem:[%s11898_s1 + $0xd0] ss:$8 sps:$4 sm:$0xff]  }
 0x674   :  { %v1442_v44 = vpop.f32.mrf.mxu0  ;;  %v10036_v40 = vld [vmem:[%s11898_s1 + $0xc4] ss:$8 sps:$4 sm:$0xff]  }
 0x675   :  { %v1457_v49 = vmax.f32 %v1451_v43, 0.0  ;;  %v1443_v59 = vadd.f32 %v8239_v35, %v1442_v44  ;;  %v1493_v4 = vrot.slane %v1454_v41, 7  ;;  %v1505_v5 = vrot.slane %v1454_v41, 1  ;;  %v10030_v35 = vld [vmem:[%s11898_s1 + $0xe4] ss:$8 sps:$4 sm:$0xff]  }
 0x676   :  { %v10034_v41 = vld [vmem:[%s11898_s1 + $0xc0] ss:$8 sps:$4 sm:$0xff]   ;;  %v10039_v43 = vld [vmem:[%s11898_s1 + $0xb4] ss:$8 sps:$4 sm:$0xff]   ;;  %v10037_v44 = vld [vmem:[%s11898_s1 + $0xb0] ss:$8 sps:$4 sm:$0xff]  }
 0x677   :  { %v1496_v1 = vrot.slane %v1457_v49, 7  ;;  %v1508_v2 = vrot.slane %v1457_v49, 1  ;;  %v1455_v3 = vmax.f32 %v1443_v59, 0.0 }
 0x679   :  { %v1500_v7 = vsel %vm541_vm5, %v1496_v1, %v1493_v4  ;;  %v1494_v8 = vrot.slane %v1455_v3, 7  ;;  %v1506_v9 = vrot.slane %v1455_v3, 1  ;;  %v1512_v11 = vsel %vm554_vm4, %v1508_v2, %v1505_v5 }
 0x67a   :  { %v1501_v12 = vmul.f32 %v11122_v55, %v1500_v7  ;;  %v1516_v16 = vmul.f32 %v11125_v56, %v1512_v11  ;;  %v1509_v60 = vsel %vm554_vm4, %v1507_v6, %v1508_v2  ;;  %v1497_v25 = vsel %vm541_vm5, %v1495_v20, %v1496_v1 }
 0x67b   :  { %v1510_v13 = vsel %vm554_vm4, %v1506_v9, %v1507_v6  ;;  %v1499_v14 = vsel %vm541_vm5, %v1493_v4, %v1494_v8  ;;  %v1511_v17 = vsel %vm554_vm4, %v1505_v5, %v1506_v9  ;;  %v1498_v63 = vsel %vm541_vm5, %v1494_v8, %v1495_v20  ;;  %v8248_v4 = vld [vmem:[#allocation7 + $0x2] ss:$0 sm:$0xff] }
 0x67c   :  { %v1514_v15 = vmul.f32 %v11116_v53, %v1510_v13  ;;  %v1517_v57 = vpack.c.bf16 %v1499_v14, %v1501_v12  ;;  %v1520_v62 = vpack.c.bf16 %v1516_v16, %v1509_v60  ;;  %v1503_v10 = vmul.f32 %v11119_v54, %v1498_v63  ;;  %v10040_v63 = vld [vmem:[%s11898_s1 + $0xa0] ss:$8 sps:$4 sm:$0xff]  }
 0x67e   :  { %v1518_v58 = vpack.c.bf16 %v1514_v15, %v1511_v17  ;;  %v1519_v26 = vpack.c.bf16 %v1497_v25, %v1503_v10  ;;  %v10045_v10 = vld [vmem:[%s11898_s1 + $0x94] ss:$8 sps:$4 sm:$0xff]   ;;  %v10043_v25 = vld [vmem:[%s11898_s1 + $0x90] ss:$8 sps:$4 sm:$0xff]  }
 0x680   :  { %1655 = vmatprep.mubr.bf16.mxu1 %v1518_v58 }
 0x681   :  { %1656 = vmatmul.mubr.bf16.vlgmr.msra.gmra.mxu1 %v1517_v57 }
 0x682   :  { %1663 = vmatprep.mubr.bf16.mxu1 %v1520_v62  ;;  %1921 = vmatpush1.bf16.msra.mxu1 %v10025_v33  ;;  %v10042_v62 = vld [vmem:[%s11898_s1 + $0xa4] ss:$8 sps:$4 sm:$0xff]  }
 0x683   :  { %1922 = vmatprep.subr.bf16.mxu1 %v10030_v35 }
 0x686   :  { %1923 = vmatpush1.bf16.msra.mxu1 %v10028_v37 }
 0x687   :  { %1924 = vmatprep.subr.bf16.mxu1 %v10033_v38 }
 0x689   :  { %1664 = vmatmul.mubr.bf16.gmra.mxu1 %v1519_v26  ;;  %v10048_v26 = vld [vmem:[%s11898_s1 + $0x84] ss:$8 sps:$4 sm:$0xff]  }
 0x68a   :  { %1952 = vmatprep.mubr.bf16.mxu1 %v10892_v0  ;;  %1925 = vmatpush1.bf16.msra.mxu1 %v10031_v39 }
 0x68b   :  { %1926 = vmatprep.subr.bf16.mxu1 %v10036_v40 }
 0x68e   :  { %1927 = vmatpush1.bf16.msra.mxu1 %v10034_v41 }
 0x68f   :  { %1928 = vmatprep.subr.bf16.mxu1 %v10039_v43 }
 0x692   :  { %1929 = vmatpush1.bf16.msra.mxu1 %v10037_v44 }
 0x693   :  { %1930 = vmatprep.subr.bf16.mxu1 %v10042_v62 }
 0x696   :  { %1931 = vmatpush1.bf16.msra.mxu1 %v10040_v63 }
 0x697   :  { %1932 = vmatprep.subr.bf16.mxu1 %v10045_v10 }
 0x69a   :  { %1933 = vmatpush1.bf16.msra.mxu1 %v10043_v25 }
 0x69b   :  { %1934 = vmatprep.subr.bf16.mxu1 %v10048_v26 }
 0x69e   :  { %1935 = vmatpush1.bf16.msra.mxu1 %v10046_v27 }
 0x741   :  { %v8948_v48 = vpop.f32.mrf.mxu1 }
 0x743   :  { %v8949_v49 = vpop.f32.mrf.mxu1 }
 0x744   :  { %v8950_v59 = vadd.f32 %v8949_v49, %v8948_v48 }
 0x745   :  { %v8951_v1 = vpop.f32.mrf.mxu1 }
 0x746   :  { %v1658_v3 = vadd.f32 %v8950_v59, %v8248_v4 }
 0x747   :  { %v8952_v2 = vpop.f32.mrf.mxu1 }
 0x748   :  { %v8953_v5 = vadd.f32 %v8952_v2, %v8951_v1  ;;  %v1672_v9 = vmax.f32 %v1658_v3, 0.0 }
 0x749   :  { %v8954_v6 = vpop.f32.mrf.mxu1 }
 0x74a   :  { %v1661_v7 = vadd.f32 %v8953_v5, %v8248_v4  ;;  %v10053_v5 = vld [vmem:[#allocation2 + $0x1e8] sm:$0xff]  }
 0x74b   :  { %v8955_v8 = vpop.f32.mrf.mxu1 }
 0x74c   :  { %v1673_v11 = vmax.f32 %v1661_v7, 0.0  ;;  %v8956_v12 = vadd.f32 %v8955_v8, %v8954_v6  ;;  %v10056_v6 = vld [vmem:[#allocation2 + $0x1a0] sm:$0xff]   ;;  %v10061_v7 = vld [vmem:[#allocation2 + $0x1c8] sm:$0xff]  }
 0x74d   :  { %v8957_v13 = vpop.f32.mrf.mxu1  ;;  %v10062_v8 = vld [vmem:[#allocation2 + $0x188] sm:$0xff]  }
 0x74e   :  { %v1693_v14 = vpack.c.bf16 %v1673_v11, %v1672_v9  ;;  %v1666_v16 = vadd.f32 %v8956_v12, %v8248_v4  ;;  %v10063_v9 = vld [vmem:[#allocation2 + $0x1c0] sm:$0xff]   ;;  %v10065_v12 = vld [vmem:[#allocation4 + $0x178] sm:$0xff]  }
 0x74f   :  { %v8958_v15 = vpop.f32.mrf.mxu1  ;;  %v10064_v11 = vld [vmem:[#allocation2 + $0x180] sm:$0xff]   ;;  %9530 = vmatprep.subr.bf16.mxu1 %v10065_v12 }
 0x750   :  { %v8959_v17 = vadd.f32 %v8958_v15, %v8957_v13  ;;  %9526 = vmatprep.mubr.bf16.mxu0 %v1693_v14  ;;  %v1674_v58 = vmax.f32 %v1666_v16, 0.0  ;;  %v10066_v13 = vld [vmem:[#allocation4 + $0x170] sm:$0xff]   ;;  %v10067_v14 = vld [vmem:[#allocation4 + $0x168] sm:$0xff]   ;;  %v11313_v15 = vld [vmem:[#allocation6 + $0x2] sm:$0x3] }
 0x752   :  { %v1669_v20 = vadd.f32 %v8959_v17, %v8248_v4 }
 0x754   :  { %v1675_v57 = vmax.f32 %v1669_v20, 0.0  ;;  %v1833_v20 = vrot.slane %v11313_v15, %v11113_v51 }
 0x756   :  { %v1694_v60 = vpack.c.bf16 %v1675_v57, %v1674_v58 }
 0x758   :  { %9527 = vmatmul.mubr.bf16.vlgmr.msra.gmra.mxu0 %v1694_v60 }
 0x759   :  { %8971 = vmatpush3.bf16.msra.mxu0 %v10050_v29 }
 0x75a   :  { %8972 = vmatprep.subr.bf16.mxu0 %v10051_v31 }
 0x75d   :  { %8973 = vmatpush3.bf16.msra.mxu0 %v10052_v32 }
 0x75e   :  { %8974 = vmatprep.subr.bf16.mxu0 %v10053_v5 }
 0x761   :  { %8975 = vmatpush3.bf16.msra.mxu0 %v10054_v22 }
 0x818   :  { %v9528_v33 = vpop.f32.mrf.mxu0 }
 0x819   :  { %v1794_v48 = vadd.f32 %v9528_v33, %v8265_v34 }
 0x81a   :  { %v1785_v35 = vpop.f32.mrf.mxu0 }
 0x81b   :  { %v1786_v37 = vadd.f32 %v8265_v34, %v1785_v35  ;;  %v1802_v2 = vadd.f32 %v1794_v48, %v1328_v61  ;;  %v10060_v61 = vld [vmem:[#allocation2 + $0x190] sm:$0xff]  }
 0x81c   :  { %v9529_v38 = vpop.f32.mrf.mxu0 }
 0x81d   :  { %v1800_v40 = vadd.f32 %v1786_v37, %v1326_v24  ;;  %v1797_v43 = vadd.f32 %v9529_v38, %v8265_v34  ;;  %v1806_v24 = vmax.f32 %v1802_v2, 0.0 }
 0x81e   :  { %v1788_v39 = vpop.f32.mrf.mxu0 }
 0x81f   :  { %v1789_v41 = vadd.f32 %v8265_v34, %v1788_v39  ;;  %v1804_v49 = vmax.f32 %v1800_v40, 0.0  ;;  %v1803_v4 = vadd.f32 %v1797_v43, %v1329_v23  ;;  %v10058_v23 = vld [vmem:[#allocation2 + $0x198] sm:$0xff]  }
 0x821   :  { %v1801_v44 = vadd.f32 %v1789_v41, %v1327_v50  ;;  %v1807_v18 = vmax.f32 %v1803_v4, 0.0  ;;  %v10055_v50 = vld [vmem:[#allocation2 + $0x1e0] sm:$0xff]  }
 0x822   :  { %8976 = vmatprep.subr.bf16.mxu0 %v10055_v50  ;;  %v10068_v50 = vld [vmem:[#allocation4 + $0x160] sm:$0xff]  }
 0x823   :  { %v1805_v59 = vmax.f32 %v1801_v44, 0.0  ;;  %v1826_v3 = vpack.c.bf16 %v1807_v18, %v1806_v24  ;;  %8977 = vmatpush3.bf16.msra.mxu0 %v10056_v6  ;;  %v10069_v6 = vld [vmem:[#allocation4 + $0x158] sm:$0xff]  }
 0x824   :  { %8978 = vmatprep.subr.bf16.mxu0 %v10057_v19  ;;  %v10070_v19 = vld [vmem:[#allocation4 + $0x150] sm:$0xff]  }
 0x825   :  { %v1825_v1 = vpack.c.bf16 %v1805_v59, %v1804_v49 }
 0x827   :  { %1953 = vmatmul.mubr.bf16.vlgmr.msra.gmra.mxu1 %v1825_v1  ;;  %8979 = vmatpush3.bf16.msra.mxu0 %v10058_v23  ;;  %v10071_v23 = vld [vmem:[#allocation4 + $0x148] sm:$0xff]  }
 0x828   :  { %1962 = vmatprep.mubr.bf16.mxu1 %v10892_v0  ;;  %8980 = vmatprep.subr.bf16.mxu0 %v10059_v21  ;;  %v10072_v21 = vld [vmem:[#allocation4 + $0x140] sm:$0xff]  }
 0x829   :  { %9531 = vmatpush3.bf16.msra.mxu1 %v10065_v12 }
 0x82a   :  { %9532 = vmatprep.subr.bf16.mxu1 %v10066_v13 }
 0x82b   :  { %8981 = vmatpush3.bf16.msra.mxu0 %v10060_v61  ;;  %v10073_v61 = vld [vmem:[#allocation4 + $0x1b8] sm:$0xff]  }
 0x82c   :  { %8982 = vmatprep.subr.bf16.mxu0 %v10061_v7  ;;  %v10074_v7 = vld [vmem:[#allocation4 + $0x1b0] sm:$0xff]  }
 0x82d   :  { %9533 = vmatpush3.bf16.msra.mxu1 %v10066_v13  ;;  %v8306_v13 = vld [vmem:[#allocation7 + $0x3] ss:$0 sm:$0xff] }
 0x82e   :  { %9534 = vmatprep.subr.bf16.mxu1 %v10067_v14 }
 0x82f   :  { %1963 = vmatmul.mubr.bf16.gmra.mxu1 %v1826_v3  ;;  %8983 = vmatpush3.bf16.msra.mxu0 %v10062_v8  ;;  %v10076_v8 = vld [vmem:[#allocation4 + $0x1a0] sm:$0xff]  }
 0x830   :  { %8984 = vmatprep.subr.bf16.mxu0 %v10063_v9 }
 0x831   :  { %9535 = vmatpush3.bf16.msra.mxu1 %v10067_v14 }
 0x832   :  { %9536 = vmatprep.subr.bf16.mxu1 %v10068_v50 }
 0x833   :  { %8985 = vmatpush3.bf16.msra.mxu0 %v10064_v11 }
 0x834   :  { %9550 = vmatprep.subr.bf16.mxu0 %v10073_v61 }
 0x835   :  { %9537 = vmatpush3.bf16.msra.mxu1 %v10068_v50 }
 0x836   :  { %9538 = vmatprep.subr.bf16.mxu1 %v10069_v6 }
 0x839   :  { %9539 = vmatpush3.bf16.msra.mxu1 %v10069_v6 }
 0x83a   :  { %9540 = vmatprep.subr.bf16.mxu1 %v10070_v19 }
 0x83d   :  { %9541 = vmatpush3.bf16.msra.mxu1 %v10070_v19 }
 0x83e   :  { %9542 = vmatprep.subr.bf16.mxu1 %v10071_v23 }
 0x841   :  { %9543 = vmatpush3.bf16.msra.mxu1 %v10071_v23 }
 0x842   :  { %9544 = vmatprep.subr.bf16.mxu1 %v10072_v21 }
 0x845   :  { %9545 = vmatpush3.bf16.msra.mxu1 %v10072_v21 }
 0x8e7   :  { %v1954_v16 = vpop.f32.mrf.mxu1 }
 0x8e8   :  { %v1955_v62 = vadd.f32 %v1954_v16, %v1833_v20 }
 0x8e9   :  { %v11315_v17 = vpop.f32.mrf.mxu1 }
 0x8ea   :  { %v1973_v27 = vmax.f32 %v1955_v62, 0.0 }
 0x8eb   :  { %v1958_v58 = vpop.f32.mrf.mxu1 }
 0x8ec   :  { %v1959_v57 = vadd.f32 %v1958_v58, %v1833_v20  ;;  %v2024_v34 = vrot.slane %v1973_v27, 1  ;;  %v2012_v38 = vrot.slane %v1973_v27, 7 }
 0x8ed   :  { %v11319_v60 = vpop.f32.mrf.mxu1 }
 0x8ee   :  { %v1974_v10 = vmax.f32 %v1959_v57, 0.0 }
 0x8ef   :  { %v1964_v63 = vpop.f32.mrf.mxu1 }
 0x8f0   :  { %v1965_v25 = vadd.f32 %v1964_v63, %v1833_v20  ;;  %v2025_v31 = vrot.slane %v1974_v10, 1  ;;  %v2013_v40 = vrot.slane %v1974_v10, 7 }
 0x8f1   :  { %v11321_v26 = vpop.f32.mrf.mxu1 }
 0x8f2   :  { %v1975_v28 = vmax.f32 %v1965_v25, 0.0  ;;  %v2030_v44 = vsel %vm554_vm4, %v2024_v34, %v2025_v31 }
 0x8f3   :  { %v1968_v29 = vpop.f32.mrf.mxu1 }
 0x8f4   :  { %v2026_v32 = vrot.slane %v1975_v28, 1  ;;  %v1969_v33 = vadd.f32 %v1968_v29, %v1833_v20  ;;  %v2014_v2 = vrot.slane %v1975_v28, 7 }
 0x8f6   :  { %v1976_v35 = vmax.f32 %v1969_v33, 0.0  ;;  %v2029_v37 = vsel %vm554_vm4, %v2025_v31, %v2026_v32  ;;  %v2017_v5 = vsel %vm541_vm5, %v2013_v40, %v2014_v2 }
 0x8f7   :  { %v2033_v39 = vmul.f32 %v11116_v53, %v2029_v37  ;;  %v2018_v53 = vsel %vm541_vm5, %v2012_v38, %v2013_v40  ;;  %v2022_v22 = vmul.f32 %v11119_v54, %v2017_v5  ;;  %v10075_v54 = vld [vmem:[#allocation4 + $0x1a8] sm:$0xff]   ;;  %v10078_v40 = vld [vmem:[#allocation4 + $0x190] sm:$0xff]  }
 0x8f8   :  { %v2015_v41 = vrot.slane %v1976_v35, 7  ;;  %v2027_v43 = vrot.slane %v1976_v35, 1 }
 0x8f9   :  { %v2037_v48 = vpack.c.bf16 %v2033_v39, %v2030_v44  ;;  %v10077_v39 = vld [vmem:[#allocation4 + $0x198] sm:$0xff]  }
 0x8fa   :  { %v2019_v49 = vsel %vm541_vm5, %v2015_v41, %v2012_v38  ;;  %v2031_v59 = vsel %vm554_vm4, %v2027_v43, %v2024_v34  ;;  %v2028_v18 = vsel %vm554_vm4, %v2026_v32, %v2027_v43  ;;  %v10080_v43 = vld [vmem:[#allocation4 + $0x180] sm:$0xff]   ;;  %v10081_v44 = vld [vmem:[#allocation2 + $0x278] sm:$0xff]  }
 0x8fb   :  { %v2020_v4 = vmul.f32 %v11122_v55, %v2019_v49  ;;  %2174 = vmatprep.mubr.bf16.mxu0 %v2037_v48  ;;  %v2035_v1 = vmul.f32 %v11125_v56, %v2031_v59  ;;  %v2016_v55 = vsel %vm541_vm5, %v2014_v2, %v2015_v41  ;;  %v10079_v41 = vld [vmem:[#allocation4 + $0x188] sm:$0xff]   ;;  %v10082_v48 = vld [vmem:[#allocation2 + $0x238] sm:$0xff]   ;;  %v10083_v49 = vld [vmem:[#allocation2 + $0x270] sm:$0xff]   ;;  %9018 = vmatprep.subr.bf16.mxu1 %v10081_v44  ;;  %v1970_v2 = vpop.f32.mrf.mxu1  ;;  %vm7882_vm5 = vcmask 1040384  }
 0x8fc   :  { %v2038_v56 = vpack.c.bf16 %v2016_v55, %v2022_v22  ;;  %v10084_v59 = vld [vmem:[#allocation2 + $0x230] sm:$0xff]  }
 0x8fd   :  { %v2036_v24 = vpack.c.bf16 %v2018_v53, %v2020_v4  ;;  %v2039_v3 = vpack.c.bf16 %v2035_v1, %v2028_v18  ;;  %v10085_v4 = vld [vmem:[#allocation2 + $0x268] sm:$0xff]   ;;  %v10087_v53 = vld [vmem:[#allocation2 + $0x260] sm:$0xff]  }
 0x8fe   :  { %v10086_v1 = vld [vmem:[#allocation2 + $0x228] sm:$0xff]  }
 0x8ff   :  { %2175 = vmatmul.mubr.bf16.vlgmr.msra.gmra.mxu0 %v2036_v24  ;;  %v1837_v24 = vrot.slane %v11313_v15, %v11160_v30 }
 0x900   :  { %2182 = vmatprep.mubr.bf16.mxu0 %v2039_v3  ;;  %9551 = vmatpush3.bf16.msra.mxu0 %v10073_v61  ;;  %v8323_v3 = vld [vmem:[#allocation9 + $0x5] ss:$0 sm:$0xff] }
 0x901   :  { %9552 = vmatprep.subr.bf16.mxu0 %v10074_v7  ;;  %v1957_v50 = vadd.f32 %v11315_v17, %v1837_v24  ;;  %v1971_v6 = vadd.f32 %v1970_v2, %v1837_v24  ;;  %v1967_v23 = vadd.f32 %v11321_v26, %v1837_v24  ;;  %v1961_v61 = vadd.f32 %v11319_v60, %v1837_v24 }
 0x902   :  { %v11377_v2 = vsel %vm298_vm8, 1.0, %v10893_v52 }
 0x904   :  { %9553 = vmatpush3.bf16.msra.mxu0 %v10074_v7 }
 0x905   :  { %9554 = vmatprep.subr.bf16.mxu0 %v10075_v54 }
 0x907   :  { %2183 = vmatmul.mubr.bf16.gmra.mxu0 %v2038_v56 }
 0x908   :  { %9555 = vmatpush3.bf16.msra.mxu0 %v10075_v54 }
 0x909   :  { %9556 = vmatprep.subr.bf16.mxu0 %v10076_v8 }
 0x90c   :  { %9557 = vmatpush3.bf16.msra.mxu0 %v10076_v8 }
 0x90d   :  { %9558 = vmatprep.subr.bf16.mxu0 %v10077_v39 }
 0x910   :  { %9559 = vmatpush3.bf16.msra.mxu0 %v10077_v39 }
 0x911   :  { %9560 = vmatprep.subr.bf16.mxu0 %v10078_v40 }
 0x914   :  { %9561 = vmatpush3.bf16.msra.mxu0 %v10078_v40 }
 0x915   :  { %9562 = vmatprep.subr.bf16.mxu0 %v10079_v41 }
 0x918   :  { %9563 = vmatpush3.bf16.msra.mxu0 %v10079_v41 }
 0x919   :  { %9564 = vmatprep.subr.bf16.mxu0 %v10080_v43 }
 0x91c   :  { %9565 = vmatpush3.bf16.msra.mxu0 %v10080_v43 }
 0x9bf   :  { %v8986_v9 = vpop.f32.mrf.mxu0 }
 0x9c1   :  { %v8987_v11 = vpop.f32.mrf.mxu0 }
 0x9c2   :  { %v8988_v12 = vadd.f32 %v8987_v11, %v8986_v9 }
 0x9c3   :  { %v8989_v14 = vpop.f32.mrf.mxu0 }
 0x9c4   :  { %v2177_v20 = vadd.f32 %v8988_v12, %v8306_v13 }
 0x9c5   :  { %v8990_v16 = vpop.f32.mrf.mxu0 }
 0x9c6   :  { %v8991_v58 = vadd.f32 %v8990_v16, %v8989_v14  ;;  %v2191_v10 = vmax.f32 %v2177_v20, 0.0  ;;  %v10088_v14 = vld [vmem:[#allocation2 + $0x220] sm:$0xff]   ;;  %v10089_v16 = vld [vmem:[#allocation2 + $0x258] sm:$0xff]  }
 0x9c7   :  { %v8992_v57 = vpop.f32.mrf.mxu0  ;;  %v10090_v20 = vld [vmem:[#allocation2 + $0x218] sm:$0xff]  }
 0x9c8   :  { %v2180_v62 = vadd.f32 %v8991_v58, %v8306_v13  ;;  %v10091_v58 = vld [vmem:[#allocation2 + $0x250] sm:$0xff]  }
 0x9c9   :  { %v8993_v63 = vpop.f32.mrf.mxu0 }
 0x9ca   :  { %v2192_v25 = vmax.f32 %v2180_v62, 0.0  ;;  %v8994_v27 = vadd.f32 %v8993_v63, %v8992_v57  ;;  %v10092_v57 = vld [vmem:[#allocation2 + $0x210] sm:$0xff]   ;;  %v10093_v62 = vld [vmem:[#allocation2 + $0x248] sm:$0xff]  }
 0x9cb   :  { %v8995_v28 = vpop.f32.mrf.mxu0  ;;  %v10094_v63 = vld [vmem:[#allocation2 + $0x208] sm:$0xff]  }
 0x9cc   :  { %v2212_v29 = vpack.c.bf16 %v2192_v25, %v2191_v10  ;;  %v2185_v32 = vadd.f32 %v8994_v27, %v8306_v13  ;;  %v10095_v10 = vld [vmem:[#allocation2 + $0x240] sm:$0xff]   ;;  %v10097_v27 = vld [vmem:[#allocation4 + $0x1f8] sm:$0xff]  }
 0x9cd   :  { %v8996_v31 = vpop.f32.mrf.mxu0  ;;  %v10096_v25 = vld [vmem:[#allocation2 + $0x200] sm:$0xff]   ;;  %9570 = vmatprep.subr.bf16.mxu0 %v10097_v27 }
 0x9ce   :  { %v8997_v33 = vadd.f32 %v8996_v31, %v8995_v28  ;;  %9546 = vmatprep.mubr.bf16.mxu1 %v2212_v29  ;;  %v2193_v35 = vmax.f32 %v2185_v32, 0.0  ;;  %v10098_v28 = vld [vmem:[#allocation4 + $0x1f0] sm:$0xff]   ;;  %v10099_v29 = vld [vmem:[#allocation4 + $0x1e8] sm:$0xff]   ;;  %v8332_v32 = vld [vmem:[#allocation9 + $0x6] ss:$0 sm:$0xff] }
 0x9d0   :  { %v2188_v34 = vadd.f32 %v8997_v33, %v8306_v13 }
 0x9d2   :  { %v2194_v37 = vmax.f32 %v2188_v34, 0.0 }
 0x9d4   :  { %v2213_v38 = vpack.c.bf16 %v2194_v37, %v2193_v35 }
 0x9d6   :  { %9547 = vmatmul.mubr.bf16.vlgmr.msra.gmra.mxu1 %v2213_v38 }
 0x9d7   :  { %9019 = vmatpush3.bf16.msra.mxu1 %v10082_v48 }
 0x9d8   :  { %9020 = vmatprep.subr.bf16.mxu1 %v10083_v49 }
 0x9db   :  { %9021 = vmatpush3.bf16.msra.mxu1 %v10084_v59 }
 0x9dc   :  { %9022 = vmatprep.subr.bf16.mxu1 %v10085_v4 }
 0x9df   :  { %9023 = vmatpush3.bf16.msra.mxu1 %v10086_v1 }
 0x9e0   :  { %9024 = vmatprep.subr.bf16.mxu1 %v10087_v53  ;;  %v11374_v53 = vsel %vm285_vm6, 1.0, %v10893_v52  ;;  %vm7885_vm6 = vcmask 1041408  }
 0x9e3   :  { %9025 = vmatpush3.bf16.msra.mxu1 %v10088_v14 }
 0x9e4   :  { %9026 = vmatprep.subr.bf16.mxu1 %v10089_v16  ;;  %v11399_v16 = vsel %vm287_vm11, 1.0, %v10893_v52 }
 0x9e7   :  { %9027 = vmatpush3.bf16.msra.mxu1 %v10090_v20 }
 0x9e8   :  { %9028 = vmatprep.subr.bf16.mxu1 %v10091_v58 }
 0x9eb   :  { %9029 = vmatpush3.bf16.msra.mxu1 %v10092_v57 }
 0x9ec   :  { %9030 = vmatprep.subr.bf16.mxu1 %v10093_v62 }
 0x9ef   :  { %9031 = vmatpush3.bf16.msra.mxu1 %v10094_v63  ;;  %v10100_v63 = vld [vmem:[#allocation4 + $0x1e0] sm:$0xff]  }
 0x9f0   :  { %9032 = vmatprep.subr.bf16.mxu1 %v10095_v10  ;;  %v10101_v10 = vld [vmem:[#allocation4 + $0x1d8] sm:$0xff]  }
 0x9f3   :  { %9033 = vmatpush3.bf16.msra.mxu1 %v10096_v25  ;;  %v10102_v25 = vld [vmem:[#allocation4 + $0x1d0] sm:$0xff]  }
 0xa96   :  { %v9548_v18 = vpop.f32.mrf.mxu1 }
 0xa97   :  { %v2313_v22 = vadd.f32 %v9548_v18, %v8323_v3  ;;  %v11380_v18 = vsel %vm300_vm7, 1.0, %v10893_v52  ;;  %vm8830_vm7 = vmpackc.low %vm7885_vm6, %vm7885_vm6 }
 0xa98   :  { %v2304_v5 = vpop.f32.mrf.mxu1 }
 0xa99   :  { %v2305_v55 = vadd.f32 %v8323_v3, %v2304_v5  ;;  %v11352_v15 = vadd.f32 %v2313_v22, %v1967_v23 }
 0xa9a   :  { %v9549_v56 = vpop.f32.mrf.mxu1 }
 0xa9b   :  { %v2316_v19 = vadd.f32 %v9549_v56, %v8323_v3  ;;  %v11348_v7 = vadd.f32 %v2305_v55, %v1957_v50  ;;  %v2325_v26 = vmax.f32 %v11352_v15, 0.0 }
 0xa9c   :  { %v2307_v21 = vpop.f32.mrf.mxu1 }
 0xa9d   :  { %v11350_v54 = vadd.f32 %v2316_v19, %v1971_v6  ;;  %v2308_v8 = vadd.f32 %v8323_v3, %v2307_v21  ;;  %v2323_v17 = vmax.f32 %v11348_v7, 0.0 }
 0xa9f   :  { %v11354_v9 = vadd.f32 %v2308_v8, %v1961_v61  ;;  %v2326_v11 = vmax.f32 %v11350_v54, 0.0 }
 0xaa1   :  { %v2324_v12 = vmax.f32 %v11354_v9, 0.0  ;;  %v2345_v13 = vpack.c.bf16 %v2326_v11, %v2325_v26  ;;  %v10120_v9 = vld [vmem:[#allocation2 + $0x2a0] sm:$0xff]  }
 0xaa3   :  { %v2344_v60 = vpack.c.bf16 %v2324_v12, %v2323_v17 }
 0xaa5   :  { %9566 = vmatprep.mubr.bf16.mxu0 %v2344_v60 }
 0xaa6   :  { %9567 = vmatmul.mubr.bf16.vlgmr.msra.gmra.mxu0 %v2345_v13 }
 0xaa7   :  { %9571 = vmatpush3.bf16.msra.mxu0 %v10097_v27  ;;  %v10103_v27 = vld [vmem:[#allocation4 + $0x1c8] sm:$0xff]  }
 0xaa8   :  { %9572 = vmatprep.subr.bf16.mxu0 %v10098_v28 }
 0xaab   :  { %9573 = vmatpush3.bf16.msra.mxu0 %v10098_v28  ;;  %v10104_v28 = vld [vmem:[#allocation4 + $0x1c0] sm:$0xff]  }
 0xaac   :  { %9574 = vmatprep.subr.bf16.mxu0 %v10099_v29 }
 0xaaf   :  { %9575 = vmatpush3.bf16.msra.mxu0 %v10099_v29  ;;  %v10105_v29 = vld [vmem:[#allocation4 + $0x238] sm:$0xff]  }
 0xab0   :  { %9576 = vmatprep.subr.bf16.mxu0 %v10100_v63  ;;  %9590 = vmatprep.subr.bf16.mxu1 %v10105_v29 }
 0xab3   :  { %9577 = vmatpush3.bf16.msra.mxu0 %v10100_v63 }
 0xab4   :  { %9578 = vmatprep.subr.bf16.mxu0 %v10101_v10 }
 0xab7   :  { %9579 = vmatpush3.bf16.msra.mxu0 %v10101_v10  ;;  %v8358_v10 = vld [vmem:[#allocation9 + $0x7] ss:$0 sm:$0xff] }
 0xab8   :  { %9580 = vmatprep.subr.bf16.mxu0 %v10102_v25 }
 0xabb   :  { %9581 = vmatpush3.bf16.msra.mxu0 %v10102_v25 }
 0xabc   :  { %9582 = vmatprep.subr.bf16.mxu0 %v10103_v27 }
 0xabf   :  { %9583 = vmatpush3.bf16.msra.mxu0 %v10103_v27 }
 0xac0   :  { %9584 = vmatprep.subr.bf16.mxu0 %v10104_v28 }
 0xac3   :  { %9585 = vmatpush3.bf16.msra.mxu0 %v10104_v28 }
 0xb66   :  { %v9568_v31 = vpop.f32.mrf.mxu0 }
 0xb67   :  { %v2445_v34 = vadd.f32 %v9568_v31, %v8332_v32  ;;  %v10106_v31 = vld [vmem:[#allocation4 + $0x230] sm:$0xff]  }
 0xb68   :  { %v2436_v33 = vpop.f32.mrf.mxu0 }
 0xb69   :  { %v2437_v35 = vadd.f32 %v8332_v32, %v2436_v33  ;;  %v2453_v41 = vmax.f32 %v2445_v34, 0.0  ;;  %v10108_v33 = vld [vmem:[#allocation4 + $0x220] sm:$0xff]  }
 0xb6a   :  { %v9569_v37 = vpop.f32.mrf.mxu0 }
 0xb6b   :  { %v2451_v38 = vmax.f32 %v2437_v35, 0.0  ;;  %v2448_v39 = vadd.f32 %v9569_v37, %v8332_v32  ;;  %v2505_v24 = vrot.slane %v2453_v41, 2  ;;  %v2492_v61 = vrot.slane %v2453_v41, 6 }
 0xb6c   :  { %v2439_v40 = vpop.f32.mrf.mxu0 }
 0xb6d   :  { %v2454_v43 = vmax.f32 %v2448_v39, 0.0  ;;  %v2440_v44 = vadd.f32 %v8332_v32, %v2439_v40  ;;  %v2490_v48 = vrot.slane %v2451_v38, 6  ;;  %v2503_v1 = vrot.slane %v2451_v38, 2  ;;  %v10107_v32 = vld [vmem:[#allocation4 + $0x228] sm:$0xff]  }
 0xb6e   :  { %v8341_v38 = vld [vmem:[#allocation7 + $0x4] ss:$0 sm:$0xff] }
 0xb6f   :  { %v2493_v49 = vrot.slane %v2454_v43, 6  ;;  %v2506_v59 = vrot.slane %v2454_v43, 2  ;;  %v2452_v4 = vmax.f32 %v2440_v44, 0.0 }
 0xb71   :  { %v2498_v3 = vsel %vm2494_vm9, %v2493_v49, %v2490_v48  ;;  %v2491_v5 = vrot.slane %v2452_v4, 6  ;;  %v2504_v55 = vrot.slane %v2452_v4, 2  ;;  %v2511_v22 = vsel %vm2507_vm10, %v2506_v59, %v2503_v1 }
 0xb72   :  { %v2499_v56 = vmul.f32 %v11374_v53, %v2498_v3  ;;  %v2515_v23 = vmul.f32 %v11380_v18, %v2511_v22  ;;  %v2508_v13 = vsel %vm2507_vm10, %v2505_v24, %v2506_v59  ;;  %v2495_v57 = vsel %vm2494_vm9, %v2492_v61, %v2493_v49 }
 0xb73   :  { %v2509_v50 = vsel %vm2507_vm10, %v2504_v55, %v2505_v24  ;;  %v2497_v6 = vsel %vm2494_vm9, %v2490_v48, %v2491_v5  ;;  %v2510_v21 = vsel %vm2507_vm10, %v2503_v1, %v2504_v55  ;;  %v2496_v20 = vsel %vm2494_vm9, %v2491_v5, %v2492_v61  ;;  %v10111_v61 = vld [vmem:[#allocation4 + $0x208] sm:$0xff]  }
 0xb74   :  { %v2513_v19 = vmul.f32 %v11377_v2, %v2509_v50  ;;  %v2516_v60 = vpack.c.bf16 %v2497_v6, %v2499_v56  ;;  %v2519_v14 = vpack.c.bf16 %v2515_v23, %v2508_v13  ;;  %v2501_v58 = vmul.f32 %v11399_v16, %v2496_v20  ;;  %v10109_v23 = vld [vmem:[#allocation4 + $0x218] sm:$0xff]   ;;  %v10116_v20 = vld [vmem:[#allocation2 + $0x2b0] sm:$0xff]  }
 0xb75   :  { %v10114_v13 = vld [vmem:[#allocation2 + $0x2b8] sm:$0xff]  }
 0xb76   :  { %v2517_v8 = vpack.c.bf16 %v2513_v19, %v2510_v21  ;;  %v2518_v62 = vpack.c.bf16 %v2495_v57, %v2501_v58  ;;  %v10110_v21 = vld [vmem:[#allocation4 + $0x210] sm:$0xff]   ;;  %v10117_v58 = vld [vmem:[#allocation2 + $0x2e8] sm:$0xff]  }
 0xb77   :  { %v10118_v57 = vld [vmem:[#allocation2 + $0x2a8] sm:$0xff]  }
 0xb78   :  { %2654 = vmatprep.mubr.bf16.mxu1 %v2517_v8  ;;  %v10112_v8 = vld [vmem:[#allocation4 + $0x200] sm:$0xff]  }
 0xb79   :  { %2655 = vmatmul.mubr.bf16.vlgmr.msra.gmra.mxu1 %v2516_v60  ;;  %v10113_v60 = vld [vmem:[#allocation2 + $0x2f8] sm:$0xff]  }
 0xb7a   :  { %2662 = vmatprep.mubr.bf16.mxu1 %v2519_v14  ;;  %9591 = vmatpush3.bf16.msra.mxu1 %v10105_v29  ;;  %v10115_v14 = vld [vmem:[#allocation2 + $0x2f0] sm:$0xff]  }
 0xb7b   :  { %9592 = vmatprep.subr.bf16.mxu1 %v10106_v31  ;;  %9066 = vmatprep.subr.bf16.mxu0 %v10113_v60 }
 0xb7e   :  { %9593 = vmatpush3.bf16.msra.mxu1 %v10106_v31 }
 0xb7f   :  { %9594 = vmatprep.subr.bf16.mxu1 %v10107_v32 }
 0xb81   :  { %2663 = vmatmul.mubr.bf16.gmra.mxu1 %v2518_v62  ;;  %v10119_v62 = vld [vmem:[#allocation2 + $0x2e0] sm:$0xff]  }
 0xb82   :  { %9595 = vmatpush3.bf16.msra.mxu1 %v10107_v32 }
 0xb83   :  { %9596 = vmatprep.subr.bf16.mxu1 %v10108_v33 }
 0xb86   :  { %9597 = vmatpush3.bf16.msra.mxu1 %v10108_v33 }
 0xb87   :  { %9598 = vmatprep.subr.bf16.mxu1 %v10109_v23 }
 0xb8a   :  { %9599 = vmatpush3.bf16.msra.mxu1 %v10109_v23 }
 0xb8b   :  { %9600 = vmatprep.subr.bf16.mxu1 %v10110_v21 }
 0xb8e   :  { %9601 = vmatpush3.bf16.msra.mxu1 %v10110_v21 }
 0xb8f   :  { %9602 = vmatprep.subr.bf16.mxu1 %v10111_v61 }
 0xb92   :  { %9603 = vmatpush3.bf16.msra.mxu1 %v10111_v61 }
 0xb93   :  { %9604 = vmatprep.subr.bf16.mxu1 %v10112_v8 }
 0xb96   :  { %9605 = vmatpush3.bf16.msra.mxu1 %v10112_v8 }
 0xc39   :  { %v9034_v34 = vpop.f32.mrf.mxu1 }
 0xc3b   :  { %v9035_v35 = vpop.f32.mrf.mxu1 }
 0xc3c   :  { %v9036_v37 = vadd.f32 %v9035_v35, %v9034_v34 }
 0xc3d   :  { %v9037_v39 = vpop.f32.mrf.mxu1 }
 0xc3e   :  { %v2657_v41 = vadd.f32 %v9036_v37, %v8341_v38 }
 0xc3f   :  { %v9038_v40 = vpop.f32.mrf.mxu1 }
 0xc40   :  { %v9039_v43 = vadd.f32 %v9038_v40, %v9037_v39  ;;  %v2671_v59 = vmax.f32 %v2657_v41, 0.0  ;;  %v10124_v41 = vld [vmem:[#allocation2 + $0x290] sm:$0xff]  }
 0xc41   :  { %v9040_v44 = vpop.f32.mrf.mxu1 }
 0xc42   :  { %v2660_v48 = vadd.f32 %v9039_v43, %v8341_v38  ;;  %v10125_v43 = vld [vmem:[#allocation2 + $0x2c8] sm:$0xff]  }
 0xc43   :  { %v9041_v49 = vpop.f32.mrf.mxu1 }
 0xc44   :  { %v2672_v4 = vmax.f32 %v2660_v48, 0.0  ;;  %v9042_v1 = vadd.f32 %v9041_v49, %v9040_v44  ;;  %v10126_v44 = vld [vmem:[#allocation2 + $0x288] sm:$0xff]   ;;  %v10127_v48 = vld [vmem:[#allocation2 + $0x2c0] sm:$0xff]  }
 0xc45   :  { %v9043_v24 = vpop.f32.mrf.mxu1  ;;  %v10128_v49 = vld [vmem:[#allocation2 + $0x280] sm:$0xff]  }
 0xc46   :  { %v2692_v3 = vpack.c.bf16 %v2672_v4, %v2671_v59  ;;  %v2665_v55 = vadd.f32 %v9042_v1, %v8341_v38  ;;  %v10129_v59 = vld [vmem:[#allocation4 + $0x278] sm:$0xff]   ;;  %v10130_v4 = vld [vmem:[#allocation4 + $0x270] sm:$0xff]   ;;  %v10131_v1 = vld [vmem:[#allocation4 + $0x268] sm:$0xff]  }
 0xc47   :  { %v9044_v5 = vpop.f32.mrf.mxu1  ;;  %9610 = vmatprep.subr.bf16.mxu1 %v10129_v59 }
 0xc48   :  { %v9045_v22 = vadd.f32 %v9044_v5, %v9043_v24  ;;  %9586 = vmatprep.mubr.bf16.mxu0 %v2692_v3  ;;  %v2673_v50 = vmax.f32 %v2665_v55, 0.0  ;;  %v8367_v3 = vld [vmem:[#allocation9 + $0x8] ss:$0 sm:$0xff] }
 0xc4a   :  { %v2668_v56 = vadd.f32 %v9045_v22, %v8341_v38 }
 0xc4c   :  { %v2674_v6 = vmax.f32 %v2668_v56, 0.0 }
 0xc4e   :  { %v2693_v19 = vpack.c.bf16 %v2674_v6, %v2673_v50 }
 0xc50   :  { %9587 = vmatmul.mubr.bf16.vlgmr.msra.gmra.mxu0 %v2693_v19 }
 0xc51   :  { %9067 = vmatpush3.bf16.msra.mxu0 %v10114_v13 }
 0xc52   :  { %9068 = vmatprep.subr.bf16.mxu0 %v10115_v14 }
 0xc55   :  { %9069 = vmatpush3.bf16.msra.mxu0 %v10116_v20 }
 0xc56   :  { %9070 = vmatprep.subr.bf16.mxu0 %v10117_v58 }
 0xc59   :  { %9071 = vmatpush3.bf16.msra.mxu0 %v10118_v57 }
 0xc5a   :  { %9072 = vmatprep.subr.bf16.mxu0 %v10119_v62 }
 0xc5d   :  { %9073 = vmatpush3.bf16.msra.mxu0 %v10120_v9 }
 0xd10   :  { %v9588_v63 = vpop.f32.mrf.mxu0 }
 0xd11   :  { %v2793_v28 = vadd.f32 %v9588_v63, %v8358_v10 }
 0xd12   :  { %v2784_v25 = vpop.f32.mrf.mxu0 }
 0xd13   :  { %v2785_v27 = vadd.f32 %v8358_v10, %v2784_v25  ;;  %v11416_v37 = vadd.f32 %v2793_v28, %v2325_v26  ;;  %v10123_v26 = vld [vmem:[#allocation2 + $0x2d0] sm:$0xff]  }
 0xd14   :  { %v9589_v29 = vpop.f32.mrf.mxu0 }
 0xd15   :  { %v2796_v31 = vadd.f32 %v9589_v29, %v8358_v10  ;;  %v11408_v33 = vadd.f32 %v2785_v27, %v2323_v17  ;;  %v2805_v17 = vmax.f32 %v11416_v37, 0.0 }
 0xd16   :  { %v2787_v32 = vpop.f32.mrf.mxu0 }
 0xd17   :  { %v11412_v34 = vadd.f32 %v2796_v31, %v2326_v11  ;;  %v2788_v35 = vadd.f32 %v8358_v10, %v2787_v32  ;;  %v2803_v40 = vmax.f32 %v11408_v33, 0.0  ;;  %v10121_v11 = vld [vmem:[#allocation2 + $0x2d8] sm:$0xff]  }
 0xd18   :  { %9074 = vmatprep.subr.bf16.mxu0 %v10121_v11 }
 0xd19   :  { %v11420_v38 = vadd.f32 %v2788_v35, %v2324_v12  ;;  %v2806_v39 = vmax.f32 %v11412_v34, 0.0  ;;  %v10122_v12 = vld [vmem:[#allocation2 + $0x298] sm:$0xff]  }
 0xd1a   :  { %9075 = vmatpush3.bf16.msra.mxu0 %v10122_v12 }
 0xd1b   :  { %v2804_v7 = vmax.f32 %v11420_v38, 0.0  ;;  %v2825_v15 = vpack.c.bf16 %v2806_v39, %v2805_v17  ;;  %9076 = vmatprep.subr.bf16.mxu0 %v10123_v26  ;;  %v10152_v38 = vld [vmem:[#allocation2 + $0x320] sm:$0xff]  }
 0xd1d   :  { %v2824_v54 = vpack.c.bf16 %v2804_v7, %v2803_v40 }
 0xd1e   :  { %9077 = vmatpush3.bf16.msra.mxu0 %v10124_v41 }
 0xd1f   :  { %9606 = vmatprep.mubr.bf16.mxu1 %v2824_v54  ;;  %9078 = vmatprep.subr.bf16.mxu0 %v10125_v43 }
 0xd20   :  { %9607 = vmatmul.mubr.bf16.vlgmr.msra.gmra.mxu1 %v2825_v15 }
 0xd21   :  { %9611 = vmatpush3.bf16.msra.mxu1 %v10129_v59  ;;  %v10135_v59 = vld [vmem:[#allocation4 + $0x248] sm:$0xff]  }
 0xd22   :  { %9079 = vmatpush3.bf16.msra.mxu0 %v10126_v44  ;;  %9612 = vmatprep.subr.bf16.mxu1 %v10130_v4  ;;  %v10132_v44 = vld [vmem:[#allocation4 + $0x260] sm:$0xff]  }
 0xd23   :  { %9080 = vmatprep.subr.bf16.mxu0 %v10127_v48  ;;  %v10133_v48 = vld [vmem:[#allocation4 + $0x258] sm:$0xff]  }
 0xd25   :  { %9613 = vmatpush3.bf16.msra.mxu1 %v10130_v4  ;;  %v10136_v4 = vld [vmem:[#allocation4 + $0x240] sm:$0xff]  }
 0xd26   :  { %9081 = vmatpush3.bf16.msra.mxu0 %v10128_v49  ;;  %9614 = vmatprep.subr.bf16.mxu1 %v10131_v1  ;;  %v10134_v49 = vld [vmem:[#allocation4 + $0x250] sm:$0xff]  }
 0xd29   :  { %9615 = vmatpush3.bf16.msra.mxu1 %v10131_v1  ;;  %v10137_v1 = vld [vmem:[#allocation4 + $0x2b8] sm:$0xff]  }
 0xd2a   :  { %9616 = vmatprep.subr.bf16.mxu1 %v10132_v44  ;;  %9630 = vmatprep.subr.bf16.mxu0 %v10137_v1 }
 0xd2d   :  { %9617 = vmatpush3.bf16.msra.mxu1 %v10132_v44 }
 0xd2e   :  { %9618 = vmatprep.subr.bf16.mxu1 %v10133_v48 }
 0xd31   :  { %9619 = vmatpush3.bf16.msra.mxu1 %v10133_v48  ;;  %v8393_v48 = vld [vmem:[#allocation9 + $0x9] ss:$0 sm:$0xff] }
 0xd32   :  { %9620 = vmatprep.subr.bf16.mxu1 %v10134_v49 }
 0xd35   :  { %9621 = vmatpush3.bf16.msra.mxu1 %v10134_v49 }
 0xd36   :  { %9622 = vmatprep.subr.bf16.mxu1 %v10135_v59 }
 0xd39   :  { %9623 = vmatpush3.bf16.msra.mxu1 %v10135_v59 }
 0xd3a   :  { %9624 = vmatprep.subr.bf16.mxu1 %v10136_v4 }
 0xd3d   :  { %9625 = vmatpush3.bf16.msra.mxu1 %v10136_v4 }
 0xde0   :  { %v9608_v24 = vpop.f32.mrf.mxu1 }
 0xde1   :  { %v2925_v55 = vadd.f32 %v9608_v24, %v8367_v3  ;;  %v10138_v24 = vld [vmem:[#allocation4 + $0x2b0] sm:$0xff]  }
 0xde2   :  { %v2916_v5 = vpop.f32.mrf.mxu1 }
 0xde3   :  { %v2917_v22 = vadd.f32 %v8367_v3, %v2916_v5  ;;  %v2933_v23 = vmax.f32 %v2925_v55, 0.0  ;;  %v10140_v5 = vld [vmem:[#allocation4 + $0x2a0] sm:$0xff]  }
 0xde4   :  { %v9609_v56 = vpop.f32.mrf.mxu1 }
 0xde5   :  { %v2931_v50 = vmax.f32 %v2917_v22, 0.0  ;;  %v2928_v6 = vadd.f32 %v9609_v56, %v8367_v3  ;;  %v2984_v58 = vrot.slane %v2933_v23, 2  ;;  %v2972_v35 = vrot.slane %v2933_v23, 6 }
 0xde6   :  { %v2919_v19 = vpop.f32.mrf.mxu1 }
 0xde7   :  { %v2934_v21 = vmax.f32 %v2928_v6, 0.0  ;;  %v2920_v61 = vadd.f32 %v8367_v3, %v2919_v19  ;;  %v2970_v8 = vrot.slane %v2931_v50, 6  ;;  %v2982_v20 = vrot.slane %v2931_v50, 2  ;;  %v10139_v3 = vld [vmem:[#allocation4 + $0x2a8] sm:$0xff]  }
 0xde8   :  { %v8376_v50 = vld [vmem:[#allocation7 + $0x5] ss:$0 sm:$0xff] }
 0xde9   :  { %v2973_v60 = vrot.slane %v2934_v21, 6  ;;  %v2985_v13 = vrot.slane %v2934_v21, 2  ;;  %v2932_v14 = vmax.f32 %v2920_v61, 0.0 }
 0xdeb   :  { %v2977_v57 = vsel %vm2494_vm9, %v2973_v60, %v2970_v8  ;;  %v2971_v62 = vrot.slane %v2932_v14, 6  ;;  %v2983_v63 = vrot.slane %v2932_v14, 2  ;;  %v2989_v10 = vsel %vm2507_vm10, %v2985_v13, %v2982_v20 }
 0xdec   :  { %v2978_v25 = vmul.f32 %v11374_v53, %v2977_v57  ;;  %v2993_v31 = vmul.f32 %v11380_v18, %v2989_v10  ;;  %v2986_v9 = vsel %vm2507_vm10, %v2984_v58, %v2985_v13  ;;  %v2974_v41 = vsel %vm2494_vm9, %v2972_v35, %v2973_v60 }
 0xded   :  { %v2987_v27 = vsel %vm2507_vm10, %v2983_v63, %v2984_v58  ;;  %v2976_v28 = vsel %vm2494_vm9, %v2970_v8, %v2971_v62  ;;  %v2988_v32 = vsel %vm2507_vm10, %v2982_v20, %v2983_v63  ;;  %v2975_v12 = vsel %vm2494_vm9, %v2971_v62, %v2972_v35  ;;  %v10143_v35 = vld [vmem:[#allocation4 + $0x288] sm:$0xff]  }
 0xdee   :  { %v2991_v29 = vmul.f32 %v11377_v2, %v2987_v27  ;;  %v2994_v15 = vpack.c.bf16 %v2976_v28, %v2978_v25  ;;  %v2997_v11 = vpack.c.bf16 %v2993_v31, %v2986_v9  ;;  %v2980_v26 = vmul.f32 %v11399_v16, %v2975_v12  ;;  %v10141_v31 = vld [vmem:[#allocation4 + $0x298] sm:$0xff]   ;;  %v10148_v12 = vld [vmem:[#allocation2 + $0x330] sm:$0xff]  }
 0xdef   :  { %v10146_v9 = vld [vmem:[#allocation2 + $0x338] sm:$0xff]  }
 0xdf0   :  { %v2995_v54 = vpack.c.bf16 %v2991_v29, %v2988_v32  ;;  %v2996_v43 = vpack.c.bf16 %v2974_v41, %v2980_v26  ;;  %v10142_v32 = vld [vmem:[#allocation4 + $0x290] sm:$0xff]   ;;  %v10149_v26 = vld [vmem:[#allocation2 + $0x368] sm:$0xff]  }
 0xdf1   :  { %v10150_v41 = vld [vmem:[#allocation2 + $0x328] sm:$0xff]  }
 0xdf2   :  { %3132 = vmatprep.mubr.bf16.mxu0 %v2995_v54  ;;  %v10144_v54 = vld [vmem:[#allocation4 + $0x280] sm:$0xff]  }
 0xdf3   :  { %3133 = vmatmul.mubr.bf16.vlgmr.msra.gmra.mxu0 %v2994_v15  ;;  %v10145_v15 = vld [vmem:[#allocation2 + $0x378] sm:$0xff]  }
 0xdf4   :  { %3140 = vmatprep.mubr.bf16.mxu0 %v2997_v11  ;;  %9631 = vmatpush3.bf16.msra.mxu0 %v10137_v1  ;;  %v10147_v11 = vld [vmem:[#allocation2 + $0x370] sm:$0xff]  }
 0xdf5   :  { %9632 = vmatprep.subr.bf16.mxu0 %v10138_v24  ;;  %9114 = vmatprep.subr.bf16.mxu1 %v10145_v15 }
 0xdf8   :  { %9633 = vmatpush3.bf16.msra.mxu0 %v10138_v24 }
 0xdf9   :  { %9634 = vmatprep.subr.bf16.mxu0 %v10139_v3 }
 0xdfb   :  { %3141 = vmatmul.mubr.bf16.gmra.mxu0 %v2996_v43  ;;  %v10151_v43 = vld [vmem:[#allocation2 + $0x360] sm:$0xff]  }
 0xdfc   :  { %9635 = vmatpush3.bf16.msra.mxu0 %v10139_v3 }
 0xdfd   :  { %9636 = vmatprep.subr.bf16.mxu0 %v10140_v5 }
 0xe00   :  { %9637 = vmatpush3.bf16.msra.mxu0 %v10140_v5 }
 0xe01   :  { %9638 = vmatprep.subr.bf16.mxu0 %v10141_v31 }
 0xe04   :  { %9639 = vmatpush3.bf16.msra.mxu0 %v10141_v31 }
 0xe05   :  { %9640 = vmatprep.subr.bf16.mxu0 %v10142_v32 }
 0xe08   :  { %9641 = vmatpush3.bf16.msra.mxu0 %v10142_v32 }
 0xe09   :  { %9642 = vmatprep.subr.bf16.mxu0 %v10143_v35 }
 0xe0c   :  { %9643 = vmatpush3.bf16.msra.mxu0 %v10143_v35 }
 0xe0d   :  { %9644 = vmatprep.subr.bf16.mxu0 %v10144_v54 }
 0xe10   :  { %9645 = vmatpush3.bf16.msra.mxu0 %v10144_v54 }
 0xeb3   :  { %v9082_v55 = vpop.f32.mrf.mxu0 }
 0xeb5   :  { %v9083_v22 = vpop.f32.mrf.mxu0 }
 0xeb6   :  { %v9084_v56 = vadd.f32 %v9083_v22, %v9082_v55 }
 0xeb7   :  { %v9085_v6 = vpop.f32.mrf.mxu0 }
 0xeb8   :  { %v3135_v23 = vadd.f32 %v9084_v56, %v8376_v50 }
 0xeb9   :  { %v9086_v19 = vpop.f32.mrf.mxu0 }
 0xeba   :  { %v9087_v21 = vadd.f32 %v9086_v19, %v9085_v6  ;;  %v3149_v13 = vmax.f32 %v3135_v23, 0.0  ;;  %v10156_v23 = vld [vmem:[#allocation2 + $0x310] sm:$0xff]  }
 0xebb   :  { %v9088_v61 = vpop.f32.mrf.mxu0 }
 0xebc   :  { %v3138_v8 = vadd.f32 %v9087_v21, %v8376_v50  ;;  %v10157_v21 = vld [vmem:[#allocation2 + $0x348] sm:$0xff]  }
 0xebd   :  { %v9089_v60 = vpop.f32.mrf.mxu0 }
 0xebe   :  { %v3150_v14 = vmax.f32 %v3138_v8, 0.0  ;;  %v9090_v20 = vadd.f32 %v9089_v60, %v9088_v61  ;;  %v10158_v61 = vld [vmem:[#allocation2 + $0x308] sm:$0xff]   ;;  %v10159_v8 = vld [vmem:[#allocation2 + $0x340] sm:$0xff]  }
 0xebf   :  { %v9091_v58 = vpop.f32.mrf.mxu0  ;;  %v10160_v60 = vld [vmem:[#allocation2 + $0x300] sm:$0xff]  }
 0xec0   :  { %v3170_v57 = vpack.c.bf16 %v3150_v14, %v3149_v13  ;;  %v3143_v63 = vadd.f32 %v9090_v20, %v8376_v50  ;;  %v10161_v13 = vld [vmem:[#allocation4 + $0x2f8] sm:$0xff]   ;;  %v10162_v14 = vld [vmem:[#allocation4 + $0x2f0] sm:$0xff]   ;;  %v10163_v20 = vld [vmem:[#allocation4 + $0x2e8] sm:$0xff]  }
 0xec1   :  { %v9092_v62 = vpop.f32.mrf.mxu0  ;;  %9650 = vmatprep.subr.bf16.mxu0 %v10161_v13 }
 0xec2   :  { %v9093_v10 = vadd.f32 %v9092_v62, %v9091_v58  ;;  %9626 = vmatprep.mubr.bf16.mxu1 %v3170_v57  ;;  %v3151_v27 = vmax.f32 %v3143_v63, 0.0  ;;  %v8402_v57 = vld [vmem:[#allocation9 + $0xa] ss:$0 sm:$0xff] }
 0xec4   :  { %v3146_v25 = vadd.f32 %v9093_v10, %v8376_v50 }
 0xec6   :  { %v3152_v28 = vmax.f32 %v3146_v25, 0.0 }
 0xec8   :  { %v3171_v29 = vpack.c.bf16 %v3152_v28, %v3151_v27 }
 0xeca   :  { %9627 = vmatmul.mubr.bf16.vlgmr.msra.gmra.mxu1 %v3171_v29 }
 0xecb   :  { %9115 = vmatpush3.bf16.msra.mxu1 %v10146_v9 }
 0xecc   :  { %9116 = vmatprep.subr.bf16.mxu1 %v10147_v11 }
 0xecf   :  { %9117 = vmatpush3.bf16.msra.mxu1 %v10148_v12 }
 0xed0   :  { %9118 = vmatprep.subr.bf16.mxu1 %v10149_v26 }
 0xed3   :  { %9119 = vmatpush3.bf16.msra.mxu1 %v10150_v41 }
 0xed4   :  { %9120 = vmatprep.subr.bf16.mxu1 %v10151_v43 }
 0xed7   :  { %9121 = vmatpush3.bf16.msra.mxu1 %v10152_v38 }
 0xf8a   :  { %v9628_v44 = vpop.f32.mrf.mxu1 }
 0xf8b   :  { %v3271_v4 = vadd.f32 %v9628_v44, %v8393_v48 }
 0xf8c   :  { %v3262_v49 = vpop.f32.mrf.mxu1 }
 0xf8d   :  { %v3263_v59 = vadd.f32 %v8393_v48, %v3262_v49  ;;  %v11464_v56 = vadd.f32 %v3271_v4, %v2805_v17  ;;  %v10155_v17 = vld [vmem:[#allocation2 + $0x350] sm:$0xff]  }
 0xf8e   :  { %v9629_v1 = vpop.f32.mrf.mxu1 }
 0xf8f   :  { %v3274_v24 = vadd.f32 %v9629_v1, %v8393_v48  ;;  %v11456_v5 = vadd.f32 %v3263_v59, %v2803_v40  ;;  %v3283_v40 = vmax.f32 %v11464_v56, 0.0  ;;  %v10203_v56 = vld [vmem:[#allocation2 + $0x3d0] sm:$0xff]  }
 0xf90   :  { %v3265_v3 = vpop.f32.mrf.mxu1 }
 0xf91   :  { %v11460_v55 = vadd.f32 %v3274_v24, %v2806_v39  ;;  %v3266_v22 = vadd.f32 %v8393_v48, %v3265_v3  ;;  %v3281_v19 = vmax.f32 %v11456_v5, 0.0  ;;  %v10153_v39 = vld [vmem:[#allocation2 + $0x358] sm:$0xff]  }
 0xf92   :  { %9122 = vmatprep.subr.bf16.mxu1 %v10153_v39 }
 0xf93   :  { %v11468_v50 = vadd.f32 %v3266_v22, %v2804_v7  ;;  %v3284_v6 = vmax.f32 %v11460_v55, 0.0  ;;  %v10154_v7 = vld [vmem:[#allocation2 + $0x318] sm:$0xff]  }
 0xf94   :  { %9123 = vmatpush3.bf16.msra.mxu1 %v10154_v7  ;;  %v10201_v55 = vld [vmem:[#allocation2 + $0x3d8] sm:$0xff]  }
 0xf95   :  { %v3282_v33 = vmax.f32 %v11468_v50, 0.0  ;;  %v3303_v37 = vpack.c.bf16 %v3284_v6, %v3283_v40  ;;  %9124 = vmatprep.subr.bf16.mxu1 %v10155_v17  ;;  %v10198_v50 = vld [vmem:[#allocation2 + $0x3a8] sm:$0xff]  }
 0xf97   :  { %v3302_v34 = vpack.c.bf16 %v3282_v33, %v3281_v19 }
 0xf98   :  { %9125 = vmatpush3.bf16.msra.mxu1 %v10156_v23 }
 0xf99   :  { %9646 = vmatprep.mubr.bf16.mxu0 %v3302_v34  ;;  %9126 = vmatprep.subr.bf16.mxu1 %v10157_v21 }
 0xf9a   :  { %9647 = vmatmul.mubr.bf16.vlgmr.msra.gmra.mxu0 %v3303_v37 }
 0xf9b   :  { %9651 = vmatpush3.bf16.msra.mxu0 %v10161_v13  ;;  %v10167_v13 = vld [vmem:[#allocation4 + $0x2c8] sm:$0xff]  }
 0xf9c   :  { %9127 = vmatpush3.bf16.msra.mxu1 %v10158_v61  ;;  %9652 = vmatprep.subr.bf16.mxu0 %v10162_v14  ;;  %v10164_v61 = vld [vmem:[#allocation4 + $0x2e0] sm:$0xff]  }
 0xf9d   :  { %9128 = vmatprep.subr.bf16.mxu1 %v10159_v8  ;;  %v10165_v8 = vld [vmem:[#allocation4 + $0x2d8] sm:$0xff]  }
 0xf9f   :  { %9653 = vmatpush3.bf16.msra.mxu0 %v10162_v14  ;;  %v10168_v14 = vld [vmem:[#allocation4 + $0x2c0] sm:$0xff]  }
 0xfa0   :  { %9129 = vmatpush3.bf16.msra.mxu1 %v10160_v60  ;;  %9654 = vmatprep.subr.bf16.mxu0 %v10163_v20  ;;  %v10166_v60 = vld [vmem:[#allocation4 + $0x2d0] sm:$0xff]  }
 0xfa3   :  { %9655 = vmatpush3.bf16.msra.mxu0 %v10163_v20  ;;  %v10169_v20 = vld [vmem:[%s11898_s1 + $0x170] ss:$8 sps:$4 sm:$0xff]  }
 0xfa4   :  { %9656 = vmatprep.subr.bf16.mxu0 %v10164_v61 }
 0xfa7   :  { %9657 = vmatpush3.bf16.msra.mxu0 %v10164_v61  ;;  %v10190_v61 = vld [vmem:[%s11898_s1 + $0x100] ss:$8 sps:$4 sm:$0xff]  }
 0xfa8   :  { %9658 = vmatprep.subr.bf16.mxu0 %v10165_v8 }
 0xfab   :  { %9659 = vmatpush3.bf16.msra.mxu0 %v10165_v8  ;;  %v10193_v8 = vld [vmem:[#allocation2 + $0x3f8] sm:$0xff]  }
 0xfac   :  { %9660 = vmatprep.subr.bf16.mxu0 %v10166_v60 }
 0xfaf   :  { %9661 = vmatpush3.bf16.msra.mxu0 %v10166_v60  ;;  %v10194_v60 = vld [vmem:[#allocation2 + $0x3b8] sm:$0xff]  }
 0xfb0   :  { %9662 = vmatprep.subr.bf16.mxu0 %v10167_v13 }
 0xfb3   :  { %9663 = vmatpush3.bf16.msra.mxu0 %v10167_v13  ;;  %v10195_v13 = vld [vmem:[#allocation2 + $0x3f0] sm:$0xff]  }
 0xfb4   :  { %9664 = vmatprep.subr.bf16.mxu0 %v10168_v14 }
 0xfb7   :  { %9665 = vmatpush3.bf16.msra.mxu0 %v10168_v14  ;;  %v10196_v14 = vld [vmem:[#allocation2 + $0x3b0] sm:$0xff]  }
 0xfb8   :  { %9152 = vmatprep.subr.bf16.mxu0 %v10193_v8 }
0x105a   :  { %v9648_v58 = vpop.f32.mrf.mxu0 }
0x105b   :  { %v3403_v63 = vadd.f32 %v9648_v58, %v8402_v57  ;;  %v10171_v58 = vld [vmem:[%s11898_s1 + $0x174] ss:$8 sps:$4 sm:$0xff]  }
0x105c   :  { %v3394_v62 = vpop.f32.mrf.mxu0  ;;  %3875 = vmatprep.subr.bf16.mxu1 %v10171_v58  ;;  %v8428_v58 = vld [vmem:[#allocation9 + $0xb] ss:$0 sm:$0xff] }
0x105d   :  { %v3395_v10 = vadd.f32 %v8402_v57, %v3394_v62  ;;  %v3411_v31 = vmax.f32 %v3403_v63, 0.0  ;;  %v10172_v62 = vld [vmem:[%s11898_s1 + $0x160] ss:$8 sps:$4 sm:$0xff]   ;;  %v10177_v63 = vld [vmem:[%s11898_s1 + $0x154] ss:$8 sps:$4 sm:$0xff]  }
0x105e   :  { %v9649_v25 = vpop.f32.mrf.mxu0 }
0x105f   :  { %v3409_v27 = vmax.f32 %v3395_v10, 0.0  ;;  %v3406_v28 = vadd.f32 %v9649_v25, %v8402_v57  ;;  %v3462_v26 = vrot.slane %v3411_v31, 2  ;;  %v3450_v22 = vrot.slane %v3411_v31, 6  ;;  %v10175_v10 = vld [vmem:[%s11898_s1 + $0x150] ss:$8 sps:$4 sm:$0xff]  }
0x1060   :  { %v3397_v29 = vpop.f32.mrf.mxu0  ;;  %v10180_v25 = vld [vmem:[%s11898_s1 + $0x144] ss:$8 sps:$4 sm:$0xff]  }
0x1061   :  { %v3412_v32 = vmax.f32 %v3406_v28, 0.0  ;;  %v3398_v35 = vadd.f32 %v8402_v57, %v3397_v29  ;;  %v3448_v54 = vrot.slane %v3409_v27, 6  ;;  %v3460_v12 = vrot.slane %v3409_v27, 2  ;;  %v10174_v57 = vld [vmem:[%s11898_s1 + $0x164] ss:$8 sps:$4 sm:$0xff]  }
0x1062   :  { %v10178_v27 = vld [vmem:[%s11898_s1 + $0x140] ss:$8 sps:$4 sm:$0xff]   ;;  %v10183_v28 = vld [vmem:[%s11898_s1 + $0x134] ss:$8 sps:$4 sm:$0xff]   ;;  %v10181_v29 = vld [vmem:[%s11898_s1 + $0x130] ss:$8 sps:$4 sm:$0xff]  }
0x1063   :  { %v3451_v15 = vrot.slane %v3412_v32, 6  ;;  %v3463_v9 = vrot.slane %v3412_v32, 2  ;;  %v3410_v11 = vmax.f32 %v3398_v35, 0.0 }
0x1065   :  { %v3455_v41 = vsel %vm2494_vm9, %v3451_v15, %v3448_v54  ;;  %v3449_v43 = vrot.slane %v3410_v11, 6  ;;  %v3461_v44 = vrot.slane %v3410_v11, 2  ;;  %v3467_v48 = vsel %vm2507_vm10, %v3463_v9, %v3460_v12 }
0x1066   :  { %v3456_v49 = vmul.f32 %v11374_v53, %v3455_v41  ;;  %v3471_v24 = vmul.f32 %v11380_v18, %v3467_v48  ;;  %v3464_v38 = vsel %vm2507_vm10, %v3462_v26, %v3463_v9  ;;  %v3452_v23 = vsel %vm2494_vm9, %v3450_v22, %v3451_v15 }
0x1067   :  { %v3465_v59 = vsel %vm2507_vm10, %v3461_v44, %v3462_v26  ;;  %v3454_v4 = vsel %vm2494_vm9, %v3448_v54, %v3449_v43  ;;  %v3466_v3 = vsel %vm2507_vm10, %v3460_v12, %v3461_v44  ;;  %v3453_v7 = vsel %vm2494_vm9, %v3449_v43, %v3450_v22  ;;  %v8411_v54 = vld [vmem:[#allocation7 + $0x6] ss:$0 sm:$0xff] }
0x1068   :  { %v3469_v1 = vmul.f32 %v11377_v2, %v3465_v59  ;;  %v3472_v37 = vpack.c.bf16 %v3454_v4, %v3456_v49  ;;  %v3475_v39 = vpack.c.bf16 %v3471_v24, %v3464_v38  ;;  %v3458_v17 = vmul.f32 %v11399_v16, %v3453_v7  ;;  %v10184_v7 = vld [vmem:[%s11898_s1 + $0x120] ss:$8 sps:$4 sm:$0xff]  }
0x106a   :  { %v3473_v34 = vpack.c.bf16 %v3469_v1, %v3466_v3  ;;  %v3474_v21 = vpack.c.bf16 %v3452_v23, %v3458_v17  ;;  %v10189_v17 = vld [vmem:[%s11898_s1 + $0x114] ss:$8 sps:$4 sm:$0xff]   ;;  %v10187_v23 = vld [vmem:[%s11898_s1 + $0x110] ss:$8 sps:$4 sm:$0xff]  }
0x106c   :  { %3610 = vmatprep.mubr.bf16.mxu1 %v3473_v34 }
0x106d   :  { %3611 = vmatmul.mubr.bf16.vlgmr.msra.gmra.mxu1 %v3472_v37 }
0x106e   :  { %3618 = vmatprep.mubr.bf16.mxu1 %v3475_v39  ;;  %3876 = vmatpush1.bf16.msra.mxu1 %v10169_v20  ;;  %v10186_v39 = vld [vmem:[%s11898_s1 + $0x124] ss:$8 sps:$4 sm:$0xff]  }
0x106f   :  { %3877 = vmatprep.subr.bf16.mxu1 %v10174_v57 }
0x1072   :  { %3878 = vmatpush1.bf16.msra.mxu1 %v10172_v62 }
0x1073   :  { %3879 = vmatprep.subr.bf16.mxu1 %v10177_v63 }
0x1075   :  { %3619 = vmatmul.mubr.bf16.gmra.mxu1 %v3474_v21  ;;  %v10192_v21 = vld [vmem:[%s11898_s1 + $0x104] ss:$8 sps:$4 sm:$0xff]  }
0x1076   :  { %3907 = vmatprep.mubr.bf16.mxu1 %v10892_v0  ;;  %3880 = vmatpush1.bf16.msra.mxu1 %v10175_v10 }
0x1077   :  { %3881 = vmatprep.subr.bf16.mxu1 %v10180_v25 }
0x107a   :  { %3882 = vmatpush1.bf16.msra.mxu1 %v10178_v27 }
0x107b   :  { %3883 = vmatprep.subr.bf16.mxu1 %v10183_v28 }
0x107e   :  { %3884 = vmatpush1.bf16.msra.mxu1 %v10181_v29 }
0x107f   :  { %3885 = vmatprep.subr.bf16.mxu1 %v10186_v39 }
0x1082   :  { %3886 = vmatpush1.bf16.msra.mxu1 %v10184_v7 }
0x1083   :  { %3887 = vmatprep.subr.bf16.mxu1 %v10189_v17 }
0x1086   :  { %3888 = vmatpush1.bf16.msra.mxu1 %v10187_v23 }
0x1087   :  { %3889 = vmatprep.subr.bf16.mxu1 %v10192_v21 }
0x108a   :  { %3890 = vmatpush1.bf16.msra.mxu1 %v10190_v61 }
0x112d   :  { %v9130_v31 = vpop.f32.mrf.mxu1 }
0x112f   :  { %v9131_v32 = vpop.f32.mrf.mxu1 }
0x1130   :  { %v9132_v35 = vadd.f32 %v9131_v32, %v9130_v31 }
0x1131   :  { %v9133_v15 = vpop.f32.mrf.mxu1 }
0x1132   :  { %v3613_v11 = vadd.f32 %v9132_v35, %v8411_v54 }
0x1133   :  { %v9134_v9 = vpop.f32.mrf.mxu1 }
0x1134   :  { %v9135_v12 = vadd.f32 %v9134_v9, %v9133_v15  ;;  %v3627_v44 = vmax.f32 %v3613_v11, 0.0 }
0x1135   :  { %v9136_v26 = vpop.f32.mrf.mxu1 }
0x1136   :  { %v3616_v41 = vadd.f32 %v9135_v12, %v8411_v54  ;;  %v10197_v12 = vld [vmem:[#allocation2 + $0x3e8] sm:$0xff]  }
0x1137   :  { %v9137_v43 = vpop.f32.mrf.mxu1 }
0x1138   :  { %v3628_v48 = vmax.f32 %v3616_v41, 0.0  ;;  %v9138_v49 = vadd.f32 %v9137_v43, %v9136_v26  ;;  %v10200_v26 = vld [vmem:[#allocation2 + $0x3a0] sm:$0xff]   ;;  %v10205_v41 = vld [vmem:[#allocation2 + $0x3c8] sm:$0xff]  }
0x1139   :  { %v9139_v59 = vpop.f32.mrf.mxu1  ;;  %v10206_v43 = vld [vmem:[#allocation2 + $0x388] sm:$0xff]  }
0x113a   :  { %v3648_v4 = vpack.c.bf16 %v3628_v48, %v3627_v44  ;;  %v3621_v24 = vadd.f32 %v9138_v49, %v8411_v54  ;;  %v10207_v44 = vld [vmem:[#allocation2 + $0x3c0] sm:$0xff]   ;;  %v10209_v49 = vld [vmem:[#allocation4 + $0x338] sm:$0xff]  }
0x113b   :  { %v9140_v1 = vpop.f32.mrf.mxu1  ;;  %v10208_v48 = vld [vmem:[#allocation2 + $0x380] sm:$0xff]   ;;  %9670 = vmatprep.subr.bf16.mxu1 %v10209_v49 }
0x113c   :  { %v9141_v3 = vadd.f32 %v9140_v1, %v9139_v59  ;;  %9666 = vmatprep.mubr.bf16.mxu0 %v3648_v4  ;;  %v3629_v34 = vmax.f32 %v3621_v24, 0.0  ;;  %v10210_v59 = vld [vmem:[#allocation4 + $0x330] sm:$0xff]   ;;  %v10211_v4 = vld [vmem:[#allocation4 + $0x328] sm:$0xff]   ;;  %v11560_v1 = vld [vmem:[#allocation6 + $0x4] sm:$0x3] }
0x113e   :  { %v3624_v22 = vadd.f32 %v9141_v3, %v8411_v54 }
0x1140   :  { %v3630_v37 = vmax.f32 %v3624_v22, 0.0  ;;  %v3788_v22 = vrot.slane %v11560_v1, %v11113_v51 }
0x1142   :  { %v3649_v38 = vpack.c.bf16 %v3630_v37, %v3629_v34 }
0x1144   :  { %9667 = vmatmul.mubr.bf16.vlgmr.msra.gmra.mxu0 %v3649_v38 }
0x1145   :  { %9153 = vmatpush3.bf16.msra.mxu0 %v10194_v60 }
0x1146   :  { %9154 = vmatprep.subr.bf16.mxu0 %v10195_v13 }
0x1149   :  { %9155 = vmatpush3.bf16.msra.mxu0 %v10196_v14 }
0x114a   :  { %9156 = vmatprep.subr.bf16.mxu0 %v10197_v12 }
0x114d   :  { %9157 = vmatpush3.bf16.msra.mxu0 %v10198_v50 }
0x1204   :  { %v9668_v20 = vpop.f32.mrf.mxu0 }
0x1205   :  { %v3749_v31 = vadd.f32 %v9668_v20, %v8428_v58 }
0x1206   :  { %v3740_v57 = vpop.f32.mrf.mxu0 }
0x1207   :  { %v3741_v62 = vadd.f32 %v8428_v58, %v3740_v57  ;;  %v3757_v9 = vadd.f32 %v3749_v31, %v3283_v40  ;;  %v10204_v40 = vld [vmem:[#allocation2 + $0x390] sm:$0xff]  }
0x1208   :  { %v9669_v63 = vpop.f32.mrf.mxu0 }
0x1209   :  { %v3755_v25 = vadd.f32 %v3741_v62, %v3281_v19  ;;  %v3752_v28 = vadd.f32 %v9669_v63, %v8428_v58  ;;  %v3761_v19 = vmax.f32 %v3757_v9, 0.0 }
0x120a   :  { %v3743_v10 = vpop.f32.mrf.mxu0 }
0x120b   :  { %v3744_v27 = vadd.f32 %v8428_v58, %v3743_v10  ;;  %v3759_v32 = vmax.f32 %v3755_v25, 0.0  ;;  %v3758_v54 = vadd.f32 %v3752_v28, %v3284_v6  ;;  %v10202_v6 = vld [vmem:[#allocation2 + $0x398] sm:$0xff]  }
0x120d   :  { %v3756_v29 = vadd.f32 %v3744_v27, %v3282_v33  ;;  %v3762_v5 = vmax.f32 %v3758_v54, 0.0  ;;  %v10199_v33 = vld [vmem:[#allocation2 + $0x3e0] sm:$0xff]  }
0x120e   :  { %9158 = vmatprep.subr.bf16.mxu0 %v10199_v33  ;;  %v10212_v33 = vld [vmem:[#allocation4 + $0x320] sm:$0xff]  }
0x120f   :  { %v3760_v35 = vmax.f32 %v3756_v29, 0.0  ;;  %v3781_v11 = vpack.c.bf16 %v3762_v5, %v3761_v19  ;;  %9159 = vmatpush3.bf16.msra.mxu0 %v10200_v26  ;;  %v10213_v26 = vld [vmem:[#allocation4 + $0x318] sm:$0xff]  }
0x1210   :  { %9160 = vmatprep.subr.bf16.mxu0 %v10201_v55  ;;  %v10214_v55 = vld [vmem:[#allocation4 + $0x310] sm:$0xff]  }
0x1211   :  { %v3780_v15 = vpack.c.bf16 %v3760_v35, %v3759_v32 }
0x1213   :  { %3908 = vmatmul.mubr.bf16.vlgmr.msra.gmra.mxu1 %v3780_v15  ;;  %9161 = vmatpush3.bf16.msra.mxu0 %v10202_v6  ;;  %v10215_v6 = vld [vmem:[#allocation4 + $0x308] sm:$0xff]  }
0x1214   :  { %3917 = vmatprep.mubr.bf16.mxu1 %v10892_v0  ;;  %9162 = vmatprep.subr.bf16.mxu0 %v10203_v56  ;;  %v10216_v56 = vld [vmem:[#allocation4 + $0x300] sm:$0xff]  }
0x1215   :  { %9671 = vmatpush3.bf16.msra.mxu1 %v10209_v49 }
0x1216   :  { %9672 = vmatprep.subr.bf16.mxu1 %v10210_v59 }
0x1217   :  { %9163 = vmatpush3.bf16.msra.mxu0 %v10204_v40  ;;  %v10217_v40 = vld [vmem:[#allocation4 + $0x378] sm:$0xff]  }
0x1218   :  { %9164 = vmatprep.subr.bf16.mxu0 %v10205_v41  ;;  %v10218_v41 = vld [vmem:[#allocation4 + $0x370] sm:$0xff]  }
0x1219   :  { %9673 = vmatpush3.bf16.msra.mxu1 %v10210_v59  ;;  %v8469_v59 = vld [vmem:[#allocation7 + $0x7] ss:$0 sm:$0xff] }
0x121a   :  { %9674 = vmatprep.subr.bf16.mxu1 %v10211_v4 }
0x121b   :  { %3918 = vmatmul.mubr.bf16.gmra.mxu1 %v3781_v11  ;;  %9165 = vmatpush3.bf16.msra.mxu0 %v10206_v43  ;;  %v10220_v43 = vld [vmem:[#allocation4 + $0x360] sm:$0xff]  }
0x121c   :  { %9166 = vmatprep.subr.bf16.mxu0 %v10207_v44 }
0x121d   :  { %9675 = vmatpush3.bf16.msra.mxu1 %v10211_v4 }
0x121e   :  { %9676 = vmatprep.subr.bf16.mxu1 %v10212_v33 }
0x121f   :  { %9167 = vmatpush3.bf16.msra.mxu0 %v10208_v48 }
0x1220   :  { %9690 = vmatprep.subr.bf16.mxu0 %v10217_v40 }
0x1221   :  { %9677 = vmatpush3.bf16.msra.mxu1 %v10212_v33 }
0x1222   :  { %9678 = vmatprep.subr.bf16.mxu1 %v10213_v26 }
0x1225   :  { %9679 = vmatpush3.bf16.msra.mxu1 %v10213_v26 }
0x1226   :  { %9680 = vmatprep.subr.bf16.mxu1 %v10214_v55 }
0x1229   :  { %9681 = vmatpush3.bf16.msra.mxu1 %v10214_v55 }
0x122a   :  { %9682 = vmatprep.subr.bf16.mxu1 %v10215_v6 }
0x122d   :  { %9683 = vmatpush3.bf16.msra.mxu1 %v10215_v6 }
0x122e   :  { %9684 = vmatprep.subr.bf16.mxu1 %v10216_v56 }
0x1231   :  { %9685 = vmatpush3.bf16.msra.mxu1 %v10216_v56 }
0x12d3   :  { %v3909_v24 = vpop.f32.mrf.mxu1 }
0x12d4   :  { %v3910_v39 = vadd.f32 %v3909_v24, %v3788_v22 }
0x12d5   :  { %v11562_v3 = vpop.f32.mrf.mxu1 }
0x12d6   :  { %v3928_v61 = vmax.f32 %v3910_v39, 0.0 }
0x12d7   :  { %v3913_v34 = vpop.f32.mrf.mxu1 }
0x12d8   :  { %v3914_v37 = vadd.f32 %v3913_v34, %v3788_v22  ;;  %v3979_v58 = vrot.slane %v3928_v61, 2  ;;  %v3967_v63 = vrot.slane %v3928_v61, 6 }
0x12d9   :  { %v11566_v38 = vpop.f32.mrf.mxu1 }
0x12da   :  { %v3929_v17 = vmax.f32 %v3914_v37, 0.0 }
0x12db   :  { %v3919_v7 = vpop.f32.mrf.mxu1 }
0x12dc   :  { %v3920_v23 = vadd.f32 %v3919_v7, %v3788_v22  ;;  %v3980_v13 = vrot.slane %v3929_v17, 2  ;;  %v3968_v25 = vrot.slane %v3929_v17, 6 }
0x12dd   :  { %v11568_v21 = vpop.f32.mrf.mxu1 }
0x12de   :  { %v3930_v8 = vmax.f32 %v3920_v23, 0.0  ;;  %v3985_v29 = vsel %vm2507_vm10, %v3979_v58, %v3980_v13 }
0x12df   :  { %v3923_v60 = vpop.f32.mrf.mxu1 }
0x12e0   :  { %v3981_v14 = vrot.slane %v3930_v8, 2  ;;  %v3924_v20 = vadd.f32 %v3923_v60, %v3788_v22  ;;  %v3969_v9 = vrot.slane %v3930_v8, 6 }
0x12e2   :  { %v3931_v57 = vmax.f32 %v3924_v20, 0.0  ;;  %v3984_v62 = vsel %vm2507_vm10, %v3980_v13, %v3981_v14  ;;  %v3972_v12 = vsel %vm2494_vm9, %v3968_v25, %v3969_v9 }
0x12e3   :  { %v3988_v10 = vmul.f32 %v11377_v2, %v3984_v62  ;;  %v3973_v2 = vsel %vm2494_vm9, %v3967_v63, %v3968_v25  ;;  %v3977_v50 = vmul.f32 %v11399_v16, %v3972_v12  ;;  %v10219_v16 = vld [vmem:[#allocation4 + $0x368] sm:$0xff]   ;;  %v10222_v25 = vld [vmem:[#allocation4 + $0x350] sm:$0xff]  }
0x12e4   :  { %v3970_v27 = vrot.slane %v3931_v57, 6  ;;  %v3982_v28 = vrot.slane %v3931_v57, 2 }
0x12e5   :  { %v3992_v31 = vpack.c.bf16 %v3988_v10, %v3985_v29  ;;  %v10221_v10 = vld [vmem:[#allocation4 + $0x358] sm:$0xff]  }
0x12e6   :  { %v3974_v32 = vsel %vm2494_vm9, %v3970_v27, %v3967_v63  ;;  %v3986_v35 = vsel %vm2507_vm10, %v3982_v28, %v3979_v58  ;;  %v3983_v5 = vsel %vm2507_vm10, %v3981_v14, %v3982_v28  ;;  %v10224_v28 = vld [vmem:[#allocation4 + $0x340] sm:$0xff]   ;;  %v10225_v29 = vld [vmem:[#allocation2 + $0x478] sm:$0xff]  }
0x12e7   :  { %v3975_v54 = vmul.f32 %v11374_v53, %v3974_v32  ;;  %4129 = vmatprep.mubr.bf16.mxu0 %v3992_v31  ;;  %v3990_v15 = vmul.f32 %v11380_v18, %v3986_v35  ;;  %v3971_v53 = vsel %vm2494_vm9, %v3969_v9, %v3970_v27  ;;  %v10223_v27 = vld [vmem:[#allocation4 + $0x348] sm:$0xff]   ;;  %v10226_v31 = vld [vmem:[#allocation2 + $0x438] sm:$0xff]   ;;  %v10227_v32 = vld [vmem:[#allocation2 + $0x470] sm:$0xff]   ;;  %9200 = vmatprep.subr.bf16.mxu1 %v10225_v29  ;;  %v3925_v9 = vpop.f32.mrf.mxu1 }
0x12e8   :  { %v3993_v18 = vpack.c.bf16 %v3971_v53, %v3977_v50  ;;  %v10228_v35 = vld [vmem:[#allocation2 + $0x430] sm:$0xff]  }
0x12e9   :  { %v3991_v19 = vpack.c.bf16 %v3973_v2, %v3975_v54  ;;  %v3994_v11 = vpack.c.bf16 %v3990_v15, %v3983_v5  ;;  %v10229_v54 = vld [vmem:[#allocation2 + $0x468] sm:$0xff]   ;;  %v10231_v2 = vld [vmem:[#allocation2 + $0x460] sm:$0xff]  }
0x12ea   :  { %v10230_v15 = vld [vmem:[#allocation2 + $0x428] sm:$0xff]  }
0x12eb   :  { %4130 = vmatmul.mubr.bf16.vlgmr.msra.gmra.mxu0 %v3991_v19  ;;  %v3792_v19 = vrot.slane %v11560_v1, %v11160_v30 }
0x12ec   :  { %4137 = vmatprep.mubr.bf16.mxu0 %v3994_v11  ;;  %9691 = vmatpush3.bf16.msra.mxu0 %v10217_v40  ;;  %v8486_v11 = vld [vmem:[#allocation9 + $0xc] ss:$0 sm:$0xff] }
0x12ed   :  { %9692 = vmatprep.subr.bf16.mxu0 %v10218_v41  ;;  %v3912_v33 = vadd.f32 %v11562_v3, %v3792_v19  ;;  %v3926_v26 = vadd.f32 %v3925_v9, %v3792_v19  ;;  %v3922_v6 = vadd.f32 %v11568_v21, %v3792_v19  ;;  %v3916_v40 = vadd.f32 %v11566_v38, %v3792_v19 }
0x12ee   :  { %v11628_v19 = vsel %vm322_vm15, 1.0, %v10893_v52 }
0x12f0   :  { %9693 = vmatpush3.bf16.msra.mxu0 %v10218_v41 }
0x12f1   :  { %9694 = vmatprep.subr.bf16.mxu0 %v10219_v16 }
0x12f3   :  { %4138 = vmatmul.mubr.bf16.gmra.mxu0 %v3993_v18 }
0x12f4   :  { %9695 = vmatpush3.bf16.msra.mxu0 %v10219_v16 }
0x12f5   :  { %9696 = vmatprep.subr.bf16.mxu0 %v10220_v43 }
0x12f8   :  { %9697 = vmatpush3.bf16.msra.mxu0 %v10220_v43 }
0x12f9   :  { %9698 = vmatprep.subr.bf16.mxu0 %v10221_v10 }
0x12fc   :  { %9699 = vmatpush3.bf16.msra.mxu0 %v10221_v10 }
0x12fd   :  { %9700 = vmatprep.subr.bf16.mxu0 %v10222_v25 }
0x1300   :  { %9701 = vmatpush3.bf16.msra.mxu0 %v10222_v25 }
0x1301   :  { %9702 = vmatprep.subr.bf16.mxu0 %v10223_v27 }
0x1304   :  { %9703 = vmatpush3.bf16.msra.mxu0 %v10223_v27 }
0x1305   :  { %9704 = vmatprep.subr.bf16.mxu0 %v10224_v28 }
0x1308   :  { %9705 = vmatpush3.bf16.msra.mxu0 %v10224_v28 }
0x13ab   :  { %v9168_v44 = vpop.f32.mrf.mxu0 }
0x13ad   :  { %v9169_v48 = vpop.f32.mrf.mxu0 }
0x13ae   :  { %v9170_v49 = vadd.f32 %v9169_v48, %v9168_v44 }
0x13af   :  { %v9171_v4 = vpop.f32.mrf.mxu0 }
0x13b0   :  { %v4132_v22 = vadd.f32 %v9170_v49, %v8469_v59 }
0x13b1   :  { %v9172_v24 = vpop.f32.mrf.mxu0 }
0x13b2   :  { %v9173_v34 = vadd.f32 %v9172_v24, %v9171_v4  ;;  %v4146_v17 = vmax.f32 %v4132_v22, 0.0  ;;  %v10232_v4 = vld [vmem:[#allocation2 + $0x420] sm:$0xff]   ;;  %v10233_v24 = vld [vmem:[#allocation2 + $0x458] sm:$0xff]  }
0x13b3   :  { %v9174_v37 = vpop.f32.mrf.mxu0  ;;  %v10234_v22 = vld [vmem:[#allocation2 + $0x418] sm:$0xff]  }
0x13b4   :  { %v4135_v39 = vadd.f32 %v9173_v34, %v8469_v59  ;;  %v10235_v34 = vld [vmem:[#allocation2 + $0x450] sm:$0xff]  }
0x13b5   :  { %v9175_v7 = vpop.f32.mrf.mxu0 }
0x13b6   :  { %v4147_v23 = vmax.f32 %v4135_v39, 0.0  ;;  %v9176_v61 = vadd.f32 %v9175_v7, %v9174_v37  ;;  %v10236_v37 = vld [vmem:[#allocation2 + $0x410] sm:$0xff]   ;;  %v10237_v39 = vld [vmem:[#allocation2 + $0x448] sm:$0xff]  }
0x13b7   :  { %v9177_v8 = vpop.f32.mrf.mxu0  ;;  %v10238_v7 = vld [vmem:[#allocation2 + $0x408] sm:$0xff]  }
0x13b8   :  { %v4167_v60 = vpack.c.bf16 %v4147_v23, %v4146_v17  ;;  %v4140_v14 = vadd.f32 %v9176_v61, %v8469_v59  ;;  %v10239_v17 = vld [vmem:[#allocation2 + $0x440] sm:$0xff]   ;;  %v10241_v61 = vld [vmem:[#allocation4 + $0x3b8] sm:$0xff]  }
0x13b9   :  { %v9178_v13 = vpop.f32.mrf.mxu0  ;;  %v10240_v23 = vld [vmem:[#allocation2 + $0x400] sm:$0xff]   ;;  %9710 = vmatprep.subr.bf16.mxu0 %v10241_v61 }
0x13ba   :  { %v9179_v20 = vadd.f32 %v9178_v13, %v9177_v8  ;;  %9686 = vmatprep.mubr.bf16.mxu1 %v4167_v60  ;;  %v4148_v57 = vmax.f32 %v4140_v14, 0.0  ;;  %v10242_v8 = vld [vmem:[#allocation4 + $0x3b0] sm:$0xff]   ;;  %v10243_v60 = vld [vmem:[#allocation4 + $0x3a8] sm:$0xff]   ;;  %v8495_v14 = vld [vmem:[#allocation9 + $0xd] ss:$0 sm:$0xff] }
0x13bc   :  { %v4143_v58 = vadd.f32 %v9179_v20, %v8469_v59 }
0x13be   :  { %v4149_v62 = vmax.f32 %v4143_v58, 0.0 }
0x13c0   :  { %v4168_v63 = vpack.c.bf16 %v4149_v62, %v4148_v57 }
0x13c2   :  { %9687 = vmatmul.mubr.bf16.vlgmr.msra.gmra.mxu1 %v4168_v63 }
0x13c3   :  { %9201 = vmatpush3.bf16.msra.mxu1 %v10226_v31 }
0x13c4   :  { %9202 = vmatprep.subr.bf16.mxu1 %v10227_v32 }
0x13c7   :  { %9203 = vmatpush3.bf16.msra.mxu1 %v10228_v35 }
0x13c8   :  { %9204 = vmatprep.subr.bf16.mxu1 %v10229_v54  ;;  %v11620_v54 = vsel %vm309_vm12, 1.0, %v10893_v52 }
0x13cb   :  { %9205 = vmatpush3.bf16.msra.mxu1 %v10230_v15  ;;  %v11623_v15 = vsel %vm324_vm13, 1.0, %v10893_v52 }
0x13cc   :  { %9206 = vmatprep.subr.bf16.mxu1 %v10231_v2 }
0x13cf   :  { %9207 = vmatpush3.bf16.msra.mxu1 %v10232_v4  ;;  %v10246_v4 = vld [vmem:[#allocation4 + $0x390] sm:$0xff]  }
0x13d0   :  { %9208 = vmatprep.subr.bf16.mxu1 %v10233_v24  ;;  %v10247_v24 = vld [vmem:[#allocation4 + $0x388] sm:$0xff]  }
0x13d3   :  { %9209 = vmatpush3.bf16.msra.mxu1 %v10234_v22  ;;  %v10248_v22 = vld [vmem:[#allocation4 + $0x380] sm:$0xff]  }
0x13d4   :  { %9210 = vmatprep.subr.bf16.mxu1 %v10235_v34  ;;  %v10249_v34 = vld [vmem:[#allocation4 + $0x3f8] sm:$0xff]  }
0x13d7   :  { %9211 = vmatpush3.bf16.msra.mxu1 %v10236_v37  ;;  %v10250_v37 = vld [vmem:[#allocation4 + $0x3f0] sm:$0xff]  }
0x13d8   :  { %9212 = vmatprep.subr.bf16.mxu1 %v10237_v39  ;;  %v10251_v39 = vld [vmem:[#allocation4 + $0x3e8] sm:$0xff]  }
0x13db   :  { %9213 = vmatpush3.bf16.msra.mxu1 %v10238_v7  ;;  %v10252_v7 = vld [vmem:[#allocation4 + $0x3e0] sm:$0xff]  }
0x13dc   :  { %9214 = vmatprep.subr.bf16.mxu1 %v10239_v17 }
0x13df   :  { %9215 = vmatpush3.bf16.msra.mxu1 %v10240_v23 }
0x13e0   :  { %9730 = vmatprep.subr.bf16.mxu1 %v10249_v34 }
0x1482   :  { %v9688_v5 = vpop.f32.mrf.mxu1 }
0x1483   :  { %v4268_v50 = vadd.f32 %v9688_v5, %v8486_v11 }
0x1484   :  { %v4259_v12 = vpop.f32.mrf.mxu1 }
0x1485   :  { %v4260_v53 = vadd.f32 %v8486_v11, %v4259_v12  ;;  %v11599_v1 = vadd.f32 %v4268_v50, %v3922_v6 }
0x1486   :  { %v9689_v18 = vpop.f32.mrf.mxu1 }
0x1487   :  { %v4271_v55 = vadd.f32 %v9689_v18, %v8486_v11  ;;  %v11595_v41 = vadd.f32 %v4260_v53, %v3912_v33  ;;  %v4280_v21 = vmax.f32 %v11599_v1, 0.0 }
0x1488   :  { %v4262_v56 = vpop.f32.mrf.mxu1 }
0x1489   :  { %v11597_v16 = vadd.f32 %v4271_v55, %v3926_v26  ;;  %v4263_v43 = vadd.f32 %v8486_v11, %v4262_v56  ;;  %v4278_v3 = vmax.f32 %v11595_v41, 0.0  ;;  %v11641_v56 = vsel %vm311_vm0, 1.0, %v10893_v52 }
0x148b   :  { %v11601_v44 = vadd.f32 %v4263_v43, %v3916_v40  ;;  %v4281_v48 = vmax.f32 %v11597_v16, 0.0 }
0x148d   :  { %v4279_v49 = vmax.f32 %v11601_v44, 0.0  ;;  %v4300_v59 = vpack.c.bf16 %v4281_v48, %v4280_v21  ;;  %v10264_v44 = vld [vmem:[#allocation2 + $0x4a0] sm:$0xff]  }
0x148f   :  { %v4299_v38 = vpack.c.bf16 %v4279_v49, %v4278_v3 }
0x1491   :  { %9706 = vmatprep.mubr.bf16.mxu0 %v4299_v38  ;;  %v10244_v38 = vld [vmem:[#allocation4 + $0x3a0] sm:$0xff]  }
0x1492   :  { %9707 = vmatmul.mubr.bf16.vlgmr.msra.gmra.mxu0 %v4300_v59  ;;  %v10245_v59 = vld [vmem:[#allocation4 + $0x398] sm:$0xff]  }
0x1493   :  { %9711 = vmatpush3.bf16.msra.mxu0 %v10241_v61 }
0x1494   :  { %9712 = vmatprep.subr.bf16.mxu0 %v10242_v8 }
0x1497   :  { %9713 = vmatpush3.bf16.msra.mxu0 %v10242_v8  ;;  %v8504_v8 = vld [vmem:[#allocation7 + $0x8] ss:$0 sm:$0xff] }
0x1498   :  { %9714 = vmatprep.subr.bf16.mxu0 %v10243_v60 }
0x149b   :  { %9715 = vmatpush3.bf16.msra.mxu0 %v10243_v60 }
0x149c   :  { %9716 = vmatprep.subr.bf16.mxu0 %v10244_v38 }
0x149f   :  { %9717 = vmatpush3.bf16.msra.mxu0 %v10244_v38 }
0x14a0   :  { %9718 = vmatprep.subr.bf16.mxu0 %v10245_v59 }
0x14a3   :  { %9719 = vmatpush3.bf16.msra.mxu0 %v10245_v59  ;;  %v8521_v59 = vld [vmem:[#allocation9 + $0xe] ss:$0 sm:$0xff] }
0x14a4   :  { %9720 = vmatprep.subr.bf16.mxu0 %v10246_v4 }
0x14a7   :  { %9721 = vmatpush3.bf16.msra.mxu0 %v10246_v4 }
0x14a8   :  { %9722 = vmatprep.subr.bf16.mxu0 %v10247_v24 }
0x14ab   :  { %9723 = vmatpush3.bf16.msra.mxu0 %v10247_v24 }
0x14ac   :  { %9724 = vmatprep.subr.bf16.mxu0 %v10248_v22 }
0x14af   :  { %9725 = vmatpush3.bf16.msra.mxu0 %v10248_v22 }
0x1552   :  { %v9708_v13 = vpop.f32.mrf.mxu0 }
0x1553   :  { %v4400_v58 = vadd.f32 %v9708_v13, %v8495_v14 }
0x1554   :  { %v4391_v20 = vpop.f32.mrf.mxu0 }
0x1555   :  { %v4392_v57 = vadd.f32 %v8495_v14, %v4391_v20  ;;  %v4408_v27 = vmax.f32 %v4400_v58, 0.0 }
0x1556   :  { %v9709_v62 = vpop.f32.mrf.mxu0 }
0x1557   :  { %v4406_v63 = vmax.f32 %v4392_v57, 0.0  ;;  %v4403_v10 = vadd.f32 %v9709_v62, %v8495_v14  ;;  %v4447_v2 = vrot.slane %v4408_v27, 4 }
0x1558   :  { %v4394_v25 = vpop.f32.mrf.mxu0 }
0x1559   :  { %v4409_v28 = vmax.f32 %v4403_v10, 0.0  ;;  %v4395_v29 = vadd.f32 %v8495_v14, %v4394_v25  ;;  %v4445_v31 = vrot.slane %v4406_v63, 4 }
0x155b   :  { %v4448_v32 = vrot.slane %v4409_v28, 4  ;;  %v4407_v35 = vmax.f32 %v4395_v29, 0.0 }
0x155d   :  { %v4453_v9 = vsel %vm4449_vm14, %v4448_v32, %v4445_v31  ;;  %v4446_v5 = vrot.slane %v4407_v35, 4  ;;  %v4450_v55 = vsel %vm4449_vm14, %v4447_v2, %v4448_v32 }
0x155e   :  { %v4454_v11 = vmul.f32 %v11620_v54, %v4453_v9  ;;  %v4461_v18 = vmul.f32 %v11623_v15, %v4453_v9 }
0x155f   :  { %v4451_v12 = vsel %vm4449_vm14, %v4446_v5, %v4447_v2  ;;  %v4452_v53 = vsel %vm4449_vm14, %v4445_v31, %v4446_v5 }
0x1560   :  { %v4459_v50 = vmul.f32 %v11628_v19, %v4451_v12  ;;  %v4462_v26 = vpack.c.bf16 %v4452_v53, %v4454_v11  ;;  %v4465_v6 = vpack.c.bf16 %v4461_v18, %v4450_v55  ;;  %v4456_v40 = vmul.f32 %v11641_v56, %v4451_v12  ;;  %v10253_v11 = vld [vmem:[#allocation4 + $0x3d8] sm:$0xff]   ;;  %v10254_v12 = vld [vmem:[#allocation4 + $0x3d0] sm:$0xff]  }
0x1561   :  { %v10257_v18 = vld [vmem:[#allocation2 + $0x4f8] sm:$0xff]  }
0x1562   :  { %v4463_v33 = vpack.c.bf16 %v4459_v50, %v4452_v53  ;;  %v4464_v43 = vpack.c.bf16 %v4450_v55, %v4456_v40  ;;  %v10255_v53 = vld [vmem:[#allocation4 + $0x3c8] sm:$0xff]   ;;  %v10256_v50 = vld [vmem:[#allocation4 + $0x3c0] sm:$0xff]   ;;  %9248 = vmatprep.subr.bf16.mxu0 %v10257_v18  ;;  %v10260_v55 = vld [vmem:[#allocation2 + $0x4b0] sm:$0xff]  }
0x1563   :  { %v10262_v40 = vld [vmem:[#allocation2 + $0x4a8] sm:$0xff]  }
0x1564   :  { %4600 = vmatprep.mubr.bf16.mxu1 %v4463_v33  ;;  %v10258_v33 = vld [vmem:[#allocation2 + $0x4b8] sm:$0xff]  }
0x1565   :  { %4601 = vmatmul.mubr.bf16.vlgmr.msra.gmra.mxu1 %v4462_v26  ;;  %v10259_v26 = vld [vmem:[#allocation2 + $0x4f0] sm:$0xff]  }
0x1566   :  { %4608 = vmatprep.mubr.bf16.mxu1 %v4465_v6  ;;  %9731 = vmatpush3.bf16.msra.mxu1 %v10249_v34  ;;  %v10261_v6 = vld [vmem:[#allocation2 + $0x4e8] sm:$0xff]  }
0x1567   :  { %9732 = vmatprep.subr.bf16.mxu1 %v10250_v37 }
0x156a   :  { %9733 = vmatpush3.bf16.msra.mxu1 %v10250_v37 }
0x156b   :  { %9734 = vmatprep.subr.bf16.mxu1 %v10251_v39 }
0x156d   :  { %4609 = vmatmul.mubr.bf16.gmra.mxu1 %v4464_v43  ;;  %v10263_v43 = vld [vmem:[#allocation2 + $0x4e0] sm:$0xff]  }
0x156e   :  { %9735 = vmatpush3.bf16.msra.mxu1 %v10251_v39 }
0x156f   :  { %9736 = vmatprep.subr.bf16.mxu1 %v10252_v7 }
0x1572   :  { %9737 = vmatpush3.bf16.msra.mxu1 %v10252_v7 }
0x1573   :  { %9738 = vmatprep.subr.bf16.mxu1 %v10253_v11 }
0x1576   :  { %9739 = vmatpush3.bf16.msra.mxu1 %v10253_v11 }
0x1577   :  { %9740 = vmatprep.subr.bf16.mxu1 %v10254_v12 }
0x157a   :  { %9741 = vmatpush3.bf16.msra.mxu1 %v10254_v12 }
0x157b   :  { %9742 = vmatprep.subr.bf16.mxu1 %v10255_v53 }
0x157e   :  { %9743 = vmatpush3.bf16.msra.mxu1 %v10255_v53 }
0x157f   :  { %9744 = vmatprep.subr.bf16.mxu1 %v10256_v50 }
0x1582   :  { %9745 = vmatpush3.bf16.msra.mxu1 %v10256_v50 }
0x1625   :  { %v9216_v17 = vpop.f32.mrf.mxu1 }
0x1627   :  { %v9217_v23 = vpop.f32.mrf.mxu1 }
0x1628   :  { %v9218_v61 = vadd.f32 %v9217_v23, %v9216_v17 }
0x1629   :  { %v9219_v60 = vpop.f32.mrf.mxu1 }
0x162a   :  { %v4603_v14 = vadd.f32 %v9218_v61, %v8504_v8 }
0x162b   :  { %v9220_v13 = vpop.f32.mrf.mxu1 }
0x162c   :  { %v9221_v20 = vadd.f32 %v9220_v13, %v9219_v60  ;;  %v4617_v63 = vmax.f32 %v4603_v14, 0.0  ;;  %v10268_v14 = vld [vmem:[#allocation2 + $0x490] sm:$0xff]  }
0x162d   :  { %v9222_v58 = vpop.f32.mrf.mxu1 }
0x162e   :  { %v4606_v57 = vadd.f32 %v9221_v20, %v8504_v8  ;;  %v10269_v20 = vld [vmem:[#allocation2 + $0x4c8] sm:$0xff]  }
0x162f   :  { %v9223_v62 = vpop.f32.mrf.mxu1 }
0x1630   :  { %v4618_v10 = vmax.f32 %v4606_v57, 0.0  ;;  %v9224_v25 = vadd.f32 %v9223_v62, %v9222_v58  ;;  %v10270_v58 = vld [vmem:[#allocation2 + $0x488] sm:$0xff]   ;;  %v10271_v57 = vld [vmem:[#allocation2 + $0x4c0] sm:$0xff]  }
0x1631   :  { %v9225_v27 = vpop.f32.mrf.mxu1  ;;  %v10272_v62 = vld [vmem:[#allocation2 + $0x480] sm:$0xff]  }
0x1632   :  { %v4638_v28 = vpack.c.bf16 %v4618_v10, %v4617_v63  ;;  %v4611_v31 = vadd.f32 %v9224_v25, %v8504_v8  ;;  %v10273_v63 = vld [vmem:[#allocation4 + $0x438] sm:$0xff]   ;;  %v10274_v10 = vld [vmem:[#allocation4 + $0x430] sm:$0xff]   ;;  %v10275_v25 = vld [vmem:[#allocation4 + $0x428] sm:$0xff]  }
0x1633   :  { %v9226_v29 = vpop.f32.mrf.mxu1  ;;  %9750 = vmatprep.subr.bf16.mxu1 %v10273_v63 }
0x1634   :  { %v9227_v32 = vadd.f32 %v9226_v29, %v9225_v27  ;;  %9726 = vmatprep.mubr.bf16.mxu0 %v4638_v28  ;;  %v4619_v2 = vmax.f32 %v4611_v31, 0.0  ;;  %v8530_v28 = vld [vmem:[#allocation9 + $0xf] ss:$0 sm:$0xff] }
0x1636   :  { %v4614_v35 = vadd.f32 %v9227_v32, %v8504_v8 }
0x1638   :  { %v4620_v9 = vmax.f32 %v4614_v35, 0.0 }
0x163a   :  { %v4639_v5 = vpack.c.bf16 %v4620_v9, %v4619_v2 }
0x163c   :  { %9727 = vmatmul.mubr.bf16.vlgmr.msra.gmra.mxu0 %v4639_v5 }
0x163d   :  { %9249 = vmatpush3.bf16.msra.mxu0 %v10258_v33 }
0x163e   :  { %9250 = vmatprep.subr.bf16.mxu0 %v10259_v26 }
0x1641   :  { %9251 = vmatpush3.bf16.msra.mxu0 %v10260_v55 }
0x1642   :  { %9252 = vmatprep.subr.bf16.mxu0 %v10261_v6 }
0x1645   :  { %9253 = vmatpush3.bf16.msra.mxu0 %v10262_v40 }
0x1646   :  { %9254 = vmatprep.subr.bf16.mxu0 %v10263_v43 }
0x1649   :  { %9255 = vmatpush3.bf16.msra.mxu0 %v10264_v44  ;;  %v10278_v44 = vld [vmem:[#allocation4 + $0x410] sm:$0xff]  }
0x16fc   :  { %v9728_v38 = vpop.f32.mrf.mxu0 }
0x16fd   :  { %v4739_v22 = vadd.f32 %v9728_v38, %v8521_v59 }
0x16fe   :  { %v4730_v4 = vpop.f32.mrf.mxu0 }
0x16ff   :  { %v4731_v24 = vadd.f32 %v8521_v59, %v4730_v4  ;;  %v11654_v61 = vadd.f32 %v4739_v22, %v4280_v21  ;;  %v10267_v21 = vld [vmem:[#allocation2 + $0x4d0] sm:$0xff]  }
0x1700   :  { %v9729_v34 = vpop.f32.mrf.mxu0 }
0x1701   :  { %v4742_v37 = vadd.f32 %v9729_v34, %v8521_v59  ;;  %v11646_v7 = vadd.f32 %v4731_v24, %v4278_v3  ;;  %v4751_v3 = vmax.f32 %v11654_v61, 0.0 }
0x1702   :  { %v4733_v39 = vpop.f32.mrf.mxu0 }
0x1703   :  { %v11650_v17 = vadd.f32 %v4742_v37, %v4281_v48  ;;  %v4734_v23 = vadd.f32 %v8521_v59, %v4733_v39  ;;  %v4749_v13 = vmax.f32 %v11646_v7, 0.0  ;;  %v10265_v48 = vld [vmem:[#allocation2 + $0x4d8] sm:$0xff]  }
0x1704   :  { %9256 = vmatprep.subr.bf16.mxu0 %v10265_v48  ;;  %v10279_v48 = vld [vmem:[#allocation4 + $0x408] sm:$0xff]  }
0x1705   :  { %v11658_v8 = vadd.f32 %v4734_v23, %v4279_v49  ;;  %v4752_v60 = vmax.f32 %v11650_v17, 0.0  ;;  %v10266_v49 = vld [vmem:[#allocation2 + $0x498] sm:$0xff]  }
0x1706   :  { %9257 = vmatpush3.bf16.msra.mxu0 %v10266_v49  ;;  %v10280_v49 = vld [vmem:[#allocation4 + $0x400] sm:$0xff]  }
0x1707   :  { %v4750_v41 = vmax.f32 %v11658_v8, 0.0  ;;  %v4771_v1 = vpack.c.bf16 %v4752_v60, %v4751_v3  ;;  %9258 = vmatprep.subr.bf16.mxu0 %v10267_v21  ;;  %v10281_v21 = vld [vmem:[#allocation4 + $0x478] sm:$0xff]   ;;  %v10296_v8 = vld [vmem:[#allocation2 + $0x520] sm:$0xff]  }
0x1709   :  { %v4770_v16 = vpack.c.bf16 %v4750_v41, %v4749_v13 }
0x170a   :  { %9259 = vmatpush3.bf16.msra.mxu0 %v10268_v14  ;;  %v10282_v14 = vld [vmem:[#allocation4 + $0x470] sm:$0xff]  }
0x170b   :  { %9746 = vmatprep.mubr.bf16.mxu1 %v4770_v16  ;;  %9260 = vmatprep.subr.bf16.mxu0 %v10269_v20  ;;  %v10276_v16 = vld [vmem:[#allocation4 + $0x420] sm:$0xff]   ;;  %v10283_v20 = vld [vmem:[#allocation4 + $0x468] sm:$0xff]  }
0x170c   :  { %9747 = vmatmul.mubr.bf16.vlgmr.msra.gmra.mxu1 %v4771_v1  ;;  %v10277_v1 = vld [vmem:[#allocation4 + $0x418] sm:$0xff]  }
0x170d   :  { %9751 = vmatpush3.bf16.msra.mxu1 %v10273_v63 }
0x170e   :  { %9261 = vmatpush3.bf16.msra.mxu0 %v10270_v58  ;;  %9752 = vmatprep.subr.bf16.mxu1 %v10274_v10  ;;  %v10284_v58 = vld [vmem:[#allocation4 + $0x460] sm:$0xff]  }
0x170f   :  { %9262 = vmatprep.subr.bf16.mxu0 %v10271_v57 }
0x1711   :  { %9753 = vmatpush3.bf16.msra.mxu1 %v10274_v10  ;;  %v8539_v10 = vld [vmem:[#allocation7 + $0x9] ss:$0 sm:$0xff] }
0x1712   :  { %9263 = vmatpush3.bf16.msra.mxu0 %v10272_v62  ;;  %9754 = vmatprep.subr.bf16.mxu1 %v10275_v25 }
0x1713   :  { %9770 = vmatprep.subr.bf16.mxu0 %v10281_v21 }
0x1715   :  { %9755 = vmatpush3.bf16.msra.mxu1 %v10275_v25 }
0x1716   :  { %9756 = vmatprep.subr.bf16.mxu1 %v10276_v16 }
0x1719   :  { %9757 = vmatpush3.bf16.msra.mxu1 %v10276_v16 }
0x171a   :  { %9758 = vmatprep.subr.bf16.mxu1 %v10277_v1 }
0x171d   :  { %9759 = vmatpush3.bf16.msra.mxu1 %v10277_v1  ;;  %v8556_v1 = vld [vmem:[#allocation9 + $0x10] ss:$0 sm:$0xff] }
0x171e   :  { %9760 = vmatprep.subr.bf16.mxu1 %v10278_v44 }
0x1721   :  { %9761 = vmatpush3.bf16.msra.mxu1 %v10278_v44 }
0x1722   :  { %9762 = vmatprep.subr.bf16.mxu1 %v10279_v48 }
0x1725   :  { %9763 = vmatpush3.bf16.msra.mxu1 %v10279_v48 }
0x1726   :  { %9764 = vmatprep.subr.bf16.mxu1 %v10280_v49 }
0x1729   :  { %9765 = vmatpush3.bf16.msra.mxu1 %v10280_v49 }
0x17cc   :  { %v9748_v27 = vpop.f32.mrf.mxu1 }
0x17cd   :  { %v4871_v31 = vadd.f32 %v9748_v27, %v8530_v28 }
0x17ce   :  { %v4862_v29 = vpop.f32.mrf.mxu1 }
0x17cf   :  { %v4863_v32 = vadd.f32 %v8530_v28, %v4862_v29  ;;  %v4879_v11 = vmax.f32 %v4871_v31, 0.0 }
0x17d0   :  { %v9749_v35 = vpop.f32.mrf.mxu1 }
0x17d1   :  { %v4877_v2 = vmax.f32 %v4863_v32, 0.0  ;;  %v4874_v9 = vadd.f32 %v9749_v35, %v8530_v28  ;;  %v4918_v26 = vrot.slane %v4879_v11, 4 }
0x17d2   :  { %v4865_v5 = vpop.f32.mrf.mxu1 }
0x17d3   :  { %v4880_v12 = vmax.f32 %v4874_v9, 0.0  ;;  %v4866_v53 = vadd.f32 %v8530_v28, %v4865_v5  ;;  %v4916_v50 = vrot.slane %v4877_v2, 4 }
0x17d5   :  { %v4919_v18 = vrot.slane %v4880_v12, 4  ;;  %v4878_v33 = vmax.f32 %v4866_v53, 0.0 }
0x17d7   :  { %v4923_v55 = vsel %vm4449_vm14, %v4919_v18, %v4916_v50  ;;  %v4917_v6 = vrot.slane %v4878_v33, 4  ;;  %v4920_v34 = vsel %vm4449_vm14, %v4918_v26, %v4919_v18 }
0x17d8   :  { %v4924_v40 = vmul.f32 %v11620_v54, %v4923_v55  ;;  %v4931_v4 = vmul.f32 %v11623_v15, %v4923_v55 }
0x17d9   :  { %v4921_v43 = vsel %vm4449_vm14, %v4917_v6, %v4918_v26  ;;  %v4922_v38 = vsel %vm4449_vm14, %v4916_v50, %v4917_v6 }
0x17da   :  { %v4929_v59 = vmul.f32 %v11628_v19, %v4921_v43  ;;  %v4932_v22 = vpack.c.bf16 %v4922_v38, %v4924_v40  ;;  %v4935_v37 = vpack.c.bf16 %v4931_v4, %v4920_v34  ;;  %v4926_v39 = vmul.f32 %v11641_v56, %v4921_v43  ;;  %v10285_v40 = vld [vmem:[#allocation4 + $0x458] sm:$0xff]   ;;  %v10286_v43 = vld [vmem:[#allocation4 + $0x450] sm:$0xff]  }
0x17db   :  { %v10289_v4 = vld [vmem:[#allocation2 + $0x578] sm:$0xff]  }
0x17dc   :  { %v4933_v24 = vpack.c.bf16 %v4929_v59, %v4922_v38  ;;  %v4934_v23 = vpack.c.bf16 %v4920_v34, %v4926_v39  ;;  %v10287_v38 = vld [vmem:[#allocation4 + $0x448] sm:$0xff]   ;;  %v10288_v59 = vld [vmem:[#allocation4 + $0x440] sm:$0xff]   ;;  %9296 = vmatprep.subr.bf16.mxu1 %v10289_v4  ;;  %v10292_v34 = vld [vmem:[#allocation2 + $0x530] sm:$0xff]  }
0x17dd   :  { %v10294_v39 = vld [vmem:[#allocation2 + $0x528] sm:$0xff]  }
0x17de   :  { %5070 = vmatprep.mubr.bf16.mxu0 %v4933_v24  ;;  %v10290_v24 = vld [vmem:[#allocation2 + $0x538] sm:$0xff]  }
0x17df   :  { %5071 = vmatmul.mubr.bf16.vlgmr.msra.gmra.mxu0 %v4932_v22  ;;  %v10291_v22 = vld [vmem:[#allocation2 + $0x570] sm:$0xff]  }
0x17e0   :  { %5078 = vmatprep.mubr.bf16.mxu0 %v4935_v37  ;;  %9771 = vmatpush3.bf16.msra.mxu0 %v10281_v21  ;;  %v10293_v37 = vld [vmem:[#allocation2 + $0x568] sm:$0xff]  }
0x17e1   :  { %9772 = vmatprep.subr.bf16.mxu0 %v10282_v14 }
0x17e4   :  { %9773 = vmatpush3.bf16.msra.mxu0 %v10282_v14 }
0x17e5   :  { %9774 = vmatprep.subr.bf16.mxu0 %v10283_v20 }
0x17e7   :  { %5079 = vmatmul.mubr.bf16.gmra.mxu0 %v4934_v23  ;;  %v10295_v23 = vld [vmem:[#allocation2 + $0x560] sm:$0xff]  }
0x17e8   :  { %9775 = vmatpush3.bf16.msra.mxu0 %v10283_v20 }
0x17e9   :  { %9776 = vmatprep.subr.bf16.mxu0 %v10284_v58 }
0x17ec   :  { %9777 = vmatpush3.bf16.msra.mxu0 %v10284_v58 }
0x17ed   :  { %9778 = vmatprep.subr.bf16.mxu0 %v10285_v40 }
0x17f0   :  { %9779 = vmatpush3.bf16.msra.mxu0 %v10285_v40 }
0x17f1   :  { %9780 = vmatprep.subr.bf16.mxu0 %v10286_v43 }
0x17f4   :  { %9781 = vmatpush3.bf16.msra.mxu0 %v10286_v43 }
0x17f5   :  { %9782 = vmatprep.subr.bf16.mxu0 %v10287_v38 }
0x17f8   :  { %9783 = vmatpush3.bf16.msra.mxu0 %v10287_v38 }
0x17f9   :  { %9784 = vmatprep.subr.bf16.mxu0 %v10288_v59 }
0x17fc   :  { %9785 = vmatpush3.bf16.msra.mxu0 %v10288_v59 }
0x189f   :  { %v9264_v57 = vpop.f32.mrf.mxu0 }
0x18a1   :  { %v9265_v62 = vpop.f32.mrf.mxu0 }
0x18a2   :  { %v9266_v63 = vadd.f32 %v9265_v62, %v9264_v57 }
0x18a3   :  { %v9267_v25 = vpop.f32.mrf.mxu0 }
0x18a4   :  { %v5073_v28 = vadd.f32 %v9266_v63, %v8539_v10 }
0x18a5   :  { %v9268_v27 = vpop.f32.mrf.mxu0 }
0x18a6   :  { %v9269_v29 = vadd.f32 %v9268_v27, %v9267_v25  ;;  %v5087_v2 = vmax.f32 %v5073_v28, 0.0  ;;  %v10300_v28 = vld [vmem:[#allocation2 + $0x510] sm:$0xff]  }
0x18a7   :  { %v9270_v31 = vpop.f32.mrf.mxu0 }
0x18a8   :  { %v5076_v32 = vadd.f32 %v9269_v29, %v8539_v10  ;;  %v10301_v29 = vld [vmem:[#allocation2 + $0x548] sm:$0xff]  }
0x18a9   :  { %v9271_v35 = vpop.f32.mrf.mxu0 }
0x18aa   :  { %v5088_v9 = vmax.f32 %v5076_v32, 0.0  ;;  %v9272_v5 = vadd.f32 %v9271_v35, %v9270_v31  ;;  %v10302_v31 = vld [vmem:[#allocation2 + $0x508] sm:$0xff]   ;;  %v10303_v32 = vld [vmem:[#allocation2 + $0x540] sm:$0xff]  }
0x18ab   :  { %v9273_v11 = vpop.f32.mrf.mxu0  ;;  %v10304_v35 = vld [vmem:[#allocation2 + $0x500] sm:$0xff]  }
0x18ac   :  { %v5108_v12 = vpack.c.bf16 %v5088_v9, %v5087_v2  ;;  %v5081_v50 = vadd.f32 %v9272_v5, %v8539_v10  ;;  %v10305_v2 = vld [vmem:[#allocation4 + $0x4b8] sm:$0xff]   ;;  %v10306_v9 = vld [vmem:[#allocation4 + $0x4b0] sm:$0xff]   ;;  %v10307_v5 = vld [vmem:[#allocation4 + $0x4a8] sm:$0xff]  }
0x18ad   :  { %v9274_v53 = vpop.f32.mrf.mxu0  ;;  %9790 = vmatprep.subr.bf16.mxu0 %v10305_v2 }
0x18ae   :  { %v9275_v18 = vadd.f32 %v9274_v53, %v9273_v11  ;;  %9766 = vmatprep.mubr.bf16.mxu1 %v5108_v12  ;;  %v5089_v26 = vmax.f32 %v5081_v50, 0.0  ;;  %v8565_v12 = vld [vmem:[#allocation9 + $0x11] ss:$0 sm:$0xff] }
0x18b0   :  { %v5084_v33 = vadd.f32 %v9275_v18, %v8539_v10 }
0x18b2   :  { %v5090_v55 = vmax.f32 %v5084_v33, 0.0 }
0x18b4   :  { %v5109_v6 = vpack.c.bf16 %v5090_v55, %v5089_v26 }
0x18b6   :  { %9767 = vmatmul.mubr.bf16.vlgmr.msra.gmra.mxu1 %v5109_v6 }
0x18b7   :  { %9297 = vmatpush3.bf16.msra.mxu1 %v10290_v24 }
0x18b8   :  { %9298 = vmatprep.subr.bf16.mxu1 %v10291_v22 }
0x18bb   :  { %9299 = vmatpush3.bf16.msra.mxu1 %v10292_v34 }
0x18bc   :  { %9300 = vmatprep.subr.bf16.mxu1 %v10293_v37 }
0x18bf   :  { %9301 = vmatpush3.bf16.msra.mxu1 %v10294_v39 }
0x18c0   :  { %9302 = vmatprep.subr.bf16.mxu1 %v10295_v23 }
0x18c3   :  { %9303 = vmatpush3.bf16.msra.mxu1 %v10296_v8  ;;  %v10310_v8 = vld [vmem:[#allocation4 + $0x490] sm:$0xff]  }
0x1976   :  { %v9768_v16 = vpop.f32.mrf.mxu1 }
0x1977   :  { %v5209_v49 = vadd.f32 %v9768_v16, %v8556_v1 }
0x1978   :  { %v5200_v44 = vpop.f32.mrf.mxu1 }
0x1979   :  { %v5201_v48 = vadd.f32 %v8556_v1, %v5200_v44  ;;  %v11694_v63 = vadd.f32 %v5209_v49, %v4751_v3  ;;  %v10299_v3 = vld [vmem:[#allocation2 + $0x550] sm:$0xff]  }
0x197a   :  { %v9769_v21 = vpop.f32.mrf.mxu1 }
0x197b   :  { %v5212_v14 = vadd.f32 %v9769_v21, %v8556_v1  ;;  %v11686_v58 = vadd.f32 %v5201_v48, %v4749_v13  ;;  %v5221_v13 = vmax.f32 %v11694_v63, 0.0 }
0x197c   :  { %v5203_v20 = vpop.f32.mrf.mxu1 }
0x197d   :  { %v11690_v57 = vadd.f32 %v5212_v14, %v4752_v60  ;;  %v5204_v62 = vadd.f32 %v8556_v1, %v5203_v20  ;;  %v5219_v27 = vmax.f32 %v11686_v58, 0.0  ;;  %v10297_v60 = vld [vmem:[#allocation2 + $0x558] sm:$0xff]  }
0x197e   :  { %9304 = vmatprep.subr.bf16.mxu1 %v10297_v60  ;;  %v10311_v60 = vld [vmem:[#allocation4 + $0x488] sm:$0xff]  }
0x197f   :  { %v11698_v10 = vadd.f32 %v5204_v62, %v4750_v41  ;;  %v5222_v25 = vmax.f32 %v11690_v57, 0.0  ;;  %v10298_v41 = vld [vmem:[#allocation2 + $0x518] sm:$0xff]  }
0x1980   :  { %9305 = vmatpush3.bf16.msra.mxu1 %v10298_v41  ;;  %v10312_v41 = vld [vmem:[#allocation4 + $0x480] sm:$0xff]  }
0x1981   :  { %v5220_v7 = vmax.f32 %v11698_v10, 0.0  ;;  %v5241_v61 = vpack.c.bf16 %v5222_v25, %v5221_v13  ;;  %9306 = vmatprep.subr.bf16.mxu1 %v10299_v3  ;;  %v10313_v3 = vld [vmem:[#allocation4 + $0x4f8] sm:$0xff]   ;;  %v10328_v10 = vld [vmem:[#allocation2 + $0x5a0] sm:$0xff]  }
0x1983   :  { %v5240_v17 = vpack.c.bf16 %v5220_v7, %v5219_v27 }
0x1984   :  { %9307 = vmatpush3.bf16.msra.mxu1 %v10300_v28  ;;  %v10314_v28 = vld [vmem:[#allocation4 + $0x4f0] sm:$0xff]  }
0x1985   :  { %9786 = vmatprep.mubr.bf16.mxu0 %v5240_v17  ;;  %9308 = vmatprep.subr.bf16.mxu1 %v10301_v29  ;;  %v10308_v17 = vld [vmem:[#allocation4 + $0x4a0] sm:$0xff]   ;;  %v10315_v29 = vld [vmem:[#allocation4 + $0x4e8] sm:$0xff]  }
0x1986   :  { %9787 = vmatmul.mubr.bf16.vlgmr.msra.gmra.mxu0 %v5241_v61  ;;  %v10309_v61 = vld [vmem:[#allocation4 + $0x498] sm:$0xff]  }
0x1987   :  { %9791 = vmatpush3.bf16.msra.mxu0 %v10305_v2 }
0x1988   :  { %9309 = vmatpush3.bf16.msra.mxu1 %v10302_v31  ;;  %9792 = vmatprep.subr.bf16.mxu0 %v10306_v9  ;;  %v10316_v31 = vld [vmem:[#allocation4 + $0x4e0] sm:$0xff]  }
0x1989   :  { %9310 = vmatprep.subr.bf16.mxu1 %v10303_v32 }
0x198b   :  { %9793 = vmatpush3.bf16.msra.mxu0 %v10306_v9  ;;  %v8574_v9 = vld [vmem:[#allocation7 + $0xa] ss:$0 sm:$0xff] }
0x198c   :  { %9311 = vmatpush3.bf16.msra.mxu1 %v10304_v35  ;;  %9794 = vmatprep.subr.bf16.mxu0 %v10307_v5 }
0x198d   :  { %9810 = vmatprep.subr.bf16.mxu1 %v10313_v3 }
0x198f   :  { %9795 = vmatpush3.bf16.msra.mxu0 %v10307_v5 }
0x1990   :  { %9796 = vmatprep.subr.bf16.mxu0 %v10308_v17 }
0x1993   :  { %9797 = vmatpush3.bf16.msra.mxu0 %v10308_v17 }
0x1994   :  { %9798 = vmatprep.subr.bf16.mxu0 %v10309_v61 }
0x1997   :  { %9799 = vmatpush3.bf16.msra.mxu0 %v10309_v61  ;;  %v8591_v61 = vld [vmem:[#allocation9 + $0x12] ss:$0 sm:$0xff] }
0x1998   :  { %9800 = vmatprep.subr.bf16.mxu0 %v10310_v8 }
0x199b   :  { %9801 = vmatpush3.bf16.msra.mxu0 %v10310_v8 }
0x199c   :  { %9802 = vmatprep.subr.bf16.mxu0 %v10311_v60 }
0x199f   :  { %9803 = vmatpush3.bf16.msra.mxu0 %v10311_v60 }
0x19a0   :  { %9804 = vmatprep.subr.bf16.mxu0 %v10312_v41 }
0x19a3   :  { %9805 = vmatpush3.bf16.msra.mxu0 %v10312_v41 }
0x1a46   :  { %v9788_v11 = vpop.f32.mrf.mxu0 }
0x1a47   :  { %v5341_v50 = vadd.f32 %v9788_v11, %v8565_v12 }
0x1a48   :  { %v5332_v53 = vpop.f32.mrf.mxu0 }
0x1a49   :  { %v5333_v18 = vadd.f32 %v8565_v12, %v5332_v53  ;;  %v5349_v40 = vmax.f32 %v5341_v50, 0.0 }
0x1a4a   :  { %v9789_v33 = vpop.f32.mrf.mxu0 }
0x1a4b   :  { %v5347_v26 = vmax.f32 %v5333_v18, 0.0  ;;  %v5344_v55 = vadd.f32 %v9789_v33, %v8565_v12  ;;  %v5388_v22 = vrot.slane %v5349_v40, 4 }
0x1a4c   :  { %v5335_v6 = vpop.f32.mrf.mxu0 }
0x1a4d   :  { %v5350_v43 = vmax.f32 %v5344_v55, 0.0  ;;  %v5336_v38 = vadd.f32 %v8565_v12, %v5335_v6  ;;  %v5386_v59 = vrot.slane %v5347_v26, 4 }
0x1a4f   :  { %v5389_v4 = vrot.slane %v5350_v43, 4  ;;  %v5348_v24 = vmax.f32 %v5336_v38, 0.0 }
0x1a51   :  { %v5393_v34 = vsel %vm4449_vm14, %v5389_v4, %v5386_v59  ;;  %v5387_v37 = vrot.slane %v5348_v24, 4  ;;  %v5390_v21 = vsel %vm4449_vm14, %v5388_v22, %v5389_v4 }
0x1a52   :  { %v5394_v39 = vmul.f32 %v11620_v54, %v5393_v34  ;;  %v5401_v44 = vmul.f32 %v11623_v15, %v5393_v34 }
0x1a53   :  { %v5391_v23 = vsel %vm4449_vm14, %v5387_v37, %v5388_v22  ;;  %v5392_v16 = vsel %vm4449_vm14, %v5386_v59, %v5387_v37 }
0x1a54   :  { %v5399_v1 = vmul.f32 %v11628_v19, %v5391_v23  ;;  %v5402_v49 = vpack.c.bf16 %v5392_v16, %v5394_v39  ;;  %v5405_v14 = vpack.c.bf16 %v5401_v44, %v5390_v21  ;;  %v5396_v20 = vmul.f32 %v11641_v56, %v5391_v23  ;;  %v10317_v39 = vld [vmem:[#allocation4 + $0x4d8] sm:$0xff]   ;;  %v10318_v23 = vld [vmem:[#allocation4 + $0x4d0] sm:$0xff]  }
0x1a55   :  { %v10321_v44 = vld [vmem:[#allocation2 + $0x5f8] sm:$0xff]  }
0x1a56   :  { %v5403_v48 = vpack.c.bf16 %v5399_v1, %v5392_v16  ;;  %v5404_v62 = vpack.c.bf16 %v5390_v21, %v5396_v20  ;;  %v10319_v16 = vld [vmem:[#allocation4 + $0x4c8] sm:$0xff]   ;;  %v10320_v1 = vld [vmem:[#allocation4 + $0x4c0] sm:$0xff]   ;;  %9344 = vmatprep.subr.bf16.mxu0 %v10321_v44  ;;  %v10324_v21 = vld [vmem:[#allocation2 + $0x5b0] sm:$0xff]  }
0x1a57   :  { %v10326_v20 = vld [vmem:[#allocation2 + $0x5a8] sm:$0xff]  }
0x1a58   :  { %5540 = vmatprep.mubr.bf16.mxu1 %v5403_v48  ;;  %v10322_v48 = vld [vmem:[#allocation2 + $0x5b8] sm:$0xff]  }
0x1a59   :  { %5541 = vmatmul.mubr.bf16.vlgmr.msra.gmra.mxu1 %v5402_v49  ;;  %v10323_v49 = vld [vmem:[#allocation2 + $0x5f0] sm:$0xff]  }
0x1a5a   :  { %5548 = vmatprep.mubr.bf16.mxu1 %v5405_v14  ;;  %9811 = vmatpush3.bf16.msra.mxu1 %v10313_v3  ;;  %v10325_v14 = vld [vmem:[#allocation2 + $0x5e8] sm:$0xff]  }
0x1a5b   :  { %9812 = vmatprep.subr.bf16.mxu1 %v10314_v28 }
0x1a5e   :  { %9813 = vmatpush3.bf16.msra.mxu1 %v10314_v28 }
0x1a5f   :  { %9814 = vmatprep.subr.bf16.mxu1 %v10315_v29 }
0x1a61   :  { %5549 = vmatmul.mubr.bf16.gmra.mxu1 %v5404_v62  ;;  %v10327_v62 = vld [vmem:[#allocation2 + $0x5e0] sm:$0xff]  }
0x1a62   :  { %9815 = vmatpush3.bf16.msra.mxu1 %v10315_v29 }
0x1a63   :  { %9816 = vmatprep.subr.bf16.mxu1 %v10316_v31 }
0x1a66   :  { %9817 = vmatpush3.bf16.msra.mxu1 %v10316_v31 }
0x1a67   :  { %9818 = vmatprep.subr.bf16.mxu1 %v10317_v39 }
0x1a6a   :  { %9819 = vmatpush3.bf16.msra.mxu1 %v10317_v39 }
0x1a6b   :  { %9820 = vmatprep.subr.bf16.mxu1 %v10318_v23 }
0x1a6e   :  { %9821 = vmatpush3.bf16.msra.mxu1 %v10318_v23 }
0x1a6f   :  { %9822 = vmatprep.subr.bf16.mxu1 %v10319_v16 }
0x1a72   :  { %9823 = vmatpush3.bf16.msra.mxu1 %v10319_v16 }
0x1a73   :  { %9824 = vmatprep.subr.bf16.mxu1 %v10320_v1 }
0x1a76   :  { %9825 = vmatpush3.bf16.msra.mxu1 %v10320_v1 }
0x1b19   :  { %v9312_v32 = vpop.f32.mrf.mxu1 }
0x1b1b   :  { %v9313_v35 = vpop.f32.mrf.mxu1 }
0x1b1c   :  { %v9314_v2 = vadd.f32 %v9313_v35, %v9312_v32 }
0x1b1d   :  { %v9315_v5 = vpop.f32.mrf.mxu1 }
0x1b1e   :  { %v5543_v12 = vadd.f32 %v9314_v2, %v8574_v9 }
0x1b1f   :  { %v9316_v11 = vpop.f32.mrf.mxu1 }
0x1b20   :  { %v9317_v53 = vadd.f32 %v9316_v11, %v9315_v5  ;;  %v5557_v26 = vmax.f32 %v5543_v12, 0.0  ;;  %v10332_v12 = vld [vmem:[#allocation2 + $0x590] sm:$0xff]  }
0x1b21   :  { %v9318_v50 = vpop.f32.mrf.mxu1 }
0x1b22   :  { %v5546_v18 = vadd.f32 %v9317_v53, %v8574_v9  ;;  %v10333_v53 = vld [vmem:[#allocation2 + $0x5c8] sm:$0xff]  }
0x1b23   :  { %v9319_v33 = vpop.f32.mrf.mxu1 }
0x1b24   :  { %v5558_v55 = vmax.f32 %v5546_v18, 0.0  ;;  %v9320_v6 = vadd.f32 %v9319_v33, %v9318_v50  ;;  %v10334_v50 = vld [vmem:[#allocation2 + $0x588] sm:$0xff]   ;;  %v10335_v18 = vld [vmem:[#allocation2 + $0x5c0] sm:$0xff]  }
0x1b25   :  { %v9321_v40 = vpop.f32.mrf.mxu1  ;;  %v10336_v33 = vld [vmem:[#allocation2 + $0x580] sm:$0xff]  }
0x1b26   :  { %v5578_v43 = vpack.c.bf16 %v5558_v55, %v5557_v26  ;;  %v5551_v59 = vadd.f32 %v9320_v6, %v8574_v9  ;;  %v10337_v26 = vld [vmem:[#allocation4 + $0x538] sm:$0xff]   ;;  %v10338_v55 = vld [vmem:[#allocation4 + $0x530] sm:$0xff]   ;;  %v10339_v6 = vld [vmem:[#allocation4 + $0x528] sm:$0xff]  }
0x1b27   :  { %v9322_v38 = vpop.f32.mrf.mxu1  ;;  %9830 = vmatprep.subr.bf16.mxu1 %v10337_v26 }
0x1b28   :  { %v9323_v4 = vadd.f32 %v9322_v38, %v9321_v40  ;;  %9806 = vmatprep.mubr.bf16.mxu0 %v5578_v43  ;;  %v5559_v22 = vmax.f32 %v5551_v59, 0.0  ;;  %v8600_v43 = vld [vmem:[#allocation9 + $0x13] ss:$0 sm:$0xff] }
0x1b2a   :  { %v5554_v24 = vadd.f32 %v9323_v4, %v8574_v9 }
0x1b2c   :  { %v5560_v34 = vmax.f32 %v5554_v24, 0.0 }
0x1b2e   :  { %v5579_v37 = vpack.c.bf16 %v5560_v34, %v5559_v22 }
0x1b30   :  { %9807 = vmatmul.mubr.bf16.vlgmr.msra.gmra.mxu0 %v5579_v37 }
0x1b31   :  { %9345 = vmatpush3.bf16.msra.mxu0 %v10322_v48 }
0x1b32   :  { %9346 = vmatprep.subr.bf16.mxu0 %v10323_v49 }
0x1b35   :  { %9347 = vmatpush3.bf16.msra.mxu0 %v10324_v21 }
0x1b36   :  { %9348 = vmatprep.subr.bf16.mxu0 %v10325_v14 }
0x1b39   :  { %9349 = vmatpush3.bf16.msra.mxu0 %v10326_v20 }
0x1b3a   :  { %9350 = vmatprep.subr.bf16.mxu0 %v10327_v62 }
0x1b3d   :  { %9351 = vmatpush3.bf16.msra.mxu0 %v10328_v10  ;;  %v10342_v10 = vld [vmem:[#allocation4 + $0x510] sm:$0xff]  }
0x1bf0   :  { %v9808_v17 = vpop.f32.mrf.mxu0 }
0x1bf1   :  { %v5679_v41 = vadd.f32 %v9808_v17, %v8591_v61 }
0x1bf2   :  { %v5670_v8 = vpop.f32.mrf.mxu0 }
0x1bf3   :  { %v5671_v60 = vadd.f32 %v8591_v61, %v5670_v8  ;;  %v11734_v2 = vadd.f32 %v5679_v41, %v5221_v13  ;;  %v10331_v13 = vld [vmem:[#allocation2 + $0x5d0] sm:$0xff]  }
0x1bf4   :  { %v9809_v3 = vpop.f32.mrf.mxu0 }
0x1bf5   :  { %v5682_v28 = vadd.f32 %v9809_v3, %v8591_v61  ;;  %v11726_v31 = vadd.f32 %v5671_v60, %v5219_v27  ;;  %v5691_v27 = vmax.f32 %v11734_v2, 0.0 }
0x1bf6   :  { %v5673_v29 = vpop.f32.mrf.mxu0 }
0x1bf7   :  { %v11730_v32 = vadd.f32 %v5682_v28, %v5222_v25  ;;  %v5674_v35 = vadd.f32 %v8591_v61, %v5673_v29  ;;  %v5689_v11 = vmax.f32 %v11726_v31, 0.0  ;;  %v10329_v25 = vld [vmem:[#allocation2 + $0x5d8] sm:$0xff]  }
0x1bf8   :  { %9352 = vmatprep.subr.bf16.mxu0 %v10329_v25  ;;  %v10343_v25 = vld [vmem:[#allocation4 + $0x508] sm:$0xff]  }
0x1bf9   :  { %v11738_v9 = vadd.f32 %v5674_v35, %v5220_v7  ;;  %v5692_v5 = vmax.f32 %v11730_v32, 0.0  ;;  %v10330_v7 = vld [vmem:[#allocation2 + $0x598] sm:$0xff]  }
0x1bfa   :  { %9353 = vmatpush3.bf16.msra.mxu0 %v10330_v7  ;;  %v10344_v7 = vld [vmem:[#allocation4 + $0x500] sm:$0xff]  }
0x1bfb   :  { %v5690_v58 = vmax.f32 %v11738_v9, 0.0  ;;  %v5711_v63 = vpack.c.bf16 %v5692_v5, %v5691_v27  ;;  %9354 = vmatprep.subr.bf16.mxu0 %v10331_v13  ;;  %v10345_v13 = vld [vmem:[#allocation4 + $0x578] sm:$0xff]   ;;  %v10360_v9 = vld [vmem:[#allocation2 + $0x620] sm:$0xff]  }
0x1bfd   :  { %v5710_v57 = vpack.c.bf16 %v5690_v58, %v5689_v11 }
0x1bfe   :  { %9355 = vmatpush3.bf16.msra.mxu0 %v10332_v12  ;;  %v10346_v12 = vld [vmem:[#allocation4 + $0x570] sm:$0xff]  }
0x1bff   :  { %9826 = vmatprep.mubr.bf16.mxu1 %v5710_v57  ;;  %9356 = vmatprep.subr.bf16.mxu0 %v10333_v53  ;;  %v10340_v57 = vld [vmem:[#allocation4 + $0x520] sm:$0xff]   ;;  %v10347_v53 = vld [vmem:[#allocation4 + $0x568] sm:$0xff]  }
0x1c00   :  { %9827 = vmatmul.mubr.bf16.vlgmr.msra.gmra.mxu1 %v5711_v63  ;;  %v10341_v63 = vld [vmem:[#allocation4 + $0x518] sm:$0xff]  }
0x1c01   :  { %9831 = vmatpush3.bf16.msra.mxu1 %v10337_v26 }
0x1c02   :  { %9357 = vmatpush3.bf16.msra.mxu0 %v10334_v50  ;;  %9832 = vmatprep.subr.bf16.mxu1 %v10338_v55  ;;  %v10348_v50 = vld [vmem:[#allocation4 + $0x560] sm:$0xff]  }
0x1c03   :  { %9358 = vmatprep.subr.bf16.mxu0 %v10335_v18 }
0x1c05   :  { %9833 = vmatpush3.bf16.msra.mxu1 %v10338_v55  ;;  %v8609_v55 = vld [vmem:[#allocation7 + $0xb] ss:$0 sm:$0xff] }
0x1c06   :  { %9359 = vmatpush3.bf16.msra.mxu0 %v10336_v33  ;;  %9834 = vmatprep.subr.bf16.mxu1 %v10339_v6 }
0x1c07   :  { %9850 = vmatprep.subr.bf16.mxu0 %v10345_v13 }
0x1c09   :  { %9835 = vmatpush3.bf16.msra.mxu1 %v10339_v6 }
0x1c0a   :  { %9836 = vmatprep.subr.bf16.mxu1 %v10340_v57 }
0x1c0d   :  { %9837 = vmatpush3.bf16.msra.mxu1 %v10340_v57 }
0x1c0e   :  { %9838 = vmatprep.subr.bf16.mxu1 %v10341_v63 }
0x1c11   :  { %9839 = vmatpush3.bf16.msra.mxu1 %v10341_v63  ;;  %v8626_v63 = vld [vmem:[#allocation9 + $0x14] ss:$0 sm:$0xff] }
0x1c12   :  { %9840 = vmatprep.subr.bf16.mxu1 %v10342_v10 }
0x1c15   :  { %9841 = vmatpush3.bf16.msra.mxu1 %v10342_v10 }
0x1c16   :  { %9842 = vmatprep.subr.bf16.mxu1 %v10343_v25 }
0x1c19   :  { %9843 = vmatpush3.bf16.msra.mxu1 %v10343_v25 }
0x1c1a   :  { %9844 = vmatprep.subr.bf16.mxu1 %v10344_v7 }
0x1c1d   :  { %9845 = vmatpush3.bf16.msra.mxu1 %v10344_v7 }
0x1cc0   :  { %v9828_v40 = vpop.f32.mrf.mxu1 }
0x1cc1   :  { %v5811_v59 = vadd.f32 %v9828_v40, %v8600_v43 }
0x1cc2   :  { %v5802_v38 = vpop.f32.mrf.mxu1 }
0x1cc3   :  { %v5803_v4 = vadd.f32 %v8600_v43, %v5802_v38  ;;  %v5819_v39 = vmax.f32 %v5811_v59, 0.0 }
0x1cc4   :  { %v9829_v24 = vpop.f32.mrf.mxu1 }
0x1cc5   :  { %v5817_v22 = vmax.f32 %v5803_v4, 0.0  ;;  %v5814_v34 = vadd.f32 %v9829_v24, %v8600_v43  ;;  %v5858_v49 = vrot.slane %v5819_v39, 4 }
0x1cc6   :  { %v5805_v37 = vpop.f32.mrf.mxu1 }
0x1cc7   :  { %v5820_v23 = vmax.f32 %v5814_v34, 0.0  ;;  %v5806_v16 = vadd.f32 %v8600_v43, %v5805_v37  ;;  %v5856_v1 = vrot.slane %v5817_v22, 4 }
0x1cc9   :  { %v5859_v44 = vrot.slane %v5820_v23, 4  ;;  %v5818_v48 = vmax.f32 %v5806_v16, 0.0 }
0x1ccb   :  { %v5863_v21 = vsel %vm4449_vm14, %v5859_v44, %v5856_v1  ;;  %v5857_v14 = vrot.slane %v5818_v48, 4  ;;  %v5860_v3 = vsel %vm4449_vm14, %v5858_v49, %v5859_v44 }
0x1ccc   :  { %v5864_v20 = vmul.f32 %v11620_v54, %v5863_v21  ;;  %v5871_v8 = vmul.f32 %v11623_v15, %v5863_v21 }
0x1ccd   :  { %v5861_v62 = vsel %vm4449_vm14, %v5857_v14, %v5858_v49  ;;  %v5862_v17 = vsel %vm4449_vm14, %v5856_v1, %v5857_v14 }
0x1cce   :  { %v5869_v61 = vmul.f32 %v11628_v19, %v5861_v62  ;;  %v5872_v41 = vpack.c.bf16 %v5862_v17, %v5864_v20  ;;  %v5875_v28 = vpack.c.bf16 %v5871_v8, %v5860_v3  ;;  %v5866_v29 = vmul.f32 %v11641_v56, %v5861_v62  ;;  %v10349_v20 = vld [vmem:[#allocation4 + $0x558] sm:$0xff]   ;;  %v10350_v62 = vld [vmem:[#allocation4 + $0x550] sm:$0xff]  }
0x1ccf   :  { %v10353_v8 = vld [vmem:[#allocation2 + $0x678] sm:$0xff]  }
0x1cd0   :  { %v5873_v60 = vpack.c.bf16 %v5869_v61, %v5862_v17  ;;  %v5874_v35 = vpack.c.bf16 %v5860_v3, %v5866_v29  ;;  %v10351_v17 = vld [vmem:[#allocation4 + $0x548] sm:$0xff]   ;;  %v10352_v61 = vld [vmem:[#allocation4 + $0x540] sm:$0xff]   ;;  %9392 = vmatprep.subr.bf16.mxu1 %v10353_v8  ;;  %v10356_v3 = vld [vmem:[#allocation2 + $0x630] sm:$0xff]  }
0x1cd1   :  { %v10358_v29 = vld [vmem:[#allocation2 + $0x628] sm:$0xff]  }
0x1cd2   :  { %6010 = vmatprep.mubr.bf16.mxu0 %v5873_v60  ;;  %v10354_v60 = vld [vmem:[#allocation2 + $0x638] sm:$0xff]  }
0x1cd3   :  { %6011 = vmatmul.mubr.bf16.vlgmr.msra.gmra.mxu0 %v5872_v41  ;;  %v10355_v41 = vld [vmem:[#allocation2 + $0x670] sm:$0xff]  }
0x1cd4   :  { %6018 = vmatprep.mubr.bf16.mxu0 %v5875_v28  ;;  %9851 = vmatpush3.bf16.msra.mxu0 %v10345_v13  ;;  %v10357_v28 = vld [vmem:[#allocation2 + $0x668] sm:$0xff]  }
0x1cd5   :  { %9852 = vmatprep.subr.bf16.mxu0 %v10346_v12 }
0x1cd8   :  { %9853 = vmatpush3.bf16.msra.mxu0 %v10346_v12 }
0x1cd9   :  { %9854 = vmatprep.subr.bf16.mxu0 %v10347_v53 }
0x1cdb   :  { %6019 = vmatmul.mubr.bf16.gmra.mxu0 %v5874_v35  ;;  %v10359_v35 = vld [vmem:[#allocation2 + $0x660] sm:$0xff]  }
0x1cdc   :  { %9855 = vmatpush3.bf16.msra.mxu0 %v10347_v53 }
0x1cdd   :  { %9856 = vmatprep.subr.bf16.mxu0 %v10348_v50 }
0x1ce0   :  { %9857 = vmatpush3.bf16.msra.mxu0 %v10348_v50 }
0x1ce1   :  { %9858 = vmatprep.subr.bf16.mxu0 %v10349_v20 }
0x1ce4   :  { %9859 = vmatpush3.bf16.msra.mxu0 %v10349_v20 }
0x1ce5   :  { %9860 = vmatprep.subr.bf16.mxu0 %v10350_v62 }
0x1ce8   :  { %9861 = vmatpush3.bf16.msra.mxu0 %v10350_v62 }
0x1ce9   :  { %9862 = vmatprep.subr.bf16.mxu0 %v10351_v17 }
0x1cec   :  { %9863 = vmatpush3.bf16.msra.mxu0 %v10351_v17 }
0x1ced   :  { %9864 = vmatprep.subr.bf16.mxu0 %v10352_v61 }
0x1cf0   :  { %9865 = vmatpush3.bf16.msra.mxu0 %v10352_v61 }
0x1d93   :  { %v9360_v18 = vpop.f32.mrf.mxu0 }
0x1d95   :  { %v9361_v33 = vpop.f32.mrf.mxu0 }
0x1d96   :  { %v9362_v26 = vadd.f32 %v9361_v33, %v9360_v18 }
0x1d97   :  { %v9363_v6 = vpop.f32.mrf.mxu0 }
0x1d98   :  { %v6013_v43 = vadd.f32 %v9362_v26, %v8609_v55 }
0x1d99   :  { %v9364_v40 = vpop.f32.mrf.mxu0 }
0x1d9a   :  { %v9365_v38 = vadd.f32 %v9364_v40, %v9363_v6  ;;  %v6027_v22 = vmax.f32 %v6013_v43, 0.0  ;;  %v10364_v43 = vld [vmem:[#allocation2 + $0x610] sm:$0xff]  }
0x1d9b   :  { %v9366_v59 = vpop.f32.mrf.mxu0 }
0x1d9c   :  { %v6016_v4 = vadd.f32 %v9365_v38, %v8609_v55  ;;  %v10365_v38 = vld [vmem:[#allocation2 + $0x648] sm:$0xff]  }
0x1d9d   :  { %v9367_v24 = vpop.f32.mrf.mxu0 }
0x1d9e   :  { %v6028_v34 = vmax.f32 %v6016_v4, 0.0  ;;  %v9368_v37 = vadd.f32 %v9367_v24, %v9366_v59  ;;  %v10366_v59 = vld [vmem:[#allocation2 + $0x608] sm:$0xff]   ;;  %v10367_v4 = vld [vmem:[#allocation2 + $0x640] sm:$0xff]  }
0x1d9f   :  { %v9369_v39 = vpop.f32.mrf.mxu0  ;;  %v10368_v24 = vld [vmem:[#allocation2 + $0x600] sm:$0xff]  }
0x1da0   :  { %v6048_v23 = vpack.c.bf16 %v6028_v34, %v6027_v22  ;;  %v6021_v1 = vadd.f32 %v9368_v37, %v8609_v55  ;;  %v10369_v22 = vld [vmem:[#allocation4 + $0x5b8] sm:$0xff]   ;;  %v10370_v34 = vld [vmem:[#allocation4 + $0x5b0] sm:$0xff]   ;;  %v10371_v37 = vld [vmem:[#allocation4 + $0x5a8] sm:$0xff]  }
0x1da1   :  { %v9370_v16 = vpop.f32.mrf.mxu0  ;;  %9870 = vmatprep.subr.bf16.mxu0 %v10369_v22 }
0x1da2   :  { %v9371_v44 = vadd.f32 %v9370_v16, %v9369_v39  ;;  %9846 = vmatprep.mubr.bf16.mxu1 %v6048_v23  ;;  %v6029_v49 = vmax.f32 %v6021_v1, 0.0  ;;  %v8635_v23 = vld [vmem:[#allocation9 + $0x15] ss:$0 sm:$0xff] }
0x1da4   :  { %v6024_v48 = vadd.f32 %v9371_v44, %v8609_v55 }
0x1da6   :  { %v6030_v21 = vmax.f32 %v6024_v48, 0.0 }
0x1da8   :  { %v6049_v14 = vpack.c.bf16 %v6030_v21, %v6029_v49 }
0x1daa   :  { %9847 = vmatmul.mubr.bf16.vlgmr.msra.gmra.mxu1 %v6049_v14 }
0x1dab   :  { %9393 = vmatpush3.bf16.msra.mxu1 %v10354_v60 }
0x1dac   :  { %9394 = vmatprep.subr.bf16.mxu1 %v10355_v41 }
0x1daf   :  { %9395 = vmatpush3.bf16.msra.mxu1 %v10356_v3 }
0x1db0   :  { %9396 = vmatprep.subr.bf16.mxu1 %v10357_v28 }
0x1db3   :  { %9397 = vmatpush3.bf16.msra.mxu1 %v10358_v29 }
0x1db4   :  { %9398 = vmatprep.subr.bf16.mxu1 %v10359_v35 }
0x1db7   :  { %9399 = vmatpush3.bf16.msra.mxu1 %v10360_v9  ;;  %v10374_v9 = vld [vmem:[#allocation4 + $0x590] sm:$0xff]  }
0x1e6a   :  { %v9848_v57 = vpop.f32.mrf.mxu1 }
0x1e6b   :  { %v6149_v7 = vadd.f32 %v9848_v57, %v8626_v63 }
0x1e6c   :  { %v6140_v10 = vpop.f32.mrf.mxu1 }
0x1e6d   :  { %v6141_v25 = vadd.f32 %v8626_v63, %v6140_v10  ;;  %v11774_v26 = vadd.f32 %v6149_v7, %v5691_v27  ;;  %v10363_v27 = vld [vmem:[#allocation2 + $0x650] sm:$0xff]  }
0x1e6e   :  { %v9849_v13 = vpop.f32.mrf.mxu1 }
0x1e6f   :  { %v6152_v12 = vadd.f32 %v9849_v13, %v8626_v63  ;;  %v11766_v50 = vadd.f32 %v6141_v25, %v5689_v11  ;;  %v6161_v11 = vmax.f32 %v11774_v26, 0.0  ;;  %v10437_v26 = vld [vmem:[#allocation12 + $0x150] ss:$8 sps:$4 sm:$0xff]  }
0x1e70   :  { %v6143_v53 = vpop.f32.mrf.mxu1 }
0x1e71   :  { %v11770_v18 = vadd.f32 %v6152_v12, %v5692_v5  ;;  %v6144_v33 = vadd.f32 %v8626_v63, %v6143_v53  ;;  %v6159_v40 = vmax.f32 %v11766_v50, 0.0  ;;  %v10361_v5 = vld [vmem:[#allocation2 + $0x658] sm:$0xff]  }
0x1e72   :  { %9400 = vmatprep.subr.bf16.mxu1 %v10361_v5  ;;  %v10375_v5 = vld [vmem:[#allocation4 + $0x588] sm:$0xff]  }
0x1e73   :  { %v11778_v55 = vadd.f32 %v6144_v33, %v5690_v58  ;;  %v6162_v6 = vmax.f32 %v11770_v18, 0.0  ;;  %v10362_v58 = vld [vmem:[#allocation2 + $0x618] sm:$0xff]   ;;  %v10434_v18 = vld [vmem:[#allocation12 + $0x60] ss:$8 sps:$4 sm:$0xff]  }
0x1e74   :  { %9401 = vmatpush3.bf16.msra.mxu1 %v10362_v58  ;;  %v10376_v58 = vld [vmem:[#allocation4 + $0x580] sm:$0xff]  }
0x1e75   :  { %v6160_v31 = vmax.f32 %v11778_v55, 0.0  ;;  %v6181_v2 = vpack.c.bf16 %v6162_v6, %v6161_v11  ;;  %9402 = vmatprep.subr.bf16.mxu1 %v10363_v27  ;;  %v10377_v27 = vld [vmem:[#allocation10 + $0xe0] ss:$16 sps:$4 sm:$0xff]  }
0x1e77   :  { %v6180_v32 = vpack.c.bf16 %v6160_v31, %v6159_v40 }
0x1e78   :  { %9403 = vmatpush3.bf16.msra.mxu1 %v10364_v43  ;;  %v10379_v43 = vld [vmem:[#allocation10 + $0xe4] ss:$16 sps:$4 sm:$0xff]  }
0x1e79   :  { %9866 = vmatprep.mubr.bf16.mxu0 %v6180_v32  ;;  %9404 = vmatprep.subr.bf16.mxu1 %v10365_v38  ;;  %v10372_v32 = vld [vmem:[#allocation4 + $0x5a0] sm:$0xff]   ;;  %v10382_v38 = vld [vmem:[#allocation10 + $0xec] ss:$16 sps:$4 sm:$0xff]  }
0x1e7a   :  { %9867 = vmatmul.mubr.bf16.vlgmr.msra.gmra.mxu0 %v6181_v2  ;;  %v10373_v2 = vld [vmem:[#allocation4 + $0x598] sm:$0xff]  }
0x1e7b   :  { %9871 = vmatpush3.bf16.msra.mxu0 %v10369_v22  ;;  %v10389_v22 = vld [vmem:[#allocation10 + $0xa0] ss:$16 sps:$4 sm:$0xff]  }
0x1e7c   :  { %9405 = vmatpush3.bf16.msra.mxu1 %v10366_v59  ;;  %9872 = vmatprep.subr.bf16.mxu0 %v10370_v34  ;;  %v10385_v59 = vld [vmem:[#allocation10 + $0xc4] ss:$16 sps:$4 sm:$0xff]  }
0x1e7d   :  { %9406 = vmatprep.subr.bf16.mxu1 %v10367_v4  ;;  %v10383_v4 = vld [vmem:[#allocation10 + $0xc0] ss:$16 sps:$4 sm:$0xff]  }
0x1e7f   :  { %9873 = vmatpush3.bf16.msra.mxu0 %v10370_v34  ;;  %v10397_v34 = vld [vmem:[#allocation10 + $0x84] ss:$16 sps:$4 sm:$0xff]  }
0x1e80   :  { %9407 = vmatpush3.bf16.msra.mxu1 %v10368_v24  ;;  %9874 = vmatprep.subr.bf16.mxu0 %v10371_v37  ;;  %v10391_v24 = vld [vmem:[#allocation10 + $0xa4] ss:$16 sps:$4 sm:$0xff]  }
0x1e81   :  { %6849 = vmatprep.subr.bf16.mxu1 %v10379_v43  ;;  %v10412_v43 = vld [vmem:[#allocation10 + $0x4c] ss:$16 sps:$4 sm:$0xff]  }
0x1e83   :  { %9875 = vmatpush3.bf16.msra.mxu0 %v10371_v37  ;;  %v10395_v37 = vld [vmem:[#allocation10 + $0x80] ss:$16 sps:$4 sm:$0xff]  }
0x1e84   :  { %9876 = vmatprep.subr.bf16.mxu0 %v10372_v32 }
0x1e87   :  { %9877 = vmatpush3.bf16.msra.mxu0 %v10372_v32  ;;  %v10392_v32 = vld [vmem:[#allocation10 + $0xa8] ss:$16 sps:$4 sm:$0xff]  }
0x1e88   :  { %9878 = vmatprep.subr.bf16.mxu0 %v10373_v2 }
0x1e8b   :  { %9879 = vmatpush3.bf16.msra.mxu0 %v10373_v2  ;;  %v10400_v2 = vld [vmem:[#allocation10 + $0x8c] ss:$16 sps:$4 sm:$0xff]  }
0x1e8c   :  { %9880 = vmatprep.subr.bf16.mxu0 %v10374_v9 }
0x1e8f   :  { %9881 = vmatpush3.bf16.msra.mxu0 %v10374_v9  ;;  %v10398_v9 = vld [vmem:[#allocation10 + $0x88] ss:$16 sps:$4 sm:$0xff]  }
0x1e90   :  { %9882 = vmatprep.subr.bf16.mxu0 %v10375_v5 }
0x1e93   :  { %9883 = vmatpush3.bf16.msra.mxu0 %v10375_v5  ;;  %v10406_v5 = vld [vmem:[#allocation10 + $0x6c] ss:$16 sps:$4 sm:$0xff]  }
0x1e94   :  { %9884 = vmatprep.subr.bf16.mxu0 %v10376_v58 }
0x1e97   :  { %9885 = vmatpush3.bf16.msra.mxu0 %v10376_v58  ;;  %v10404_v58 = vld [vmem:[#allocation10 + $0x68] ss:$16 sps:$4 sm:$0xff]  }
0x1e98   :  { %6902 = vmatprep.subr.bf16.mxu0 %v10382_v38  ;;  %v10407_v38 = vld [vmem:[#allocation10 + $0x40] ss:$16 sps:$4 sm:$0xff]  }
0x1f3a   :  { %v9868_v39 = vpop.f32.mrf.mxu0 }
0x1f3b   :  { %v6281_v1 = vadd.f32 %v9868_v39, %v8635_v23  ;;  %v10403_v39 = vld [vmem:[#allocation10 + $0x64] ss:$16 sps:$4 sm:$0xff]  }
0x1f3c   :  { %v6272_v16 = vpop.f32.mrf.mxu0 }
0x1f3d   :  { %v6273_v44 = vadd.f32 %v8635_v23, %v6272_v16  ;;  %v6289_v20 = vmax.f32 %v6281_v1, 0.0 }
0x1f3e   :  { %v9869_v48 = vpop.f32.mrf.mxu0 }
0x1f3f   :  { %v6287_v49 = vmax.f32 %v6273_v44, 0.0  ;;  %v6284_v21 = vadd.f32 %v9869_v48, %v8635_v23  ;;  %v6328_v41 = vrot.slane %v6289_v20, 4  ;;  %v8644_v48 = vld [vmem:[#allocation7 + $0xc] ss:$0 sm:$0xff] }
0x1f40   :  { %v6275_v14 = vpop.f32.mrf.mxu0 }
0x1f41   :  { %v6290_v62 = vmax.f32 %v6284_v21, 0.0  ;;  %v6276_v17 = vadd.f32 %v8635_v23, %v6275_v14  ;;  %v6326_v61 = vrot.slane %v6287_v49, 4  ;;  %v10401_v23 = vld [vmem:[#allocation10 + $0x60] ss:$16 sps:$4 sm:$0xff]  }
0x1f43   :  { %v6329_v8 = vrot.slane %v6290_v62, 4  ;;  %v6288_v60 = vmax.f32 %v6276_v17, 0.0 }
0x1f45   :  { %v6333_v3 = vsel %vm4449_vm14, %v6329_v8, %v6326_v61  ;;  %v6327_v28 = vrot.slane %v6288_v60, 4  ;;  %v6330_v13 = vsel %vm4449_vm14, %v6328_v41, %v6329_v8 }
0x1f46   :  { %v6334_v29 = vmul.f32 %v11620_v54, %v6333_v3  ;;  %v6341_v10 = vmul.f32 %v11623_v15, %v6333_v3 }
0x1f47   :  { %v6331_v35 = vsel %vm4449_vm14, %v6327_v28, %v6328_v41  ;;  %v6332_v57 = vsel %vm4449_vm14, %v6326_v61, %v6327_v28 }
0x1f48   :  { %v6339_v63 = vmul.f32 %v11628_v19, %v6331_v35  ;;  %v6342_v7 = vpack.c.bf16 %v6332_v57, %v6334_v29  ;;  %v6345_v12 = vpack.c.bf16 %v6341_v10, %v6330_v13  ;;  %v6336_v53 = vmul.f32 %v11641_v56, %v6331_v35 }
0x1f4a   :  { %v6343_v25 = vpack.c.bf16 %v6339_v63, %v6332_v57  ;;  %v6344_v33 = vpack.c.bf16 %v6330_v13, %v6336_v53  ;;  %v10386_v53 = vld [vmem:[#allocation10 + $0xc8] ss:$16 sps:$4 sm:$0xff]  }
0x1f4c   :  { %6480 = vmatprep.mubr.bf16.mxu1 %v6343_v25 }
0x1f4d   :  { %6481 = vmatmul.mubr.bf16.vlgmr.msra.gmra.mxu1 %v6342_v7  ;;  %v10380_v7 = vld [vmem:[#allocation10 + $0xe8] ss:$16 sps:$4 sm:$0xff]  }
0x1f4e   :  { %6488 = vmatprep.mubr.bf16.mxu1 %v6345_v12  ;;  %6850 = vmatpush1.bf16.msra.mxu1 %v10377_v27  ;;  %v10388_v12 = vld [vmem:[#allocation10 + $0xcc] ss:$16 sps:$4 sm:$0xff]   ;;  %v10409_v27 = vld [vmem:[#allocation10 + $0x44] ss:$16 sps:$4 sm:$0xff]  }
0x1f4f   :  { %6851 = vmatprep.subr.bf16.mxu1 %v10385_v59  ;;  %v10410_v59 = vld [vmem:[#allocation10 + $0x48] ss:$16 sps:$4 sm:$0xff]  }
0x1f52   :  { %6852 = vmatpush1.bf16.msra.mxu1 %v10383_v4  ;;  %v10415_v4 = vld [vmem:[#allocation10 + $0x24] ss:$16 sps:$4 sm:$0xff]  }
0x1f53   :  { %6853 = vmatprep.subr.bf16.mxu1 %v10391_v24  ;;  %v10418_v24 = vld [vmem:[#allocation10 + $0x2c] ss:$16 sps:$4 sm:$0xff]  }
0x1f55   :  { %6489 = vmatmul.mubr.bf16.gmra.mxu1 %v6344_v33  ;;  %v10394_v33 = vld [vmem:[#allocation10 + $0xac] ss:$16 sps:$4 sm:$0xff]  }
0x1f56   :  { %6881 = vmatprep.mubr.bf16.mxu1 %v10892_v0  ;;  %6854 = vmatpush1.bf16.msra.mxu1 %v10389_v22  ;;  %v10413_v22 = vld [vmem:[#allocation10 + $0x20] ss:$16 sps:$4 sm:$0xff]  }
0x1f57   :  { %6855 = vmatprep.subr.bf16.mxu1 %v10397_v34  ;;  %v10416_v34 = vld [vmem:[#allocation10 + $0x28] ss:$16 sps:$4 sm:$0xff]  }
0x1f5a   :  { %6856 = vmatpush1.bf16.msra.mxu1 %v10395_v37  ;;  %v10421_v37 = vld [vmem:[#allocation10 + $0x4] ss:$16 sps:$4 sm:$0xff]  }
0x1f5b   :  { %6857 = vmatprep.subr.bf16.mxu1 %v10403_v39  ;;  %v10424_v39 = vld [vmem:[#allocation10 + $0xc] ss:$16 sps:$4 sm:$0xff]  }
0x1f5e   :  { %6858 = vmatpush1.bf16.msra.mxu1 %v10401_v23  ;;  %v10419_v23 = vld [vmem:[#allocation10] ss:$16 sps:$4 sm:$0xff]  }
0x1f5f   :  { %6859 = vmatprep.subr.bf16.mxu1 %v10409_v27  ;;  %v10460_v27 = vld [vmem:[#allocation12 + $0x24] ss:$8 sps:$4 sm:$0xff]  }
0x1f62   :  { %6860 = vmatpush1.bf16.msra.mxu1 %v10407_v38  ;;  %v10458_v38 = vld [vmem:[#allocation12 + $0x20] ss:$8 sps:$4 sm:$0xff]  }
0x1f63   :  { %6861 = vmatprep.subr.bf16.mxu1 %v10415_v4  ;;  %v10466_v4 = vld [vmem:[#allocation12 + $0x14] ss:$8 sps:$4 sm:$0xff]  }
0x1f66   :  { %6862 = vmatpush1.bf16.msra.mxu1 %v10413_v22  ;;  %v10464_v22 = vld [vmem:[#allocation12 + $0x10] ss:$8 sps:$4 sm:$0xff]  }
0x1f67   :  { %6863 = vmatprep.subr.bf16.mxu1 %v10421_v37  ;;  %v10472_v37 = vld [vmem:[#allocation12 + $0x4] ss:$8 sps:$4 sm:$0xff]  }
0x1f6a   :  { %6864 = vmatpush1.bf16.msra.mxu1 %v10419_v23  ;;  %v10470_v23 = vld [vmem:[#allocation12] ss:$8 sps:$4 sm:$0xff]  }
0x200d   :  { %v9408_v16 = vpop.f32.mrf.mxu1 }
0x200f   :  { %v9409_v1 = vpop.f32.mrf.mxu1 }
0x2010   :  { %v9410_v44 = vadd.f32 %v9409_v1, %v9408_v16  ;;  %v10422_v16 = vld [vmem:[#allocation10 + $0x8] ss:$16 sps:$4 sm:$0xff]   ;;  %v10427_v1 = vld [vmem:[#allocation12 + $0x174] ss:$8 sps:$4 sm:$0xff]  }
0x2011   :  { %v9411_v49 = vpop.f32.mrf.mxu1 }
0x2012   :  { %v6483_v14 = vadd.f32 %v9410_v44, %v8644_v48  ;;  %v10430_v44 = vld [vmem:[#allocation12 + $0x74] ss:$8 sps:$4 sm:$0xff]  }
0x2013   :  { %v9412_v21 = vpop.f32.mrf.mxu1  ;;  %7399 = vmatprep.subr.bf16.mxu1 %v10430_v44  ;;  %v10473_v44 = vld [vmem:[#allocation12 + $0x1f0] ss:$8 sps:$4 sm:$0xff]  }
0x2014   :  { %v9413_v20 = vadd.f32 %v9412_v21, %v9411_v49  ;;  %v6497_v8 = vmax.f32 %v6483_v14, 0.0  ;;  %v8661_v49 = vld [vmem:[#allocation9 + $0x16] ss:$0 sm:$0xff] }
0x2015   :  { %v9414_v62 = vpop.f32.mrf.mxu1 }
0x2016   :  { %v6486_v17 = vadd.f32 %v9413_v20, %v8644_v48 }
0x2017   :  { %v9415_v61 = vpop.f32.mrf.mxu1 }
0x2018   :  { %v6498_v60 = vmax.f32 %v6486_v17, 0.0  ;;  %v9416_v41 = vadd.f32 %v9415_v61, %v9414_v62 }
0x2019   :  { %v9417_v3 = vpop.f32.mrf.mxu1 }
0x201a   :  { %v6518_v28 = vpack.c.bf16 %v6498_v60, %v6497_v8  ;;  %v6491_v35 = vadd.f32 %v9416_v41, %v8644_v48 }
0x201b   :  { %v9418_v29 = vpop.f32.mrf.mxu1 }
0x201c   :  { %v9419_v57 = vadd.f32 %v9418_v29, %v9417_v3  ;;  %9886 = vmatprep.mubr.bf16.mxu0 %v6518_v28  ;;  %v6499_v10 = vmax.f32 %v6491_v35, 0.0 }
0x201e   :  { %v6494_v63 = vadd.f32 %v9419_v57, %v8644_v48  ;;  %v10425_v57 = vld [vmem:[#allocation12 + $0x170] ss:$8 sps:$4 sm:$0xff]  }
0x2020   :  { %v6500_v25 = vmax.f32 %v6494_v63, 0.0  ;;  %v10428_v63 = vld [vmem:[#allocation12 + $0x70] ss:$8 sps:$4 sm:$0xff]  }
0x2022   :  { %v6519_v13 = vpack.c.bf16 %v6500_v25, %v6499_v10  ;;  %v10433_v10 = vld [vmem:[#allocation12 + $0x164] ss:$8 sps:$4 sm:$0xff]  }
0x2023   :  { %v10436_v25 = vld [vmem:[#allocation12 + $0x64] ss:$8 sps:$4 sm:$0xff]  }
0x2024   :  { %9887 = vmatmul.mubr.bf16.vlgmr.msra.gmra.mxu0 %v6519_v13 }
0x2025   :  { %6903 = vmatpush1.bf16.msra.mxu0 %v10380_v7  ;;  %6934 = vmatprep.mubr.bf16.mxu0 %v10892_v0 }
0x2026   :  { %6904 = vmatprep.subr.bf16.mxu0 %v10388_v12  ;;  %v10445_v12 = vld [vmem:[#allocation12 + $0x144] ss:$8 sps:$4 sm:$0xff]  }
0x2029   :  { %6905 = vmatpush1.bf16.msra.mxu0 %v10386_v53  ;;  %v10448_v53 = vld [vmem:[#allocation12 + $0x44] ss:$8 sps:$4 sm:$0xff]  }
0x202a   :  { %6906 = vmatprep.subr.bf16.mxu0 %v10394_v33  ;;  %v10446_v33 = vld [vmem:[#allocation12 + $0x40] ss:$8 sps:$4 sm:$0xff]  }
0x202d   :  { %6907 = vmatpush1.bf16.msra.mxu0 %v10392_v32  ;;  %v10451_v32 = vld [vmem:[#allocation12 + $0x134] ss:$8 sps:$4 sm:$0xff]  }
0x202e   :  { %6908 = vmatprep.subr.bf16.mxu0 %v10400_v2  ;;  %v10454_v2 = vld [vmem:[#allocation12 + $0x34] ss:$8 sps:$4 sm:$0xff]  }
0x2031   :  { %6909 = vmatpush1.bf16.msra.mxu0 %v10398_v9  ;;  %v10449_v9 = vld [vmem:[#allocation12 + $0x130] ss:$8 sps:$4 sm:$0xff]  }
0x2032   :  { %6910 = vmatprep.subr.bf16.mxu0 %v10406_v5  ;;  %v10452_v5 = vld [vmem:[#allocation12 + $0x30] ss:$8 sps:$4 sm:$0xff]  }
0x2035   :  { %6911 = vmatpush1.bf16.msra.mxu0 %v10404_v58  ;;  %v10457_v58 = vld [vmem:[#allocation12 + $0x124] ss:$8 sps:$4 sm:$0xff]  }
0x2036   :  { %6912 = vmatprep.subr.bf16.mxu0 %v10412_v43  ;;  %v10455_v43 = vld [vmem:[#allocation12 + $0x120] ss:$8 sps:$4 sm:$0xff]  }
0x2039   :  { %6913 = vmatpush1.bf16.msra.mxu0 %v10410_v59  ;;  %v10463_v59 = vld [vmem:[#allocation12 + $0x114] ss:$8 sps:$4 sm:$0xff]  }
0x203a   :  { %6914 = vmatprep.subr.bf16.mxu0 %v10418_v24  ;;  %v10461_v24 = vld [vmem:[#allocation12 + $0x110] ss:$8 sps:$4 sm:$0xff]  }
0x203d   :  { %6915 = vmatpush1.bf16.msra.mxu0 %v10416_v34  ;;  %v10469_v34 = vld [vmem:[#allocation12 + $0x104] ss:$8 sps:$4 sm:$0xff]  }
0x203e   :  { %6916 = vmatprep.subr.bf16.mxu0 %v10424_v39  ;;  %v10467_v39 = vld [vmem:[#allocation12 + $0x100] ss:$8 sps:$4 sm:$0xff]  }
0x2041   :  { %6917 = vmatpush1.bf16.msra.mxu0 %v10422_v16  ;;  %v10475_v16 = vld [vmem:[#allocation12 + $0x1f4] ss:$8 sps:$4 sm:$0xff]  }
0x2042   :  { %7452 = vmatprep.subr.bf16.mxu0 %v10427_v1  ;;  %v10478_v1 = vld [vmem:[#allocation12 + $0xf4] ss:$8 sps:$4 sm:$0xff]  }
0x20e4   :  { %v9888_v48 = vpop.f32.mrf.mxu0 }
0x20e5   :  { %v6619_v41 = vadd.f32 %v9888_v48, %v8661_v49  ;;  %v10476_v48 = vld [vmem:[#allocation12 + $0xf0] ss:$8 sps:$4 sm:$0xff]  }
0x20e6   :  { %v6610_v21 = vpop.f32.mrf.mxu0 }
0x20e7   :  { %v6611_v14 = vadd.f32 %v8661_v49, %v6610_v21  ;;  %v6627_v50 = vadd.f32 %v6619_v41, %v6161_v11  ;;  %v10440_v11 = vld [vmem:[#allocation12 + $0x50] ss:$8 sps:$4 sm:$0xff]   ;;  %v10484_v21 = vld [vmem:[#allocation12 + $0xe4] ss:$8 sps:$4 sm:$0xff]   ;;  %v10491_v41 = vld [vmem:[#allocation12 + $0x1c0] ss:$8 sps:$4 sm:$0xff]  }
0x20e8   :  { %v9889_v20 = vpop.f32.mrf.mxu0 }
0x20e9   :  { %v6625_v17 = vadd.f32 %v6611_v14, %v6159_v40  ;;  %v6622_v8 = vadd.f32 %v9889_v20, %v8661_v49  ;;  %v10431_v40 = vld [vmem:[#allocation12 + $0x160] ss:$8 sps:$4 sm:$0xff]   ;;  %v6631_v7 = vmax.f32 %v6627_v50, 0.0  ;;  %v10508_v50 = vld [vmem:[#allocation12 + $0xa4] ss:$8 sps:$4 sm:$0xff]  }
0x20ea   :  { %v6613_v62 = vpop.f32.mrf.mxu0  ;;  %v10479_v14 = vld [vmem:[#allocation12 + $0x1e0] ss:$8 sps:$4 sm:$0xff]  }
0x20eb   :  { %v6614_v61 = vadd.f32 %v8661_v49, %v6613_v62  ;;  %v6629_v3 = vmax.f32 %v6625_v17, 0.0  ;;  %v6628_v29 = vadd.f32 %v6622_v8, %v6162_v6  ;;  %v10439_v6 = vld [vmem:[#allocation12 + $0x154] ss:$8 sps:$4 sm:$0xff]   ;;  %v10481_v49 = vld [vmem:[#allocation12 + $0x1e4] ss:$8 sps:$4 sm:$0xff]  }
0x20ec   :  { %v10482_v20 = vld [vmem:[#allocation12 + $0xe0] ss:$8 sps:$4 sm:$0xff]   ;;  %v10487_v62 = vld [vmem:[#allocation12 + $0x1d4] ss:$8 sps:$4 sm:$0xff]   ;;  %v10485_v17 = vld [vmem:[#allocation12 + $0x1d0] ss:$8 sps:$4 sm:$0xff]  }
0x20ed   :  { %v6626_v60 = vadd.f32 %v6614_v61, %v6160_v31  ;;  %v6632_v55 = vmax.f32 %v6628_v29, 0.0  ;;  %v10442_v31 = vld [vmem:[#allocation12 + $0x54] ss:$8 sps:$4 sm:$0xff]   ;;  %v10493_v8 = vld [vmem:[#allocation12 + $0x1c4] ss:$8 sps:$4 sm:$0xff]  }
0x20ee   :  { %v10490_v61 = vld [vmem:[#allocation12 + $0xd4] ss:$8 sps:$4 sm:$0xff]   ;;  %v10494_v29 = vld [vmem:[#allocation12 + $0xc0] ss:$8 sps:$4 sm:$0xff]  }
0x20ef   :  { %v6630_v28 = vmax.f32 %v6626_v60, 0.0  ;;  %v6666_v13 = vpack.c.bf16 %v6632_v55, %v6631_v7  ;;  %v10488_v60 = vld [vmem:[#allocation12 + $0xd0] ss:$8 sps:$4 sm:$0xff]   ;;  %v10511_v55 = vld [vmem:[#allocation12 + $0x194] ss:$8 sps:$4 sm:$0xff]  }
0x20f0   :  { %v10512_v7 = vld [vmem:[#allocation12 + $0x90] ss:$8 sps:$4 sm:$0xff]  }
0x20f1   :  { %v6665_v35 = vpack.c.bf16 %v6630_v28, %v6629_v3  ;;  %v10496_v3 = vld [vmem:[#allocation12 + $0xc4] ss:$8 sps:$4 sm:$0xff]   ;;  %v10499_v28 = vld [vmem:[#allocation12 + $0x1b4] ss:$8 sps:$4 sm:$0xff]  }
0x20f3   :  { %6882 = vmatmul.mubr.bf16.vlgmr.msra.gmra.mxu1 %v6665_v35  ;;  %6935 = vmatmul.mubr.bf16.vlgmr.msra.gmra.mxu0 %v6665_v35  ;;  %v10497_v35 = vld [vmem:[#allocation12 + $0x1b0] ss:$8 sps:$4 sm:$0xff]  }
0x20f4   :  { %6891 = vmatprep.mubr.bf16.mxu1 %v10892_v0  ;;  %6944 = vmatprep.mubr.bf16.mxu0 %v10892_v0  ;;  %v10443_v0 = vld [vmem:[#allocation12 + $0x140] ss:$8 sps:$4 sm:$0xff]  }
0x20f5   :  { %7453 = vmatpush1.bf16.msra.mxu0 %v10425_v57  ;;  %7400 = vmatpush1.bf16.msra.mxu1 %v10428_v63  ;;  %v10502_v57 = vld [vmem:[#allocation12 + $0xb4] ss:$8 sps:$4 sm:$0xff]   ;;  %v10505_v63 = vld [vmem:[#allocation12 + $0x1a4] ss:$8 sps:$4 sm:$0xff]  }
0x20f6   :  { %7454 = vmatprep.subr.bf16.mxu0 %v10433_v10  ;;  %7401 = vmatprep.subr.bf16.mxu1 %v10436_v25  ;;  %v10500_v10 = vld [vmem:[#allocation12 + $0xb0] ss:$8 sps:$4 sm:$0xff]   ;;  %v10503_v25 = vld [vmem:[#allocation12 + $0x1a0] ss:$8 sps:$4 sm:$0xff]  }
0x20f9   :  { %7455 = vmatpush1.bf16.msra.mxu0 %v10431_v40  ;;  %7402 = vmatpush1.bf16.msra.mxu1 %v10434_v18  ;;  %v10506_v40 = vld [vmem:[#allocation12 + $0xa0] ss:$8 sps:$4 sm:$0xff]   ;;  %v10509_v18 = vld [vmem:[#allocation12 + $0x190] ss:$8 sps:$4 sm:$0xff]  }
0x20fa   :  { %7456 = vmatprep.subr.bf16.mxu0 %v10439_v6  ;;  %7403 = vmatprep.subr.bf16.mxu1 %v10442_v31  ;;  %v10514_v6 = vld [vmem:[#allocation12 + $0x94] ss:$8 sps:$4 sm:$0xff]   ;;  %v10517_v31 = vld [vmem:[#allocation12 + $0x184] ss:$8 sps:$4 sm:$0xff]  }
0x20fb   :  { %6892 = vmatmul.mubr.bf16.gmra.mxu1 %v6666_v13  ;;  %6945 = vmatmul.mubr.bf16.gmra.mxu0 %v6666_v13  ;;  %v10515_v13 = vld [vmem:[#allocation12 + $0x180] ss:$8 sps:$4 sm:$0xff]  }
0x20fd   :  { %7457 = vmatpush1.bf16.msra.mxu0 %v10437_v26  ;;  %7404 = vmatpush1.bf16.msra.mxu1 %v10440_v11  ;;  %v10518_v26 = vld [vmem:[#allocation12 + $0x80] ss:$8 sps:$4 sm:$0xff]   ;;  %v10520_v11 = vld [vmem:[#allocation12 + $0x84] ss:$8 sps:$4 sm:$0xff]  }
0x20fe   :  { %7458 = vmatprep.subr.bf16.mxu0 %v10445_v12  ;;  %7405 = vmatprep.subr.bf16.mxu1 %v10448_v53  ;;  %v10523_v12 = vld [vmem:[#allocation13 + $0x74] ss:$8 sps:$4 sm:$0xff]   ;;  %v11816_v53 = vld [vmem:[#allocation16] sm:$0xf] }
0x2101   :  { %7459 = vmatpush1.bf16.msra.mxu0 %v10443_v0  ;;  %7406 = vmatpush1.bf16.msra.mxu1 %v10446_v33 }
0x2102   :  { %7460 = vmatprep.subr.bf16.mxu0 %v10451_v32  ;;  %7407 = vmatprep.subr.bf16.mxu1 %v10454_v2  ;;  %v6672_v32 = vrot.slane %v11816_v53, %v11113_v51  ;;  %v6676_v2 = vrot.slane %v11816_v53, %v11160_v30 }
0x2105   :  { %7461 = vmatpush1.bf16.msra.mxu0 %v10449_v9  ;;  %7408 = vmatpush1.bf16.msra.mxu1 %v10452_v5 }
0x2106   :  { %7462 = vmatprep.subr.bf16.mxu0 %v10457_v58  ;;  %7409 = vmatprep.subr.bf16.mxu1 %v10460_v27 }
0x2109   :  { %7463 = vmatpush1.bf16.msra.mxu0 %v10455_v43  ;;  %7410 = vmatpush1.bf16.msra.mxu1 %v10458_v38 }
0x210a   :  { %7464 = vmatprep.subr.bf16.mxu0 %v10463_v59  ;;  %7411 = vmatprep.subr.bf16.mxu1 %v10466_v4 }
0x210d   :  { %7465 = vmatpush1.bf16.msra.mxu0 %v10461_v24  ;;  %7412 = vmatpush1.bf16.msra.mxu1 %v10464_v22 }
0x210e   :  { %7466 = vmatprep.subr.bf16.mxu0 %v10469_v34  ;;  %7413 = vmatprep.subr.bf16.mxu1 %v10472_v37 }
0x2111   :  { %7467 = vmatpush1.bf16.msra.mxu0 %v10467_v39  ;;  %7414 = vmatpush1.bf16.msra.mxu1 %v10470_v23 }
0x2112   :  { %7468 = vmatprep.subr.bf16.mxu0 %v10475_v16  ;;  %7415 = vmatprep.subr.bf16.mxu1 %v10478_v1 }
0x2115   :  { %7469 = vmatpush2.bf16.msra.mxu0 %v10473_v44  ;;  %7416 = vmatpush2.bf16.msra.mxu1 %v10476_v48 }
0x2116   :  { %7470 = vmatprep.subr.bf16.mxu0 %v10481_v49  ;;  %7417 = vmatprep.subr.bf16.mxu1 %v10484_v21 }
0x2119   :  { %7471 = vmatpush2.bf16.msra.mxu0 %v10479_v14  ;;  %7418 = vmatpush2.bf16.msra.mxu1 %v10482_v20 }
0x211a   :  { %7472 = vmatprep.subr.bf16.mxu0 %v10487_v62  ;;  %7419 = vmatprep.subr.bf16.mxu1 %v10490_v61 }
0x211d   :  { %7473 = vmatpush2.bf16.msra.mxu0 %v10485_v17  ;;  %7420 = vmatpush2.bf16.msra.mxu1 %v10488_v60 }
0x211e   :  { %7474 = vmatprep.subr.bf16.mxu0 %v10493_v8  ;;  %7421 = vmatprep.subr.bf16.mxu1 %v10496_v3 }
0x2121   :  { %7475 = vmatpush2.bf16.msra.mxu0 %v10491_v41  ;;  %7422 = vmatpush2.bf16.msra.mxu1 %v10494_v29 }
0x2122   :  { %7476 = vmatprep.subr.bf16.mxu0 %v10499_v28  ;;  %7423 = vmatprep.subr.bf16.mxu1 %v10502_v57 }
0x2125   :  { %7477 = vmatpush2.bf16.msra.mxu0 %v10497_v35  ;;  %7424 = vmatpush2.bf16.msra.mxu1 %v10500_v10 }
0x2126   :  { %7478 = vmatprep.subr.bf16.mxu0 %v10505_v63  ;;  %7425 = vmatprep.subr.bf16.mxu1 %v10508_v50 }
0x2129   :  { %7479 = vmatpush2.bf16.msra.mxu0 %v10503_v25  ;;  %7426 = vmatpush2.bf16.msra.mxu1 %v10506_v40 }
0x212a   :  { %7480 = vmatprep.subr.bf16.mxu0 %v10511_v55  ;;  %7427 = vmatprep.subr.bf16.mxu1 %v10514_v6 }
0x212d   :  { %7481 = vmatpush2.bf16.msra.mxu0 %v10509_v18  ;;  %7428 = vmatpush2.bf16.msra.mxu1 %v10512_v7 }
0x212e   :  { %7482 = vmatprep.subr.bf16.mxu0 %v10517_v31  ;;  %7429 = vmatprep.subr.bf16.mxu1 %v10520_v11 }
0x2131   :  { %7483 = vmatpush2.bf16.msra.mxu0 %v10515_v13  ;;  %7430 = vmatpush2.bf16.msra.mxu1 %v10518_v26 }
0x2132   :  { %7721 = vmatprep.subr.bf16.mxu1 %v10523_v12  ;;  %v10521_v12 = vld [vmem:[#allocation13 + $0x70] ss:$8 sps:$4 sm:$0xff]  }
0x21b3   :  { %v6883_v0 = vpop.f32.mrf.mxu1 }
0x21b4   :  { %v6884_v43 = vadd.f32 %v6883_v0, %v6672_v32 }
0x21b5   :  { %v6885_v33 = vpop.f32.mrf.mxu1 }
0x21b6   :  { %v6886_v38 = vadd.f32 %v6885_v33, %v6676_v2  ;;  %v6955_v23 = vmax.f32 %v6884_v43, 0.0 }
0x21b7   :  { %v6887_v9 = vpop.f32.mrf.mxu1 }
0x21b8   :  { %v6888_v5 = vadd.f32 %v6887_v9, %v6672_v32  ;;  %v6956_v16 = vmax.f32 %v6886_v38, 0.0  ;;  %v7028_v60 = vrot.slane %v6955_v23, 4  ;;  %v10524_v9 = vld [vmem:[#allocation13 + $0x60] ss:$8 sps:$4 sm:$0xff]   ;;  %v10532_v38 = vld [vmem:[#allocation13 + $0x44] ss:$8 sps:$4 sm:$0xff]  }
0x21b9   :  { %v6889_v58 = vpop.f32.mrf.mxu1  ;;  %v10542_v23 = vld [vmem:[#allocation13] ss:$8 sps:$4 sm:$0xff]  }
0x21ba   :  { %v6890_v27 = vadd.f32 %v6889_v58, %v6676_v2  ;;  %v6957_v4 = vmax.f32 %v6888_v5, 0.0  ;;  %v7029_v41 = vrot.slane %v6956_v16, 4  ;;  %v10529_v58 = vld [vmem:[#allocation13 + $0x54] ss:$8 sps:$4 sm:$0xff]  }
0x21bb   :  { %v6893_v59 = vpop.f32.mrf.mxu1  ;;  %v10547_v16 = vld [vmem:[#allocation13 + $0xf4] ss:$8 sps:$4 sm:$0xff]  }
0x21bc   :  { %v6894_v24 = vadd.f32 %v6893_v59, %v6672_v32  ;;  %v6958_v22 = vmax.f32 %v6890_v27, 0.0  ;;  %v7030_v44 = vrot.slane %v6957_v4, 4  ;;  %v10530_v59 = vld [vmem:[#allocation13 + $0x40] ss:$8 sps:$4 sm:$0xff]   ;;  %v10535_v4 = vld [vmem:[#allocation13 + $0x34] ss:$8 sps:$4 sm:$0xff]  }
0x21bd   :  { %v6895_v34 = vpop.f32.mrf.mxu1 }
0x21be   :  { %v6959_v37 = vmax.f32 %v6894_v24, 0.0  ;;  %v6896_v39 = vadd.f32 %v6895_v34, %v6676_v2  ;;  %v7031_v14 = vrot.slane %v6958_v22, 4  ;;  %v7040_v50 = vsel %vm4449_vm14, %v7028_v60, %v7030_v44  ;;  %v10533_v24 = vld [vmem:[#allocation13 + $0x30] ss:$8 sps:$4 sm:$0xff]   ;;  %v10538_v22 = vld [vmem:[#allocation13 + $0x24] ss:$8 sps:$4 sm:$0xff]  }
0x21bf   :  { %v6897_v1 = vpop.f32.mrf.mxu1  ;;  %v10536_v34 = vld [vmem:[#allocation13 + $0x20] ss:$8 sps:$4 sm:$0xff]  }
0x21c0   :  { %v7032_v48 = vrot.slane %v6959_v37, 4  ;;  %v6960_v49 = vmax.f32 %v6896_v39, 0.0  ;;  %v6898_v21 = vadd.f32 %v6897_v1, %v6672_v32  ;;  %v7041_v25 = vsel %vm4449_vm14, %v7029_v41, %v7031_v14  ;;  %v10526_v32 = vld [vmem:[#allocation13 + $0x64] ss:$8 sps:$4 sm:$0xff]   ;;  %v10541_v37 = vld [vmem:[#allocation13 + $0x14] ss:$8 sps:$4 sm:$0xff]  }
0x21c1   :  { %v6899_v20 = vpop.f32.mrf.mxu1  ;;  %v10544_v39 = vld [vmem:[#allocation13 + $0x4] ss:$8 sps:$4 sm:$0xff]   ;;  %v10545_v1 = vld [vmem:[#allocation13 + $0xf0] ss:$8 sps:$4 sm:$0xff]  }
0x21c2   :  { %v7038_v62 = vsel %vm4449_vm14, %v7030_v44, %v7032_v48  ;;  %v7033_v17 = vrot.slane %v6960_v49, 4  ;;  %v6961_v61 = vmax.f32 %v6898_v21, 0.0  ;;  %v6900_v8 = vadd.f32 %v6899_v20, %v6676_v2  ;;  %v10550_v44 = vld [vmem:[#allocation13 + $0xe4] ss:$8 sps:$4 sm:$0xff]   ;;  %v10553_v49 = vld [vmem:[#allocation13 + $0xd4] ss:$8 sps:$4 sm:$0xff]  }
0x21c3   :  { %v7054_v3 = vmul.f32 %v11628_v19, %v7038_v62  ;;  %v7048_v27 = vmul.f32 %v11641_v56, %v7038_v62  ;;  %v10551_v21 = vld [vmem:[#allocation13 + $0xd0] ss:$8 sps:$4 sm:$0xff]   ;;  %v10554_v20 = vld [vmem:[#allocation13 + $0xc0] ss:$8 sps:$4 sm:$0xff]   ;;  %v10559_v62 = vld [vmem:[#allocation13 + $0xb4] ss:$8 sps:$4 sm:$0xff]  }
0x21c4   :  { %v7039_v28 = vsel %vm4449_vm14, %v7031_v14, %v7033_v17  ;;  %v7034_v29 = vrot.slane %v6961_v61, 4  ;;  %v6962_v35 = vmax.f32 %v6900_v8, 0.0  ;;  %v10556_v14 = vld [vmem:[#allocation13 + $0xc4] ss:$8 sps:$4 sm:$0xff]   ;;  %v10560_v8 = vld [vmem:[#allocation13 + $0xa0] ss:$8 sps:$4 sm:$0xff]  }
0x21c5   :  { %v7055_v57 = vmul.f32 %v11628_v19, %v7039_v28  ;;  %v7062_v40 = vpack.c.bf16 %v7054_v3, %v7040_v50  ;;  %v7049_v11 = vmul.f32 %v11641_v56, %v7039_v28  ;;  %v10539_v56 = vld [vmem:[#allocation13 + $0x10] ss:$8 sps:$4 sm:$0xff]   ;;  %v10562_v61 = vld [vmem:[#allocation13 + $0xa4] ss:$8 sps:$4 sm:$0xff]   ;;  %v10566_v28 = vld [vmem:[#allocation13 + $0x80] ss:$8 sps:$4 sm:$0xff]  }
0x21c6   :  { %v7042_v63 = vsel %vm4449_vm14, %v7034_v29, %v7028_v60  ;;  %v7035_v10 = vrot.slane %v6962_v35, 4  ;;  %v10565_v60 = vld [vmem:[#allocation13 + $0x94] ss:$8 sps:$4 sm:$0xff]   ;;  %v10568_v3 = vld [vmem:[#allocation13 + $0x84] ss:$8 sps:$4 sm:$0xff]  }
0x21c7   :  { %v7063_v55 = vpack.c.bf16 %v7055_v57, %v7041_v25  ;;  %v7044_v18 = vmul.f32 %v11620_v54, %v7042_v63  ;;  %v7058_v0 = vmul.f32 %v11623_v15, %v7042_v63  ;;  %v10571_v35 = vld [vmem:[#allocation15 + $0x74] ss:$8 sps:$4 sm:$0xff]   ;;  %v10574_v57 = vld [vmem:[#allocation15 + $0x64] ss:$8 sps:$4 sm:$0xff]   ;;  %v10572_v63 = vld [vmem:[#allocation15 + $0x60] ss:$8 sps:$4 sm:$0xff]  }
0x21c8   :  { %v7043_v6 = vsel %vm4449_vm14, %v7035_v10, %v7029_v41  ;;  %v7037_v7 = vsel %vm4449_vm14, %v7033_v17, %v7035_v10  ;;  %v10557_v17 = vld [vmem:[#allocation13 + $0xb0] ss:$8 sps:$4 sm:$0xff]   ;;  %8094 = vmatprep.subr.bf16.mxu0 %v10571_v35  ;;  %v10577_v10 = vld [vmem:[#allocation15 + $0x54] ss:$8 sps:$4 sm:$0xff]  }
0x21c9   :  { %7484 = vmatprep.mubr.bf16.mxu0 %v7063_v55  ;;  %v7045_v19 = vmul.f32 %v11620_v54, %v7043_v6  ;;  %v7059_v31 = vmul.f32 %v11623_v15, %v7043_v6  ;;  %v7060_v33 = vpack.c.bf16 %v7040_v50, %v7044_v18  ;;  %v7065_v2 = vpack.c.bf16 %v7037_v7, %v7049_v11  ;;  %v10527_v15 = vld [vmem:[#allocation13 + $0x50] ss:$8 sps:$4 sm:$0xff]   ;;  %v10580_v50 = vld [vmem:[#allocation15 + $0x44] ss:$8 sps:$4 sm:$0xff]   ;;  %v10578_v55 = vld [vmem:[#allocation15 + $0x40] ss:$8 sps:$4 sm:$0xff]  }
0x21ca   :  { %7485 = vmatmul.mubr.bf16.vlgmr.msra.gmra.mxu0 %v7062_v40  ;;  %v7036_v54 = vsel %vm4449_vm14, %v7032_v48, %v7034_v29  ;;  %v10548_v48 = vld [vmem:[#allocation13 + $0xe0] ss:$8 sps:$4 sm:$0xff]   ;;  %v10563_v41 = vld [vmem:[#allocation13 + $0x90] ss:$8 sps:$4 sm:$0xff]   ;;  %v10583_v40 = vld [vmem:[#allocation15 + $0x34] ss:$8 sps:$4 sm:$0xff]  }
0x21cb   :  { %v7061_v13 = vpack.c.bf16 %v7041_v25, %v7045_v19  ;;  %v7067_v26 = vpack.c.bf16 %v7059_v31, %v7037_v7  ;;  %v7066_v5 = vpack.c.bf16 %v7058_v0, %v7036_v54  ;;  %v7064_v43 = vpack.c.bf16 %v7036_v54, %v7048_v27  ;;  %v10569_v29 = vld [vmem:[#allocation15 + $0x70] ss:$8 sps:$4 sm:$0xff]   ;;  %v10586_v6 = vld [vmem:[#allocation15 + $0x24] ss:$8 sps:$4 sm:$0xff]   ;;  %v10584_v19 = vld [vmem:[#allocation15 + $0x20] ss:$8 sps:$4 sm:$0xff]   ;;  %v11846_v31 = vpop.f32.mrf.mxu0 }
0x21cc   :  { %8095 = vmatpush1.bf16.msra.mxu0 %v10569_v29  ;;  %v10575_v25 = vld [vmem:[#allocation15 + $0x50] ss:$8 sps:$4 sm:$0xff]  }
0x21cd   :  { %7431 = vmatprep.mubr.bf16.mxu1 %v7061_v13  ;;  %7494 = vmatprep.mubr.bf16.mxu0 %v7067_v26  ;;  %v10581_v18 = vld [vmem:[#allocation15 + $0x30] ss:$8 sps:$4 sm:$0xff]   ;;  %v11848_v7 = vpop.f32.mrf.mxu0 }
0x21ce   :  { %7432 = vmatmul.mubr.bf16.vlgmr.msra.gmra.mxu1 %v7060_v33  ;;  %8096 = vmatprep.subr.bf16.mxu0 %v10574_v57 }
0x21cf   :  { %7441 = vmatprep.mubr.bf16.mxu1 %v7065_v2  ;;  %7722 = vmatpush1.bf16.msra.mxu1 %v10521_v12  ;;  %v11850_v13 = vpop.f32.mrf.mxu0  ;;  %v7027_v2 = vld [vmem:[%s11909_s12] sm:$0x3] }
0x21d0   :  { %7723 = vmatprep.subr.bf16.mxu1 %v10526_v32  ;;  %8097 = vmatpush1.bf16.msra.mxu0 %v10572_v63 }
0x21d1   :  { %8098 = vmatprep.subr.bf16.mxu0 %v10577_v10  ;;  %v11852_v26 = vpop.f32.mrf.mxu0 }
0x21d2   :  { %7495 = vmatmul.mubr.bf16.gmra.mxu0 %v7066_v5  ;;  %v7072_v5 = vrot.slane %v7027_v2, %v11113_v51 }
0x21d3   :  { %7724 = vmatpush1.bf16.msra.mxu1 %v10524_v9  ;;  %v11854_v11 = vpop.f32.mrf.mxu0  ;;  %v7076_v9 = vrot.slane %v7027_v2, %v11160_v30  ;;  %v10587_v2 = vld [vmem:[#allocation15 + $0x10] ss:$8 sps:$4 sm:$0xff]  }
0x21d4   :  { %7725 = vmatprep.subr.bf16.mxu1 %v10529_v58  ;;  %8099 = vmatpush1.bf16.msra.mxu0 %v10575_v25 }
0x21d5   :  { %8100 = vmatprep.subr.bf16.mxu0 %v10580_v50  ;;  %v11856_v12 = vpop.f32.mrf.mxu0 }
0x21d6   :  { %7442 = vmatmul.mubr.bf16.gmra.mxu1 %v7064_v43 }
0x21d7   :  { %7726 = vmatpush1.bf16.msra.mxu1 %v10527_v15  ;;  %v11858_v0 = vpop.f32.mrf.mxu0 }
0x21d8   :  { %7727 = vmatprep.subr.bf16.mxu1 %v10532_v38  ;;  %8101 = vmatpush1.bf16.msra.mxu0 %v10578_v55 }
0x21d9   :  { %8102 = vmatprep.subr.bf16.mxu0 %v10583_v40  ;;  %v11860_v33 = vpop.f32.mrf.mxu0 }
0x21db   :  { %7728 = vmatpush1.bf16.msra.mxu1 %v10530_v59 }
0x21dc   :  { %7729 = vmatprep.subr.bf16.mxu1 %v10535_v4  ;;  %8103 = vmatpush1.bf16.msra.mxu0 %v10581_v18 }
0x21dd   :  { %8104 = vmatprep.subr.bf16.mxu0 %v10586_v6 }
0x21df   :  { %7730 = vmatpush1.bf16.msra.mxu1 %v10533_v24 }
0x21e0   :  { %7731 = vmatprep.subr.bf16.mxu1 %v10538_v22  ;;  %8105 = vmatpush1.bf16.msra.mxu0 %v10584_v19 }
0x21e3   :  { %7732 = vmatpush1.bf16.msra.mxu1 %v10536_v34 }
0x21e4   :  { %7733 = vmatprep.subr.bf16.mxu1 %v10541_v37 }
0x21e7   :  { %7734 = vmatpush1.bf16.msra.mxu1 %v10539_v56 }
0x21e8   :  { %7735 = vmatprep.subr.bf16.mxu1 %v10544_v39 }
0x21eb   :  { %7736 = vmatpush1.bf16.msra.mxu1 %v10542_v23 }
0x21ec   :  { %7737 = vmatprep.subr.bf16.mxu1 %v10547_v16 }
0x21ef   :  { %7738 = vmatpush2.bf16.msra.mxu1 %v10545_v1 }
0x21f0   :  { %7739 = vmatprep.subr.bf16.mxu1 %v10550_v44 }
0x21f3   :  { %7740 = vmatpush2.bf16.msra.mxu1 %v10548_v48 }
0x21f4   :  { %7741 = vmatprep.subr.bf16.mxu1 %v10553_v49 }
0x21f7   :  { %7742 = vmatpush2.bf16.msra.mxu1 %v10551_v21 }
0x21f8   :  { %7743 = vmatprep.subr.bf16.mxu1 %v10556_v14 }
0x21fb   :  { %7744 = vmatpush2.bf16.msra.mxu1 %v10554_v20 }
0x21fc   :  { %7745 = vmatprep.subr.bf16.mxu1 %v10559_v62 }
0x21ff   :  { %7746 = vmatpush2.bf16.msra.mxu1 %v10557_v17 }
0x2200   :  { %7747 = vmatprep.subr.bf16.mxu1 %v10562_v61 }
0x2203   :  { %7748 = vmatpush2.bf16.msra.mxu1 %v10560_v8 }
0x2204   :  { %7749 = vmatprep.subr.bf16.mxu1 %v10565_v60 }
0x2207   :  { %7750 = vmatpush2.bf16.msra.mxu1 %v10563_v41 }
0x2208   :  { %7751 = vmatprep.subr.bf16.mxu1 %v10568_v3 }
0x220b   :  { %7752 = vmatpush2.bf16.msra.mxu1 %v10566_v28 }
0x228a   :  { %v7486_v32 = vpop.f32.mrf.mxu0 }
0x228c   :  { %v7488_v54 = vpop.f32.mrf.mxu0 }
0x228e   :  { %v7433_v58 = vpop.f32.mrf.mxu1  ;;  %v7490_v27 = vpop.f32.mrf.mxu0 }
0x228f   :  { %v7434_v59 = vadd.f32 %v7433_v58, %v7072_v5  ;;  %v10593_v58 = vld [vmem:[#allocation15 + $0xf0] ss:$8 sps:$4 sm:$0xff]  }
0x2290   :  { %v7435_v15 = vpop.f32.mrf.mxu1  ;;  %v7492_v43 = vpop.f32.mrf.mxu0 }
0x2291   :  { %v7436_v38 = vadd.f32 %v7435_v15, %v7076_v9  ;;  %v7487_v23 = vadd.f32 %v7486_v32, %v7434_v59  ;;  %v10589_v32 = vld [vmem:[#allocation15 + $0x14] ss:$8 sps:$4 sm:$0xff]   ;;  %v10596_v15 = vld [vmem:[#allocation15 + $0xe0] ss:$8 sps:$4 sm:$0xff]   ;;  %v10604_v59 = vld [vmem:[#allocation15 + $0xc4] ss:$8 sps:$4 sm:$0xff]  }
0x2292   :  { %v7437_v4 = vpop.f32.mrf.mxu1  ;;  %v7496_v24 = vpop.f32.mrf.mxu0  ;;  %8106 = vmatprep.subr.bf16.mxu0 %v10589_v32 }
0x2293   :  { %v7438_v22 = vadd.f32 %v7437_v4, %v7072_v5  ;;  %v7489_v37 = vadd.f32 %v7488_v54, %v7436_v38  ;;  %v7505_v62 = vmax.f32 %v7487_v23, 0.0  ;;  %8107 = vmatpush1.bf16.msra.mxu0 %v10587_v2  ;;  %v10592_v54 = vld [vmem:[#allocation15 + $0x4] ss:$8 sps:$4 sm:$0xff]   ;;  %v10599_v38 = vld [vmem:[#allocation15 + $0xd0] ss:$8 sps:$4 sm:$0xff]   ;;  %v7815_v2 = vand.u32 3, %v11104_v46 }
0x2294   :  { %v7439_v34 = vpop.f32.mrf.mxu1  ;;  %v7498_v16 = vpop.f32.mrf.mxu0  ;;  %8108 = vmatprep.subr.bf16.mxu0 %v10592_v54  ;;  %v10602_v4 = vld [vmem:[#allocation15 + $0xc0] ss:$8 sps:$4 sm:$0xff]   ;;  %v10616_v23 = vld [vmem:[#allocation15 + $0x84] ss:$8 sps:$4 sm:$0xff]  }
0x2295   :  { %v7491_v56 = vadd.f32 %v7490_v27, %v7438_v22  ;;  %v7440_v39 = vadd.f32 %v7439_v34, %v7076_v9  ;;  %v7506_v21 = vmax.f32 %v7489_v37, 0.0  ;;  %v10598_v27 = vld [vmem:[#allocation15 + $0xe4] ss:$8 sps:$4 sm:$0xff]   ;;  %v10605_v22 = vld [vmem:[#allocation15 + $0xb0] ss:$8 sps:$4 sm:$0xff]   ;;  %vm7841_vm4 = vcmp.eq.s32.totalorder %v7815_v2, 0 }
0x2296   :  { %v7443_v1 = vpop.f32.mrf.mxu1  ;;  %v7500_v61 = vpop.f32.mrf.mxu0  ;;  %v10610_v34 = vld [vmem:[#allocation15 + $0xa4] ss:$8 sps:$4 sm:$0xff]   ;;  %v10608_v37 = vld [vmem:[#allocation15 + $0xa0] ss:$8 sps:$4 sm:$0xff]  }
0x2297   :  { %v7493_v44 = vadd.f32 %v7492_v43, %v7440_v39  ;;  %v7507_v48 = vmax.f32 %v7491_v56, 0.0  ;;  %v7444_v17 = vadd.f32 %v7443_v1, %v7072_v5  ;;  %v10601_v43 = vld [vmem:[#allocation15 + $0xd4] ss:$8 sps:$4 sm:$0xff]   ;;  %v10611_v39 = vld [vmem:[#allocation15 + $0x90] ss:$8 sps:$4 sm:$0xff]   ;;  %v6679_v1 = vsub.s32 2, %v11094_v36 }
0x2298   :  { %v7445_v49 = vpop.f32.mrf.mxu1  ;;  %v7502_v10 = vpop.f32.mrf.mxu0  ;;  %v10613_v56 = vld [vmem:[#allocation15 + $0x94] ss:$8 sps:$4 sm:$0xff]  }
0x2299   :  { %v7508_v14 = vmax.f32 %v7493_v44, 0.0  ;;  %v7446_v20 = vadd.f32 %v7445_v49, %v7076_v9  ;;  %v7545_v3 = vpack.c.bf16 %v7507_v48, %v7505_v62  ;;  %v7497_v63 = vadd.f32 %v7496_v24, %v7444_v17  ;;  %v10607_v24 = vld [vmem:[#allocation15 + $0xb4] ss:$8 sps:$4 sm:$0xff]   ;;  %v7549_v44 = vld [vmem:[#allocation18] sm:$0x3] }
0x229a   :  { %v7447_v8 = vpop.f32.mrf.mxu1  ;;  %v6683_v48 = vsub.s32 3, %v11094_v36  ;;  %v6680_v49 = vrot.slane %v11816_v53, %v6679_v1 }
0x229b   :  { %v7448_v60 = vadd.f32 %v7447_v8, %v7072_v5  ;;  %v7546_v41 = vpack.c.bf16 %v7508_v14, %v7506_v21  ;;  %v7499_v29 = vadd.f32 %v7498_v16, %v7446_v20  ;;  %v7509_v18 = vmax.f32 %v7497_v63, 0.0  ;;  %v10590_v5 = vld [vmem:[#allocation15] ss:$8 sps:$4 sm:$0xff]  }
0x229c   :  { %v7449_v28 = vpop.f32.mrf.mxu1  ;;  %8109 = vmatpush1.bf16.msra.mxu0 %v10590_v5  ;;  %v10614_v16 = vld [vmem:[#allocation15 + $0x80] ss:$8 sps:$4 sm:$0xff]   ;;  %v7554_v21 = vrot.slane %v7549_v44, %v11113_v51  ;;  %v6684_v14 = vrot.slane %v11816_v53, %v6683_v48  ;;  %v7558_v20 = vrot.slane %v7549_v44, %v11160_v30  ;;  %v6937_v17 = vadd.f32 %v11846_v31, %v6680_v49 }
0x229d   :  { %v7501_v35 = vadd.f32 %v7500_v61, %v7448_v60  ;;  %v7450_v57 = vadd.f32 %v7449_v28, %v7076_v9  ;;  %7753 = vmatprep.mubr.bf16.mxu1 %v7546_v41  ;;  %v7510_v55 = vmax.f32 %v7499_v29, 0.0  ;;  %v10595_v9 = vld [vmem:[#allocation15 + $0xf4] ss:$8 sps:$4 sm:$0xff]   ;;  %v7794_v8 = vand.u32 3, %v11102_v45 }
0x229e   :  { %7754 = vmatmul.mubr.bf16.vlgmr.msra.gmra.mxu1 %v7545_v3  ;;  %8110 = vmatprep.subr.bf16.mxu0 %v10595_v9  ;;  %v7801_v60 = vand.u32 3, %v11098_v42  ;;  %v6939_v3 = vadd.f32 %v11848_v7, %v6684_v14  ;;  %v6941_v29 = vadd.f32 %v11850_v13, %v6680_v49  ;;  %v6943_v31 = vadd.f32 %v11852_v26, %v6684_v14 }
0x229f   :  { %v7503_v25 = vadd.f32 %v7502_v10, %v7450_v57  ;;  %v7511_v50 = vmax.f32 %v7501_v35, 0.0  ;;  %vm7838_vm1 = vcmp.eq.s32.totalorder %v7794_v8, 0 }
0x22a0   :  { %8111 = vmatpush2.bf16.msra.mxu0 %v10593_v58  ;;  %vm7839_vm2 = vcmp.eq.s32.totalorder %v7801_v60, 0  ;;  %v7842_v42 = vsel %vm7838_vm1, 0.25, %v10893_v52  ;;  %v6949_v58 = vadd.f32 %v11856_v12, %v6684_v14 }
0x22a1   :  { %v7512_v40 = vmax.f32 %v7503_v25, 0.0  ;;  %v7547_v19 = vpack.c.bf16 %v7511_v50, %v7509_v18  ;;  %8112 = vmatprep.subr.bf16.mxu0 %v10598_v27  ;;  %v7843_v50 = vsel %vm7839_vm2, 0.25, %v10893_v52 }
0x22a3   :  { %v7548_v6 = vpack.c.bf16 %v7512_v40, %v7510_v55 }
0x22a4   :  { %8113 = vmatpush2.bf16.msra.mxu0 %v10596_v15 }
0x22a5   :  { %7763 = vmatprep.mubr.bf16.mxu1 %v7548_v6  ;;  %8114 = vmatprep.subr.bf16.mxu0 %v10601_v43  ;;  %v6947_v6 = vadd.f32 %v11854_v11, %v6680_v49  ;;  %v6951_v43 = vadd.f32 %v11858_v0, %v6680_v49  ;;  %v7845_v0 = vsel %vm7841_vm4, 0.25, %v10893_v52 }
0x22a6   :  { %7764 = vmatmul.mubr.bf16.gmra.mxu1 %v7547_v19  ;;  %v7808_v19 = vand.u32 3, %v11106_v47 }
0x22a8   :  { %8115 = vmatpush2.bf16.msra.mxu0 %v10599_v38  ;;  %vm7840_vm3 = vcmp.eq.s32.totalorder %v7808_v19, 0  ;;  %v7922_v19 = vld [vmem:[#allocation19] sm:$0x3] }
0x22a9   :  { %8116 = vmatprep.subr.bf16.mxu0 %v10604_v59  ;;  %v7931_v2 = vrot.slane %v7922_v19, %v11160_v30 }
0x22ac   :  { %8117 = vmatpush2.bf16.msra.mxu0 %v10602_v4 }
0x22ad   :  { %8118 = vmatprep.subr.bf16.mxu0 %v10607_v24 }
0x22b0   :  { %8119 = vmatpush2.bf16.msra.mxu0 %v10605_v22 }
0x22b1   :  { %8120 = vmatprep.subr.bf16.mxu0 %v10610_v34  ;;  %v6953_v34 = vadd.f32 %v11860_v33, %v6684_v14 }
0x22b4   :  { %8121 = vmatpush2.bf16.msra.mxu0 %v10608_v37 }
0x22b5   :  { %8122 = vmatprep.subr.bf16.mxu0 %v10613_v56 }
0x22b8   :  { %8123 = vmatpush2.bf16.msra.mxu0 %v10611_v39 }
0x22b9   :  { %8124 = vmatprep.subr.bf16.mxu0 %v10616_v23  ;;  %v7844_v23 = vsel %vm7840_vm3, 0.25, %v10893_v52 }
0x22bc   :  { %8125 = vmatpush2.bf16.msra.mxu0 %v10614_v16 }
0x235e   :  { %v7755_v62 = vpop.f32.mrf.mxu1 }
0x235f   :  { %v7756_v61 = vadd.f32 %v7755_v62, %v7554_v21 }
0x2360   :  { %v7757_v41 = vpop.f32.mrf.mxu1 }
0x2361   :  { %v7774_v36 = vadd.f32 %v7756_v61, %v6937_v17  ;;  %v7758_v28 = vadd.f32 %v7757_v41, %v7558_v20 }
0x2362   :  { %v7759_v35 = vpop.f32.mrf.mxu1 }
0x2363   :  { %v7775_v53 = vadd.f32 %v7758_v28, %v6939_v3  ;;  %v7760_v57 = vadd.f32 %v7759_v35, %v7554_v21  ;;  %v7782_v10 = vmax.f32 %v7774_v36, 0.0 }
0x2364   :  { %v7761_v63 = vpop.f32.mrf.mxu1 }
0x2365   :  { %v7776_v25 = vadd.f32 %v7760_v57, %v6941_v29  ;;  %v7762_v45 = vadd.f32 %v7761_v63, %v7558_v20  ;;  %v7783_v55 = vmax.f32 %v7775_v53, 0.0  ;;  %v7846_v26 = vmul.f32 %v7842_v42, %v7782_v10 }
0x2366   :  { %v7765_v7 = vpop.f32.mrf.mxu1 }
0x2367   :  { %v7784_v40 = vmax.f32 %v7776_v25, 0.0  ;;  %v7777_v18 = vadd.f32 %v7762_v45, %v6943_v31  ;;  %v7766_v13 = vadd.f32 %v7765_v7, %v7554_v21  ;;  %v7847_v38 = vmul.f32 %v7842_v42, %v7783_v55 }
0x2368   :  { %v7767_v32 = vpop.f32.mrf.mxu1 }
0x2369   :  { %v7848_v54 = vmul.f32 %v7843_v50, %v7784_v40  ;;  %v7785_v5 = vmax.f32 %v7777_v18, 0.0  ;;  %v7768_v9 = vadd.f32 %v7767_v32, %v7558_v20  ;;  %v7778_v27 = vadd.f32 %v7766_v13, %v6947_v6 }
0x236a   :  { %v7769_v15 = vpop.f32.mrf.mxu1  ;;  %v7927_v32 = vrot.slane %v7922_v19, %v11113_v51 }
0x236b   :  { %v7854_v59 = vadd.f32 %v7848_v54, %v7846_v26  ;;  %v7849_v4 = vmul.f32 %v7843_v50, %v7785_v5  ;;  %v7779_v11 = vadd.f32 %v7768_v9, %v6949_v58  ;;  %v7770_v24 = vadd.f32 %v7769_v15, %v7554_v21 }
0x236c   :  { %v7771_v47 = vpop.f32.mrf.mxu1  ;;  %v7786_v37 = vmax.f32 %v7778_v27, 0.0 }
0x236d   :  { %v7855_v22 = vrot.slane %v7854_v59, 4  ;;  %v7861_v46 = vadd.f32 %v7849_v4, %v7847_v38  ;;  %v7780_v56 = vadd.f32 %v7770_v24, %v6951_v43  ;;  %v7772_v39 = vadd.f32 %v7771_v47, %v7558_v20 }
0x236e   :  { %v7787_v1 = vmax.f32 %v7779_v11, 0.0  ;;  %v7850_v21 = vmul.f32 %v7844_v23, %v7786_v37 }
0x236f   :  { %v7862_v12 = vrot.slane %v7861_v46, 4  ;;  %v7856_v16 = vadd.f32 %v7855_v22, %v7854_v59  ;;  %v7788_v44 = vmax.f32 %v7780_v56, 0.0  ;;  %v7781_v48 = vadd.f32 %v7772_v39, %v6953_v34 }
0x2370   :  { %v7851_v8 = vmul.f32 %v7844_v23, %v7787_v1 }
0x2371   :  { %v7863_v49 = vadd.f32 %v7862_v12, %v7861_v46  ;;  %v7852_v62 = vmul.f32 %v7845_v0, %v7788_v44  ;;  %v7789_v17 = vmax.f32 %v7781_v48, 0.0  ;;  %v7857_v61 = vrot.slane %v7856_v16, 2 }
0x2373   :  { %v7868_v60 = vadd.f32 %v7852_v62, %v7850_v21  ;;  %v7853_v33 = vmul.f32 %v7845_v0, %v7789_v17  ;;  %v7864_v14 = vrot.slane %v7863_v49, 2  ;;  %v7858_v3 = vadd.f32 %v7857_v61, %v7856_v16 }
0x2375   :  { %v7869_v41 = vrot.slane %v7868_v60, 4  ;;  %v7875_v20 = vadd.f32 %v7853_v33, %v7851_v8  ;;  %v7865_v29 = vadd.f32 %v7864_v14, %v7863_v49  ;;  %v7859_v53 = vrot.slane %v7858_v3, 1 }
0x2377   :  { %v7870_v36 = vadd.f32 %v7869_v41, %v7868_v60  ;;  %v7876_v28 = vrot.slane %v7875_v20, 4  ;;  %v7866_v31 = vrot.slane %v7865_v29, 1  ;;  %v7860_v45 = vadd.f32 %v7859_v53, %v7858_v3 }
0x2379   :  { %v7871_v52 = vrot.slane %v7870_v36, 2  ;;  %v7877_v35 = vadd.f32 %v7876_v28, %v7875_v20  ;;  %v7867_v7 = vadd.f32 %v7866_v31, %v7865_v29 }
0x237b   :  { %v7872_v57 = vadd.f32 %v7871_v52, %v7870_v36  ;;  %v7878_v63 = vrot.slane %v7877_v35, 2 }
0x237d   :  { %v7873_v10 = vrot.slane %v7872_v57, 1  ;;  %v7879_v25 = vadd.f32 %v7878_v63, %v7877_v35 }
0x237f   :  { %v7874_v42 = vadd.f32 %v7873_v10, %v7872_v57  ;;  %v7880_v50 = vrot.slane %v7879_v25, 1 }
0x2381   :  { %v7881_v55 = vadd.f32 %v7880_v50, %v7879_v25  ;;  %v7883_v40 = vsel %vm7882_vm5, %v7860_v45, %v7874_v42 }
0x2382   :  { %v8834_v6 = vpack.c.bf16 %v7883_v40, %v7883_v40 }
0x2383   :  { %v7884_v18 = vsel %vm7882_vm5, %v7867_v7, %v7881_v55 }
0x2384   :  { %v8831_v13 = vpack.c.bf16 %v7884_v18, %v7884_v18 }
0x2386   :  { %8832 = vmatprep.mubr.msk.bf16.mxu0 %vm8830_vm7, %v8831_v13 }
0x2387   :  { %8835 = vmatmul.mubr.msk.bf16.vlgmr.msra.gmra.mxu0 %vm8830_vm7, %v8834_v6 }
0x2447   :  { %v8128_v26 = vpop.f32.mrf.mxu0 }
0x2448   :  { %v8129_v54 = vadd.f32 %v8128_v26, %v7927_v32 }
0x2449   :  { %v8130_v5 = vpop.f32.mrf.mxu0 }
0x244a   :  { %v8135_v9 = vmax.f32 %v8129_v54, 0.0  ;;  %v8131_v58 = vadd.f32 %v8130_v5, %v7931_v2 }
0x244b   :  { %v8132_v27 = vpop.f32.mrf.mxu0 }
0x244c   :  { %8137 = vst [vmem:[%s11912_s15] sm:$0xff] %v8135_v9  ;;  %v8136_v15 = vmax.f32 %v8131_v58, 0.0 }
0x244d   :  { %v8133_v43 = vpop.f32.mrf.mxu0 }
0x244e   :  { %8138 = vst [vmem:[%s11912_s15 + $0x8] sm:$0xff] %v8136_v15 }
0x244f   :  { %8143 = vsyncpa [#allocation3], 1 }
0x2450   :  { %8144 = vsyncpa [#allocation5], 1 }
0x2451   :  { %8145 = vsyncpa [#allocation8], 1 }
0x2452   :  { %8146 = vsyncpa [#allocation11], 1 }
0x2453   :  { %8147 = vsyncpa [#allocation14], 1 }
0x2454   :  { %8148 = vsyncpa [#allocation17], 1 }
0x2455   :  { %8149 = vsyncpa [#allocation20], 1 }

</bundles_post_ra>
